<compile_context>
chip_gen: v6e
topology: v6e:2x2x1
jax: 0.10.0
libtpu: 0.0.40
codegen_flags: <defaults>
</compile_context>

<pallas_src>
import jax
import jax.numpy as jnp
import numpy as np
from jax.experimental import pallas as pl
from jax.experimental.pallas import tpu as pltpu

_B = 8  # samples per grid step (multiple of 8 keeps all reshapes layout-free)


# ----------------------------- fused Pallas kernel ---------------------------


def _lenet_kernel(x_ref, w1_ref, b1_ref, w2_ref, b2_ref,
                  f1w_ref, f1b_ref, f2w_ref, f2b_ref, f3w_ref, f3b_ref,
                  out_ref):
    B = x_ref.shape[1]
    f32 = jnp.float32
    x = x_ref[...]                                     # (32, B, 32)  [h, b, w]

    # ---- conv1 (5x5, 1->6): 5 banded MXU matmuls over the width axis.
    # Output column layout: even ow -> lane (ow//2)*6+c, odd ow -> 128+(ow//2)*6+c.
    acc1 = jnp.dot(x[0:28].reshape(28 * B, 32), w1_ref[0],
                   preferred_element_type=f32)         # (28B, 256)
    for i in range(1, 5):
        acc1 = acc1 + jnp.dot(x[i:i + 28].reshape(28 * B, 32), w1_ref[i],
                              preferred_element_type=f32)
    y1 = jnp.maximum(acc1 + b1_ref[...], 0.0)          # bias + ReLU
    y1 = y1.reshape(14, 2, B, 256)                     # free leading-dim split
    y1 = jnp.maximum(y1[:, 0], y1[:, 1])               # pool rows -> (14,B,256)
    p1 = jnp.maximum(y1[..., 0:84], y1[..., 128:212])  # pool cols -> (14,B,84)

    # ---- conv2 (5x5, 6->16): same banded scheme, K = 14*6 = 84.
    acc2 = jnp.dot(p1[0:10].reshape(10 * B, 84), w2_ref[0],
                   preferred_element_type=f32)         # (10B, 256)
    for i in range(1, 5):
        acc2 = acc2 + jnp.dot(p1[i:i + 10].reshape(10 * B, 84), w2_ref[i],
                              preferred_element_type=f32)
    y2 = jnp.maximum(acc2 + b2_ref[...], 0.0)
    y2 = y2.reshape(5, 2, B, 256)
    y2 = jnp.maximum(y2[:, 0], y2[:, 1])               # pool rows -> (5,B,256)
    p2 = jnp.maximum(y2[..., 0:80], y2[..., 128:208])  # pool cols -> (5,B,80)

    # ---- FC head, fully batched on the MXU.
    acc3 = f1b_ref[...]                                # (1,120), broadcasts
    for h in range(5):
        acc3 = acc3 + jnp.dot(p2[h], f1w_ref[h], preferred_element_type=f32)
    y = jnp.maximum(acc3, 0.0)                         # (B,120)
    y = jnp.maximum(jnp.dot(y, f2w_ref[...], preferred_element_type=f32)
                    + f2b_ref[...], 0.0)               # (B,84)
    y = jnp.dot(y, f3w_ref[...], preferred_element_type=f32) + f3b_ref[...]
    out_ref[...] = y.astype(out_ref.dtype)             # (B,128) lane-dense


# ------------------------------ wrappers -------------------------------------


def _const_spec(shape):
    zeros = (0,) * len(shape)
    return pl.BlockSpec(shape, lambda i, _z=zeros: _z)


def prepare_params(params):
    """One-time host-side weight re-layout (PyTorch layouts -> kernel layouts)."""
    f32 = np.float32
    c1w = np.asarray(params["conv1_w"], f32)           # (6,1,5,5)  [oc,ic,i,j]
    c1b = np.asarray(params["conv1_b"], f32)
    c2w = np.asarray(params["conv2_w"], f32)           # (16,6,5,5) [oc,ic,i,j]
    c2b = np.asarray(params["conv2_b"], f32)

    # conv1 band matrices, one per kernel row: (5, 32, 256).
    # Column layout encodes the pooling parity: even ow at p*6+c, odd ow at 128+p*6+c.
    w1 = np.zeros((5, 32, 256), f32)
    b1 = np.zeros((1, 256), f32)
    for ow in range(28):
        base = (ow % 2) * 128 + (ow // 2) * 6
        b1[0, base:base + 6] = c1b
        for i in range(5):
            for j in range(5):
                w1[i, ow + j, base:base + 6] = c1w[:, 0, i, j]

    # conv2 band matrices: (5, 84, 256); input lanes are w*6+c (w: 0..13),
    # output even ow at p*16+c2, odd ow at 128+p*16+c2.
    w2 = np.zeros((5, 84, 256), f32)
    b2 = np.zeros((1, 256), f32)
    for ow in range(10):
        base = (ow % 2) * 128 + (ow // 2) * 16
        b2[0, base:base + 16] = c2b
        for i in range(5):
            for j in range(5):
                w2[i, (ow + j) * 6:(ow + j + 1) * 6, base:base + 16] = \
                    c2w[:, :, i, j].T

    # fc1: fold the PyTorch NCHW flatten (k = c*25 + h*5 + w) plus the kernel's
    # (h, b, w*16+c) activation layout into the weight: (5, 80, 120).
    f1w = np.asarray(params["fc1_w"], f32).reshape(120, 16, 5, 5)
    f1w = np.transpose(f1w, (2, 3, 1, 0)).reshape(5, 80, 120)
    f2w = np.asarray(params["fc2_w"], f32).T            # (120, 84)
    # fc3 padded to 128 output lanes so the final store is lane-dense.
    f3w = np.zeros((84, 128), f32)
    f3w[:, :10] = np.asarray(params["fc3_w"], f32).T
    f3b = np.zeros((1, 128), f32)
    f3b[0, :10] = np.asarray(params["fc3_b"], f32)

    host = {
        "w1": w1, "b1": b1, "w2": w2, "b2": b2,
        "f1w": f1w, "f1b": np.asarray(params["fc1_b"], f32).reshape(1, 120),
        "f2w": f2w, "f2b": np.asarray(params["fc2_b"], f32).reshape(1, 84),
        "f3w": f3w, "f3b": f3b,
    }
    return {k: jnp.asarray(v) for k, v in host.items()}


def net_forward(prepared, x_nchw):
    nb, cin, hh, ww = x_nchw.shape
    assert (cin, hh, ww) == (1, 32, 32), "LeNet geometry requires 1x32x32 input"
    B = _B
    nb_pad = ((nb + B - 1) // B) * B
    # Layout plumbing in the wrapper: (N,1,32,32) -> (32, N_pad, 32) = [h, b, w]
    # so the batch fills the sublane axis inside the kernel.
    x = jnp.transpose(x_nchw[:, 0].astype(jnp.float32), (1, 0, 2))   # (32,N,32)
    if nb_pad != nb:
        x = jnp.pad(x, ((0, 0), (0, nb_pad - nb), (0, 0)))

    p = prepared
    weights = (p["w1"], p["b1"], p["w2"], p["b2"],
               p["f1w"], p["f1b"], p["f2w"], p["f2b"], p["f3w"], p["f3b"])

    in_specs = [pl.BlockSpec((32, B, 32), lambda i: (0, i, 0))]
    in_specs += [_const_spec(w.shape) for w in weights]

    n_steps = nb_pad // B
    flops_step = 2 * (5 * (28 * B) * 32 * 256 + 5 * (10 * B) * 84 * 256
                      + 5 * B * 80 * 120 + B * 120 * 84 + B * 84 * 128)
    w_bytes = int(sum(int(w.size) for w in weights)) * 4
    io_bytes_step = (32 * B * 32 + B * 128) * 4

    out = pl.pallas_call(
        _lenet_kernel,
        out_shape=jax.ShapeDtypeStruct((nb_pad, 128), jnp.float32),
        grid=(n_steps,),
        in_specs=in_specs,
        out_specs=pl.BlockSpec((B, 128), lambda i: (i, 0)),
        compiler_params=pltpu.CompilerParams(
            dimension_semantics=("parallel",)),
        cost_estimate=pl.CostEstimate(
            flops=flops_step * n_steps, transcendentals=0,
            bytes_accessed=w_bytes + io_bytes_step * n_steps),
    )(x, *weights)
    return out[:nb, :10]


# Pure-JAX reference (independent ops) used only as a correctness check.
def net_forward_ref(params, x_nchw):
    hp = jax.lax.Precision.HIGHEST

    def conv(x, w, b):
        y = jax.lax.conv_general_dilated(
            x, w, (1, 1), "VALID",
            dimension_numbers=("NCHW", "OIHW", "NCHW"), precision=hp)
        return jax.nn.relu(y + b[None, :, None, None])

    def pool(x):
        return jax.lax.reduce_window(
            x, -jnp.inf, jax.lax.max, (1, 1, 2, 2), (1, 1, 2, 2), "VALID")

    x = pool(conv(x_nchw, params["conv1_w"], params["conv1_b"]))
    x = pool(conv(x, params["conv2_w"], params["conv2_b"]))
    x = x.reshape(x.shape[0], -1)
    x = jax.nn.relu(jnp.dot(x, params["fc1_w"].T, precision=hp) + params["fc1_b"])
    x = jax.nn.relu(jnp.dot(x, params["fc2_w"].T, precision=hp) + params["fc2_b"])
    return jnp.dot(x, params["fc3_w"].T, precision=hp) + params["fc3_b"]


# ------------------------------ Param init ------------------------------------


def init_params(key):
    def uinit(k, shape, fan_in):
        bound = 1.0 / float(fan_in) ** 0.5
        return jax.random.uniform(k, shape, jnp.float32, -bound, bound)

    ks = jax.random.split(key, 10)
    p = {}
    p["conv1_w"] = uinit(ks[0], (6, 1, 5, 5), 1 * 5 * 5)
    p["conv1_b"] = uinit(ks[1], (6,), 1 * 5 * 5)
    p["conv2_w"] = uinit(ks[2], (16, 6, 5, 5), 6 * 5 * 5)
    p["conv2_b"] = uinit(ks[3], (16,), 6 * 5 * 5)
    p["fc1_w"] = uinit(ks[4], (120, 400), 400)   # PyTorch (out, in) layout
    p["fc1_b"] = uinit(ks[5], (120,), 400)
    p["fc2_w"] = uinit(ks[6], (84, 120), 120)
    p["fc2_b"] = uinit(ks[7], (84,), 120)
    p["fc3_w"] = uinit(ks[8], (10, 84), 84)
    p["fc3_b"] = uinit(ks[9], (10,), 84)
    return p


if __name__ == "__main__":
    key = jax.random.PRNGKey(0)
    k_params, k_x = jax.random.split(key)
    params = init_params(k_params)
    # LeNet geometry requires 32x32 spatial input to reach 16*5*5 features.
    x = jax.random.normal(k_x, (2, 1, 32, 32), dtype=jnp.float32)

    prepared = prepare_params(params)            # one-time weight re-layout

    out = jax.block_until_ready(jax.jit(net_forward)(prepared, x))
    assert out.shape == (2, 10), out.shape

    ref = jax.block_until_ready(net_forward_ref(params, x))
    assert jnp.allclose(out, ref, rtol=1e-4, atol=2e-4), (
        float(jnp.max(jnp.abs(out - ref))))

    print("KERNEL_OK")
</pallas_src>

<mosaic_0001>
module attributes {stable_mosaic.version = 11 : i64} {
  func.func @_lenet_kernel(%arg0: i32, %arg1: memref<32x8x32xf32, #tpu.memory_space<vmem>>, %arg2: memref<5x32x256xf32, #tpu.memory_space<vmem>>, %arg3: memref<1x256xf32, #tpu.memory_space<vmem>>, %arg4: memref<5x84x256xf32, #tpu.memory_space<vmem>>, %arg5: memref<1x256xf32, #tpu.memory_space<vmem>>, %arg6: memref<5x80x120xf32, #tpu.memory_space<vmem>>, %arg7: memref<1x120xf32, #tpu.memory_space<vmem>>, %arg8: memref<120x84xf32, #tpu.memory_space<vmem>>, %arg9: memref<1x84xf32, #tpu.memory_space<vmem>>, %arg10: memref<84x128xf32, #tpu.memory_space<vmem>>, %arg11: memref<1x128xf32, #tpu.memory_space<vmem>>, %arg12: memref<8x128xf32, #tpu.memory_space<vmem>>) attributes {dimension_semantics = [#tpu.dimension_semantics<parallel>], iteration_bounds = array<i64: 1>, scalar_prefetch = 0 : i64, scratch_operands = 0 : i64, tpu.core_type = #tpu.core_type<tc>, window_params = [{transform_indices = @transform_0, window_bounds = array<i64: 32, 8, 32>}, {pipeline_mode = #tpu.pipeline_mode<synchronous>, transform_indices = @transform_1, window_bounds = array<i64: 5, 32, 256>}, {pipeline_mode = #tpu.pipeline_mode<synchronous>, transform_indices = @transform_2, window_bounds = array<i64: 1, 256>}, {pipeline_mode = #tpu.pipeline_mode<synchronous>, transform_indices = @transform_3, window_bounds = array<i64: 5, 84, 256>}, {pipeline_mode = #tpu.pipeline_mode<synchronous>, transform_indices = @transform_4, window_bounds = array<i64: 1, 256>}, {pipeline_mode = #tpu.pipeline_mode<synchronous>, transform_indices = @transform_5, window_bounds = array<i64: 5, 80, 120>}, {pipeline_mode = #tpu.pipeline_mode<synchronous>, transform_indices = @transform_6, window_bounds = array<i64: 1, 120>}, {pipeline_mode = #tpu.pipeline_mode<synchronous>, transform_indices = @transform_7, window_bounds = array<i64: 120, 84>}, {pipeline_mode = #tpu.pipeline_mode<synchronous>, transform_indices = @transform_8, window_bounds = array<i64: 1, 84>}, {pipeline_mode = #tpu.pipeline_mode<synchronous>, transform_indices = @transform_9, window_bounds = array<i64: 84, 128>}, {pipeline_mode = #tpu.pipeline_mode<synchronous>, transform_indices = @transform_10, window_bounds = array<i64: 1, 128>}, {transform_indices = @transform_11, window_bounds = array<i64: 8, 128>}]} {
    %c0 = arith.constant 0 : index
    %c0_0 = arith.constant 0 : index
    %c0_1 = arith.constant 0 : index
    %0 = vector.load %arg1[%c0, %c0_0, %c0_1] : memref<32x8x32xf32, #tpu.memory_space<vmem>>, vector<32x8x32xf32>
    %1 = vector.extract_strided_slice %0 {offsets = [0, 0, 0], sizes = [28, 8, 32], strides = [1, 1, 1]} : vector<32x8x32xf32> to vector<28x8x32xf32>
    %2 = vector.shape_cast %1 : vector<28x8x32xf32> to vector<224x32xf32>
    %c0_2 = arith.constant 0 : index
    %c0_3 = arith.constant 0 : index
    %c0_4 = arith.constant 0 : index
    %3 = vector.load %arg2[%c0_2, %c0_3, %c0_4] : memref<5x32x256xf32, #tpu.memory_space<vmem>>, vector<1x32x256xf32>
    %4 = vector.shape_cast %3 : vector<1x32x256xf32> to vector<32x256xf32>
    %cst = arith.constant dense<0.000000e+00> : vector<224x256xf32>
    %5 = tpu.matmul %2, %4, %cst {dimension_numbers = #tpu.dot_dimension_numbers<[1], [0], [0], [1], [0, 0, 1, 1], [], []>} : vector<224x32xf32>, vector<32x256xf32>, vector<224x256xf32> -> vector<224x256xf32>
    %6 = vector.extract_strided_slice %0 {offsets = [1, 0, 0], sizes = [28, 8, 32], strides = [1, 1, 1]} : vector<32x8x32xf32> to vector<28x8x32xf32>
    %7 = vector.shape_cast %6 : vector<28x8x32xf32> to vector<224x32xf32>
    %c1 = arith.constant 1 : index
    %c0_5 = arith.constant 0 : index
    %c0_6 = arith.constant 0 : index
    %8 = vector.load %arg2[%c1, %c0_5, %c0_6] : memref<5x32x256xf32, #tpu.memory_space<vmem>>, vector<1x32x256xf32>
    %9 = vector.shape_cast %8 : vector<1x32x256xf32> to vector<32x256xf32>
    %cst_7 = arith.constant dense<0.000000e+00> : vector<224x256xf32>
    %10 = tpu.matmul %7, %9, %cst_7 {dimension_numbers = #tpu.dot_dimension_numbers<[1], [0], [0], [1], [0, 0, 1, 1], [], []>} : vector<224x32xf32>, vector<32x256xf32>, vector<224x256xf32> -> vector<224x256xf32>
    %11 = arith.addf %5, %10 : vector<224x256xf32>
    %12 = vector.extract_strided_slice %0 {offsets = [2, 0, 0], sizes = [28, 8, 32], strides = [1, 1, 1]} : vector<32x8x32xf32> to vector<28x8x32xf32>
    %13 = vector.shape_cast %12 : vector<28x8x32xf32> to vector<224x32xf32>
    %c2 = arith.constant 2 : index
    %c0_8 = arith.constant 0 : index
    %c0_9 = arith.constant 0 : index
    %14 = vector.load %arg2[%c2, %c0_8, %c0_9] : memref<5x32x256xf32, #tpu.memory_space<vmem>>, vector<1x32x256xf32>
    %15 = vector.shape_cast %14 : vector<1x32x256xf32> to vector<32x256xf32>
    %cst_10 = arith.constant dense<0.000000e+00> : vector<224x256xf32>
    %16 = tpu.matmul %13, %15, %cst_10 {dimension_numbers = #tpu.dot_dimension_numbers<[1], [0], [0], [1], [0, 0, 1, 1], [], []>} : vector<224x32xf32>, vector<32x256xf32>, vector<224x256xf32> -> vector<224x256xf32>
    %17 = arith.addf %11, %16 : vector<224x256xf32>
    %18 = vector.extract_strided_slice %0 {offsets = [3, 0, 0], sizes = [28, 8, 32], strides = [1, 1, 1]} : vector<32x8x32xf32> to vector<28x8x32xf32>
    %19 = vector.shape_cast %18 : vector<28x8x32xf32> to vector<224x32xf32>
    %c3 = arith.constant 3 : index
    %c0_11 = arith.constant 0 : index
    %c0_12 = arith.constant 0 : index
    %20 = vector.load %arg2[%c3, %c0_11, %c0_12] : memref<5x32x256xf32, #tpu.memory_space<vmem>>, vector<1x32x256xf32>
    %21 = vector.shape_cast %20 : vector<1x32x256xf32> to vector<32x256xf32>
    %cst_13 = arith.constant dense<0.000000e+00> : vector<224x256xf32>
    %22 = tpu.matmul %19, %21, %cst_13 {dimension_numbers = #tpu.dot_dimension_numbers<[1], [0], [0], [1], [0, 0, 1, 1], [], []>} : vector<224x32xf32>, vector<32x256xf32>, vector<224x256xf32> -> vector<224x256xf32>
    %23 = arith.addf %17, %22 : vector<224x256xf32>
    %24 = vector.extract_strided_slice %0 {offsets = [4, 0, 0], sizes = [28, 8, 32], strides = [1, 1, 1]} : vector<32x8x32xf32> to vector<28x8x32xf32>
    %25 = vector.shape_cast %24 : vector<28x8x32xf32> to vector<224x32xf32>
    %c4 = arith.constant 4 : index
    %c0_14 = arith.constant 0 : index
    %c0_15 = arith.constant 0 : index
    %26 = vector.load %arg2[%c4, %c0_14, %c0_15] : memref<5x32x256xf32, #tpu.memory_space<vmem>>, vector<1x32x256xf32>
    %27 = vector.shape_cast %26 : vector<1x32x256xf32> to vector<32x256xf32>
    %cst_16 = arith.constant dense<0.000000e+00> : vector<224x256xf32>
    %28 = tpu.matmul %25, %27, %cst_16 {dimension_numbers = #tpu.dot_dimension_numbers<[1], [0], [0], [1], [0, 0, 1, 1], [], []>} : vector<224x32xf32>, vector<32x256xf32>, vector<224x256xf32> -> vector<224x256xf32>
    %29 = arith.addf %23, %28 : vector<224x256xf32>
    %c0_17 = arith.constant 0 : index
    %c0_18 = arith.constant 0 : index
    %30 = vector.load %arg3[%c0_17, %c0_18] : memref<1x256xf32, #tpu.memory_space<vmem>>, vector<1x256xf32>
    %31 = vector.broadcast %30 : vector<1x256xf32> to vector<224x256xf32>
    %32 = arith.addf %29, %31 : vector<224x256xf32>
    %cst_19 = arith.constant 0.000000e+00 : f32
    %33 = vector.broadcast %cst_19 : f32 to vector<224x256xf32>
    %34 = arith.maximumf %32, %33 : vector<224x256xf32>
    %35 = vector.shape_cast %34 : vector<224x256xf32> to vector<14x2x8x256xf32>
    %36 = vector.extract_strided_slice %35 {offsets = [0, 0, 0, 0], sizes = [14, 1, 8, 256], strides = [1, 1, 1, 1]} : vector<14x2x8x256xf32> to vector<14x1x8x256xf32>
    %37 = vector.shape_cast %36 : vector<14x1x8x256xf32> to vector<14x8x256xf32>
    %38 = vector.extract_strided_slice %35 {offsets = [0, 1, 0, 0], sizes = [14, 1, 8, 256], strides = [1, 1, 1, 1]} : vector<14x2x8x256xf32> to vector<14x1x8x256xf32>
    %39 = vector.shape_cast %38 : vector<14x1x8x256xf32> to vector<14x8x256xf32>
    %40 = arith.maximumf %37, %39 : vector<14x8x256xf32>
    %41 = vector.extract_strided_slice %40 {offsets = [0, 0, 0], sizes = [14, 8, 84], strides = [1, 1, 1]} : vector<14x8x256xf32> to vector<14x8x84xf32>
    %42 = vector.extract_strided_slice %40 {offsets = [0, 0, 128], sizes = [14, 8, 84], strides = [1, 1, 1]} : vector<14x8x256xf32> to vector<14x8x84xf32>
    %43 = arith.maximumf %41, %42 : vector<14x8x84xf32>
    %44 = vector.extract_strided_slice %43 {offsets = [0, 0, 0], sizes = [10, 8, 84], strides = [1, 1, 1]} : vector<14x8x84xf32> to vector<10x8x84xf32>
    %45 = vector.shape_cast %44 : vector<10x8x84xf32> to vector<80x84xf32>
    %c0_20 = arith.constant 0 : index
    %c0_21 = arith.constant 0 : index
    %c0_22 = arith.constant 0 : index
    %46 = vector.load %arg4[%c0_20, %c0_21, %c0_22] : memref<5x84x256xf32, #tpu.memory_space<vmem>>, vector<1x84x256xf32>
    %47 = vector.shape_cast %46 : vector<1x84x256xf32> to vector<84x256xf32>
    %cst_23 = arith.constant dense<0.000000e+00> : vector<80x256xf32>
    %48 = tpu.matmul %45, %47, %cst_23 {dimension_numbers = #tpu.dot_dimension_numbers<[1], [0], [0], [1], [0, 0, 1, 1], [], []>} : vector<80x84xf32>, vector<84x256xf32>, vector<80x256xf32> -> vector<80x256xf32>
    %49 = vector.extract_strided_slice %43 {offsets = [1, 0, 0], sizes = [10, 8, 84], strides = [1, 1, 1]} : vector<14x8x84xf32> to vector<10x8x84xf32>
    %50 = vector.shape_cast %49 : vector<10x8x84xf32> to vector<80x84xf32>
    %c1_24 = arith.constant 1 : index
    %c0_25 = arith.constant 0 : index
    %c0_26 = arith.constant 0 : index
    %51 = vector.load %arg4[%c1_24, %c0_25, %c0_26] : memref<5x84x256xf32, #tpu.memory_space<vmem>>, vector<1x84x256xf32>
    %52 = vector.shape_cast %51 : vector<1x84x256xf32> to vector<84x256xf32>
    %cst_27 = arith.constant dense<0.000000e+00> : vector<80x256xf32>
    %53 = tpu.matmul %50, %52, %cst_27 {dimension_numbers = #tpu.dot_dimension_numbers<[1], [0], [0], [1], [0, 0, 1, 1], [], []>} : vector<80x84xf32>, vector<84x256xf32>, vector<80x256xf32> -> vector<80x256xf32>
    %54 = arith.addf %48, %53 : vector<80x256xf32>
    %55 = vector.extract_strided_slice %43 {offsets = [2, 0, 0], sizes = [10, 8, 84], strides = [1, 1, 1]} : vector<14x8x84xf32> to vector<10x8x84xf32>
    %56 = vector.shape_cast %55 : vector<10x8x84xf32> to vector<80x84xf32>
    %c2_28 = arith.constant 2 : index
    %c0_29 = arith.constant 0 : index
    %c0_30 = arith.constant 0 : index
    %57 = vector.load %arg4[%c2_28, %c0_29, %c0_30] : memref<5x84x256xf32, #tpu.memory_space<vmem>>, vector<1x84x256xf32>
    %58 = vector.shape_cast %57 : vector<1x84x256xf32> to vector<84x256xf32>
    %cst_31 = arith.constant dense<0.000000e+00> : vector<80x256xf32>
    %59 = tpu.matmul %56, %58, %cst_31 {dimension_numbers = #tpu.dot_dimension_numbers<[1], [0], [0], [1], [0, 0, 1, 1], [], []>} : vector<80x84xf32>, vector<84x256xf32>, vector<80x256xf32> -> vector<80x256xf32>
    %60 = arith.addf %54, %59 : vector<80x256xf32>
    %61 = vector.extract_strided_slice %43 {offsets = [3, 0, 0], sizes = [10, 8, 84], strides = [1, 1, 1]} : vector<14x8x84xf32> to vector<10x8x84xf32>
    %62 = vector.shape_cast %61 : vector<10x8x84xf32> to vector<80x84xf32>
    %c3_32 = arith.constant 3 : index
    %c0_33 = arith.constant 0 : index
    %c0_34 = arith.constant 0 : index
    %63 = vector.load %arg4[%c3_32, %c0_33, %c0_34] : memref<5x84x256xf32, #tpu.memory_space<vmem>>, vector<1x84x256xf32>
    %64 = vector.shape_cast %63 : vector<1x84x256xf32> to vector<84x256xf32>
    %cst_35 = arith.constant dense<0.000000e+00> : vector<80x256xf32>
    %65 = tpu.matmul %62, %64, %cst_35 {dimension_numbers = #tpu.dot_dimension_numbers<[1], [0], [0], [1], [0, 0, 1, 1], [], []>} : vector<80x84xf32>, vector<84x256xf32>, vector<80x256xf32> -> vector<80x256xf32>
    %66 = arith.addf %60, %65 : vector<80x256xf32>
    %67 = vector.extract_strided_slice %43 {offsets = [4, 0, 0], sizes = [10, 8, 84], strides = [1, 1, 1]} : vector<14x8x84xf32> to vector<10x8x84xf32>
    %68 = vector.shape_cast %67 : vector<10x8x84xf32> to vector<80x84xf32>
    %c4_36 = arith.constant 4 : index
    %c0_37 = arith.constant 0 : index
    %c0_38 = arith.constant 0 : index
    %69 = vector.load %arg4[%c4_36, %c0_37, %c0_38] : memref<5x84x256xf32, #tpu.memory_space<vmem>>, vector<1x84x256xf32>
    %70 = vector.shape_cast %69 : vector<1x84x256xf32> to vector<84x256xf32>
    %cst_39 = arith.constant dense<0.000000e+00> : vector<80x256xf32>
    %71 = tpu.matmul %68, %70, %cst_39 {dimension_numbers = #tpu.dot_dimension_numbers<[1], [0], [0], [1], [0, 0, 1, 1], [], []>} : vector<80x84xf32>, vector<84x256xf32>, vector<80x256xf32> -> vector<80x256xf32>
    %72 = arith.addf %66, %71 : vector<80x256xf32>
    %c0_40 = arith.constant 0 : index
    %c0_41 = arith.constant 0 : index
    %73 = vector.load %arg5[%c0_40, %c0_41] : memref<1x256xf32, #tpu.memory_space<vmem>>, vector<1x256xf32>
    %74 = vector.broadcast %73 : vector<1x256xf32> to vector<80x256xf32>
    %75 = arith.addf %72, %74 : vector<80x256xf32>
    %cst_42 = arith.constant 0.000000e+00 : f32
    %76 = vector.broadcast %cst_42 : f32 to vector<80x256xf32>
    %77 = arith.maximumf %75, %76 : vector<80x256xf32>
    %78 = vector.shape_cast %77 : vector<80x256xf32> to vector<5x2x8x256xf32>
    %79 = vector.extract_strided_slice %78 {offsets = [0, 0, 0, 0], sizes = [5, 1, 8, 256], strides = [1, 1, 1, 1]} : vector<5x2x8x256xf32> to vector<5x1x8x256xf32>
    %80 = vector.shape_cast %79 : vector<5x1x8x256xf32> to vector<5x8x256xf32>
    %81 = vector.extract_strided_slice %78 {offsets = [0, 1, 0, 0], sizes = [5, 1, 8, 256], strides = [1, 1, 1, 1]} : vector<5x2x8x256xf32> to vector<5x1x8x256xf32>
    %82 = vector.shape_cast %81 : vector<5x1x8x256xf32> to vector<5x8x256xf32>
    %83 = arith.maximumf %80, %82 : vector<5x8x256xf32>
    %84 = vector.extract_strided_slice %83 {offsets = [0, 0, 0], sizes = [5, 8, 80], strides = [1, 1, 1]} : vector<5x8x256xf32> to vector<5x8x80xf32>
    %85 = vector.extract_strided_slice %83 {offsets = [0, 0, 128], sizes = [5, 8, 80], strides = [1, 1, 1]} : vector<5x8x256xf32> to vector<5x8x80xf32>
    %86 = arith.maximumf %84, %85 : vector<5x8x80xf32>
    %c0_43 = arith.constant 0 : index
    %c0_44 = arith.constant 0 : index
    %87 = vector.load %arg7[%c0_43, %c0_44] : memref<1x120xf32, #tpu.memory_space<vmem>>, vector<1x120xf32>
    %88 = vector.extract_strided_slice %86 {offsets = [0, 0, 0], sizes = [1, 8, 80], strides = [1, 1, 1]} : vector<5x8x80xf32> to vector<1x8x80xf32>
    %89 = vector.shape_cast %88 : vector<1x8x80xf32> to vector<8x80xf32>
    %c0_45 = arith.constant 0 : index
    %c0_46 = arith.constant 0 : index
    %c0_47 = arith.constant 0 : index
    %90 = vector.load %arg6[%c0_45, %c0_46, %c0_47] : memref<5x80x120xf32, #tpu.memory_space<vmem>>, vector<1x80x120xf32>
    %91 = vector.shape_cast %90 : vector<1x80x120xf32> to vector<80x120xf32>
    %cst_48 = arith.constant dense<0.000000e+00> : vector<8x120xf32>
    %92 = tpu.matmul %89, %91, %cst_48 {dimension_numbers = #tpu.dot_dimension_numbers<[1], [0], [0], [1], [0, 0, 1, 1], [], []>} : vector<8x80xf32>, vector<80x120xf32>, vector<8x120xf32> -> vector<8x120xf32>
    %93 = vector.broadcast %87 : vector<1x120xf32> to vector<8x120xf32>
    %94 = arith.addf %93, %92 : vector<8x120xf32>
    %95 = vector.extract_strided_slice %86 {offsets = [1, 0, 0], sizes = [1, 8, 80], strides = [1, 1, 1]} : vector<5x8x80xf32> to vector<1x8x80xf32>
    %96 = vector.shape_cast %95 : vector<1x8x80xf32> to vector<8x80xf32>
    %c1_49 = arith.constant 1 : index
    %c0_50 = arith.constant 0 : index
    %c0_51 = arith.constant 0 : index
    %97 = vector.load %arg6[%c1_49, %c0_50, %c0_51] : memref<5x80x120xf32, #tpu.memory_space<vmem>>, vector<1x80x120xf32>
    %98 = vector.shape_cast %97 : vector<1x80x120xf32> to vector<80x120xf32>
    %cst_52 = arith.constant dense<0.000000e+00> : vector<8x120xf32>
    %99 = tpu.matmul %96, %98, %cst_52 {dimension_numbers = #tpu.dot_dimension_numbers<[1], [0], [0], [1], [0, 0, 1, 1], [], []>} : vector<8x80xf32>, vector<80x120xf32>, vector<8x120xf32> -> vector<8x120xf32>
    %100 = arith.addf %94, %99 : vector<8x120xf32>
    %101 = vector.extract_strided_slice %86 {offsets = [2, 0, 0], sizes = [1, 8, 80], strides = [1, 1, 1]} : vector<5x8x80xf32> to vector<1x8x80xf32>
    %102 = vector.shape_cast %101 : vector<1x8x80xf32> to vector<8x80xf32>
    %c2_53 = arith.constant 2 : index
    %c0_54 = arith.constant 0 : index
    %c0_55 = arith.constant 0 : index
    %103 = vector.load %arg6[%c2_53, %c0_54, %c0_55] : memref<5x80x120xf32, #tpu.memory_space<vmem>>, vector<1x80x120xf32>
    %104 = vector.shape_cast %103 : vector<1x80x120xf32> to vector<80x120xf32>
    %cst_56 = arith.constant dense<0.000000e+00> : vector<8x120xf32>
    %105 = tpu.matmul %102, %104, %cst_56 {dimension_numbers = #tpu.dot_dimension_numbers<[1], [0], [0], [1], [0, 0, 1, 1], [], []>} : vector<8x80xf32>, vector<80x120xf32>, vector<8x120xf32> -> vector<8x120xf32>
    %106 = arith.addf %100, %105 : vector<8x120xf32>
    %107 = vector.extract_strided_slice %86 {offsets = [3, 0, 0], sizes = [1, 8, 80], strides = [1, 1, 1]} : vector<5x8x80xf32> to vector<1x8x80xf32>
    %108 = vector.shape_cast %107 : vector<1x8x80xf32> to vector<8x80xf32>
    %c3_57 = arith.constant 3 : index
    %c0_58 = arith.constant 0 : index
    %c0_59 = arith.constant 0 : index
    %109 = vector.load %arg6[%c3_57, %c0_58, %c0_59] : memref<5x80x120xf32, #tpu.memory_space<vmem>>, vector<1x80x120xf32>
    %110 = vector.shape_cast %109 : vector<1x80x120xf32> to vector<80x120xf32>
    %cst_60 = arith.constant dense<0.000000e+00> : vector<8x120xf32>
    %111 = tpu.matmul %108, %110, %cst_60 {dimension_numbers = #tpu.dot_dimension_numbers<[1], [0], [0], [1], [0, 0, 1, 1], [], []>} : vector<8x80xf32>, vector<80x120xf32>, vector<8x120xf32> -> vector<8x120xf32>
    %112 = arith.addf %106, %111 : vector<8x120xf32>
    %113 = vector.extract_strided_slice %86 {offsets = [4, 0, 0], sizes = [1, 8, 80], strides = [1, 1, 1]} : vector<5x8x80xf32> to vector<1x8x80xf32>
    %114 = vector.shape_cast %113 : vector<1x8x80xf32> to vector<8x80xf32>
    %c4_61 = arith.constant 4 : index
    %c0_62 = arith.constant 0 : index
    %c0_63 = arith.constant 0 : index
    %115 = vector.load %arg6[%c4_61, %c0_62, %c0_63] : memref<5x80x120xf32, #tpu.memory_space<vmem>>, vector<1x80x120xf32>
    %116 = vector.shape_cast %115 : vector<1x80x120xf32> to vector<80x120xf32>
    %cst_64 = arith.constant dense<0.000000e+00> : vector<8x120xf32>
    %117 = tpu.matmul %114, %116, %cst_64 {dimension_numbers = #tpu.dot_dimension_numbers<[1], [0], [0], [1], [0, 0, 1, 1], [], []>} : vector<8x80xf32>, vector<80x120xf32>, vector<8x120xf32> -> vector<8x120xf32>
    %118 = arith.addf %112, %117 : vector<8x120xf32>
    %cst_65 = arith.constant 0.000000e+00 : f32
    %119 = vector.broadcast %cst_65 : f32 to vector<8x120xf32>
    %120 = arith.maximumf %118, %119 : vector<8x120xf32>
    %c0_66 = arith.constant 0 : index
    %c0_67 = arith.constant 0 : index
    %121 = vector.load %arg8[%c0_66, %c0_67] : memref<120x84xf32, #tpu.memory_space<vmem>>, vector<120x84xf32>
    %cst_68 = arith.constant dense<0.000000e+00> : vector<8x84xf32>
    %122 = tpu.matmul %120, %121, %cst_68 {dimension_numbers = #tpu.dot_dimension_numbers<[1], [0], [0], [1], [0, 0, 1, 1], [], []>} : vector<8x120xf32>, vector<120x84xf32>, vector<8x84xf32> -> vector<8x84xf32>
    %c0_69 = arith.constant 0 : index
    %c0_70 = arith.constant 0 : index
    %123 = vector.load %arg9[%c0_69, %c0_70] : memref<1x84xf32, #tpu.memory_space<vmem>>, vector<1x84xf32>
    %124 = vector.broadcast %123 : vector<1x84xf32> to vector<8x84xf32>
    %125 = arith.addf %122, %124 : vector<8x84xf32>
    %cst_71 = arith.constant 0.000000e+00 : f32
    %126 = vector.broadcast %cst_71 : f32 to vector<8x84xf32>
    %127 = arith.maximumf %125, %126 : vector<8x84xf32>
    %c0_72 = arith.constant 0 : index
    %c0_73 = arith.constant 0 : index
    %128 = vector.load %arg10[%c0_72, %c0_73] : memref<84x128xf32, #tpu.memory_space<vmem>>, vector<84x128xf32>
    %cst_74 = arith.constant dense<0.000000e+00> : vector<8x128xf32>
    %129 = tpu.matmul %127, %128, %cst_74 {dimension_numbers = #tpu.dot_dimension_numbers<[1], [0], [0], [1], [0, 0, 1, 1], [], []>} : vector<8x84xf32>, vector<84x128xf32>, vector<8x128xf32> -> vector<8x128xf32>
    %c0_75 = arith.constant 0 : index
    %c0_76 = arith.constant 0 : index
    %130 = vector.load %arg11[%c0_75, %c0_76] : memref<1x128xf32, #tpu.memory_space<vmem>>, vector<1x128xf32>
    %131 = vector.broadcast %130 : vector<1x128xf32> to vector<8x128xf32>
    %132 = arith.addf %129, %131 : vector<8x128xf32>
    %c0_77 = arith.constant 0 : index
    %c0_78 = arith.constant 0 : index
    %133 = vector.load %arg12[%c0_77, %c0_78] : memref<8x128xf32, #tpu.memory_space<vmem>>, vector<8x128xf32>
    tpu.vector_store %arg12[%c0_77, %c0_78], %132 {strides = array<i32>} : memref<8x128xf32, #tpu.memory_space<vmem>>, vector<8x128xf32>,
    return
  }
  func.func @transform_0(%arg0: i32) -> (i32, i32, i32) {
    %c0_i32 = arith.constant 0 : i32
    %c0_i32_0 = arith.constant 0 : i32
    %c0_i32_1 = arith.constant 0 : i32
    return %c0_i32, %arg0, %c0_i32_0 : i32, i32, i32
  }
  func.func @transform_1(%arg0: i32) -> (i32, i32, i32) {
    %c0_i32 = arith.constant 0 : i32
    %c0_i32_0 = arith.constant 0 : i32
    %c0_i32_1 = arith.constant 0 : i32
    %c0_i32_2 = arith.constant 0 : i32
    return %c0_i32, %c0_i32_0, %c0_i32_1 : i32, i32, i32
  }
  func.func @transform_2(%arg0: i32) -> (i32, i32) {
    %c0_i32 = arith.constant 0 : i32
    %c0_i32_0 = arith.constant 0 : i32
    %c0_i32_1 = arith.constant 0 : i32
    return %c0_i32, %c0_i32_0 : i32, i32
  }
  func.func @transform_3(%arg0: i32) -> (i32, i32, i32) {
    %c0_i32 = arith.constant 0 : i32
    %c0_i32_0 = arith.constant 0 : i32
    %c0_i32_1 = arith.constant 0 : i32
    %c0_i32_2 = arith.constant 0 : i32
    return %c0_i32, %c0_i32_0, %c0_i32_1 : i32, i32, i32
  }
  func.func @transform_4(%arg0: i32) -> (i32, i32) {
    %c0_i32 = arith.constant 0 : i32
    %c0_i32_0 = arith.constant 0 : i32
    %c0_i32_1 = arith.constant 0 : i32
    return %c0_i32, %c0_i32_0 : i32, i32
  }
  func.func @transform_5(%arg0: i32) -> (i32, i32, i32) {
    %c0_i32 = arith.constant 0 : i32
    %c0_i32_0 = arith.constant 0 : i32
    %c0_i32_1 = arith.constant 0 : i32
    %c0_i32_2 = arith.constant 0 : i32
    return %c0_i32, %c0_i32_0, %c0_i32_1 : i32, i32, i32
  }
  func.func @transform_6(%arg0: i32) -> (i32, i32) {
    %c0_i32 = arith.constant 0 : i32
    %c0_i32_0 = arith.constant 0 : i32
    %c0_i32_1 = arith.constant 0 : i32
    return %c0_i32, %c0_i32_0 : i32, i32
  }
  func.func @transform_7(%arg0: i32) -> (i32, i32) {
    %c0_i32 = arith.constant 0 : i32
    %c0_i32_0 = arith.constant 0 : i32
    %c0_i32_1 = arith.constant 0 : i32
    return %c0_i32, %c0_i32_0 : i32, i32
  }
  func.func @transform_8(%arg0: i32) -> (i32, i32) {
    %c0_i32 = arith.constant 0 : i32
    %c0_i32_0 = arith.constant 0 : i32
    %c0_i32_1 = arith.constant 0 : i32
    return %c0_i32, %c0_i32_0 : i32, i32
  }
  func.func @transform_9(%arg0: i32) -> (i32, i32) {
    %c0_i32 = arith.constant 0 : i32
    %c0_i32_0 = arith.constant 0 : i32
    %c0_i32_1 = arith.constant 0 : i32
    return %c0_i32, %c0_i32_0 : i32, i32
  }
  func.func @transform_10(%arg0: i32) -> (i32, i32) {
    %c0_i32 = arith.constant 0 : i32
    %c0_i32_0 = arith.constant 0 : i32
    %c0_i32_1 = arith.constant 0 : i32
    return %c0_i32, %c0_i32_0 : i32, i32
  }
  func.func @transform_11(%arg0: i32) -> (i32, i32) {
    %c0_i32 = arith.constant 0 : i32
    %c0_i32_0 = arith.constant 0 : i32
    return %arg0, %c0_i32 : i32, i32
  }
}

</mosaic_0001>

<bundles_post_ra>
// kernel: net_forward.1
= control target key start
LH: loop header
LB: loop body
LE: loop exit
PB: predicated region body
PF: predicated region fallthrough
CT: control target
= control target key end

     0   :  { %16 = vsyncpa [#allocation3], 0  ;;  %s5807_s0 = inlined_call_operand.vmem [shape: f32[32,8,32], index: 0, kind: input, shape index: {}]   ;;  %s5808_s1 = inlined_call_operand.hbm [shape: f32[5,32,256], index: 1, kind: input, shape index: {}]   ;;  %s5809_s2 = inlined_call_operand.vmem [shape: f32[1,256], index: 2, kind: input, shape index: {}]   ;;  %s5810_s3 = inlined_call_operand.hbm [shape: f32[5,84,256], index: 3, kind: input, shape index: {}]   ;;  %s5811_s4 = inlined_call_operand.vmem [shape: f32[1,256], index: 4, kind: input, shape index: {}]   ;;  %s5812_s5 = inlined_call_operand.vmem [shape: f32[5,80,120], index: 5, kind: input, shape index: {}]   ;;  %s5813_s6 = inlined_call_operand.vmem [shape: f32[1,120], index: 6, kind: input, shape index: {}]   ;;  %s5814_s7 = inlined_call_operand.vmem [shape: f32[120,84], index: 7, kind: input, shape index: {}]   ;;  %s5815_s8 = inlined_call_operand.vmem [shape: f32[1,84], index: 8, kind: input, shape index: {}]   ;;  %s5816_s9 = inlined_call_operand.vmem [shape: f32[84,128], index: 9, kind: input, shape index: {}]   ;;  %s5817_s10 = inlined_call_operand.vmem [shape: f32[1,128], index: 10, kind: input, shape index: {}]   ;;  %s5818_s11 = inlined_call_operand.vmem [shape: f32[8,128], index: 11, kind: output, shape index: {}]  }
   0x1   :  { %17 = vsyncpa [#allocation5], 0  ;;  %s3866_s17 = smov [#allocation2]  }
   0x2   :  { %s25_s18 = sshll.u32 %s3866_s17, 4  ;;  %s26_s18 = int_to_ptr.vmem [resolvable:$true] %s25_s18 }
   0x3   :  { %s3830_s19 = scalar_lea.vmem %s26_s18, 5120  ;;  %p3835_p1 = scmp.lt.s32.totalorder %s26_s18, %s26_s18 }
   0x4   :  { %p3831_p0 = scmp.ne.s32.totalorder %s26_s18, %s3830_s19  ;;  %p3836_p2 = scmp.lt.s32.totalorder %s3830_s19, %s3830_s19 }
   0x6   :  { %p3837_p3 = por %p3836_p2, %p3835_p1 }
   0x8   :  { %p3838_p4 = pnand %p3837_p3, %p3831_p0 }
   0xa   :  { %3841 = shalt.err (!%p3838_p4)
}
   0xb   :  { %s3867_s20 = smov 256   ;;  %s3868_s21 = smov 16  }
   0xc   :  { %31 = dma.hbm_to_vmem [thread:$0]  %s5808_s1, 5120, %s26_s18, [#allocation3], %s3867_s20, %s3867_s20, %s3868_s21  }
   0xd   :  { %s3869_s24 = smov [#allocation4]  }
   0xe   :  { %s39_s25 = sshll.u32 %s3869_s24, 4  ;;  %s40_s25 = int_to_ptr.vmem [resolvable:$true] %s39_s25 }
   0xf   :  { %s3850_s26 = scalar_lea.vmem %s40_s25, 14080  ;;  %p3855_p6 = scmp.lt.s32.totalorder %s40_s25, %s40_s25 }
  0x10   :  { %p3851_p5 = scmp.ne.s32.totalorder %s40_s25, %s3850_s26  ;;  %p3856_p7 = scmp.lt.s32.totalorder %s3850_s26, %s3850_s26 }
  0x12   :  { %p3857_p8 = por %p3856_p7, %p3855_p6 }
  0x14   :  { %p3858_p9 = pnand %p3857_p8, %p3851_p5 }
  0x16   :  { %3861 = shalt.err (!%p3858_p9)
}
  0x17   :  { %45 = dma.hbm_to_vmem [thread:$0]  %s5810_s3, 14080, %s40_s25, [#allocation5], %s3867_s20, %s3867_s20, %s3868_s21  }
  0x18   :  { %3862 = dma.done.wait [#allocation3], 5120  }
  0x19   :  { %3863 = vsyncadd [#allocation3], 4294962176 }
  0x1a   :  { %3864 = dma.done.wait [#allocation5], 14080  }
  0x1b   :  { %3865 = vsyncadd [#allocation5], 4294953216  ;;  %v5819_v0 = vmov 0.0   ;;  %v114_v1 = vld [vmem:[#allocation2 + $0x78] sm:$0xff]  ;;  %v113_v3 = vld [vmem:[#allocation2 + $0x70] sm:$0xff]  ;;  %vm115_vm0 = vcmask 261120  }
  0x1c   :  { %264 = vmatprep.mubr.f32.mxu0 %v5819_v0  ;;  %500 = vmatprep.mubr.f32.mxu1 %v5819_v0  ;;  %v105_v2 = vld [vmem:[#allocation2 + $0x38] sm:$0xff]  ;;  %v104_v4 = vld [vmem:[#allocation2 + $0x30] sm:$0xff]  ;;  %v112_v5 = vld [vmem:[#allocation2 + $0x68] sm:$0xff]  ;;  %vm1814_vm1 = vcmask 1043456   ;;  %vm1783_vm2 = vcmask 687104   ;;  %vm3871_vm3 = vmmov 0  }
  0x1d   :  { %224 = vmatprep.subr.mxu0 %v114_v1  ;;  %460 = vmatprep.subr.mxu1 %v105_v2  ;;  %v103_v6 = vld [vmem:[#allocation2 + $0x28] sm:$0xff]  ;;  %v111_v7 = vld [vmem:[#allocation2 + $0x60] sm:$0xff]  ;;  %v110_v9 = vld [vmem:[#allocation2 + $0x58] sm:$0xff]  ;;  %vm2689_vm4 = vcmask 654336   ;;  %vm3133_vm5 = vcmask 982016  }
  0x1e   :  { %225 = vmatpush1.msra.mxu0 %v113_v3  ;;  %461 = vmatpush1.msra.mxu1 %v104_v4  ;;  %v102_v8 = vld [vmem:[#allocation2 + $0x20] sm:$0xff]  ;;  %v101_v10 = vld [vmem:[#allocation2 + $0x18] sm:$0xff]  ;;  %v109_v11 = vld [vmem:[#allocation2 + $0x50] sm:$0xff] }
  0x1f   :  { %226 = vmatprep.subr.mxu0 %v112_v5  ;;  %462 = vmatprep.subr.mxu1 %v103_v6  ;;  %v100_v12 = vld [vmem:[#allocation2 + $0x10] sm:$0xff]  ;;  %v108_v13 = vld [vmem:[#allocation2 + $0x48] sm:$0xff]  ;;  %v107_v15 = vld [vmem:[#allocation2 + $0x40] sm:$0xff] }
  0x20   :  { %227 = vmatpush1.msra.mxu0 %v111_v7  ;;  %463 = vmatpush1.msra.mxu1 %v102_v8  ;;  %v99_v14 = vld [vmem:[#allocation2 + $0x8] sm:$0xff]  ;;  %v98_v16 = vld [vmem:[#allocation2] sm:$0xff]  ;;  %v677_v19 = vld [vmem:[#allocation2 + $0xb8] sm:$0xff] }
  0x21   :  { %228 = vmatprep.subr.mxu0 %v110_v9  ;;  %464 = vmatprep.subr.mxu1 %v101_v10  ;;  %v67_v17 = vld [vmem:[%s5807_s0 + $0x8] sm:$0xff]  ;;  %v66_v18 = vld [vmem:[%s5807_s0] sm:$0xff]  ;;  %v676_v20 = vld [vmem:[#allocation2 + $0xb0] sm:$0xff] }
  0x22   :  { %229 = vmatpush1.msra.mxu0 %v109_v11  ;;  %465 = vmatpush1.msra.mxu1 %v100_v12  ;;  %v675_v21 = vld [vmem:[#allocation2 + $0xa8] sm:$0xff]  ;;  %v3952_v22 = vld [vmem:[%s5807_s0 + $0x10] sm:$0xff]  ;;  %v674_v23 = vld [vmem:[#allocation2 + $0xa0] sm:$0xff] }
  0x23   :  { %230 = vmatprep.subr.mxu0 %v108_v13  ;;  %466 = vmatprep.subr.mxu1 %v99_v14  ;;  %v673_v24 = vld [vmem:[#allocation2 + $0x98] sm:$0xff]  ;;  %v672_v26 = vld [vmem:[#allocation2 + $0x90] sm:$0xff]  ;;  %v671_v27 = vld [vmem:[#allocation2 + $0x88] sm:$0xff] }
  0x24   :  { %231 = vmatpush1.msra.mxu0 %v107_v15  ;;  %467 = vmatpush1.msra.mxu1 %v98_v16  ;;  %v3963_v25 = vld [vmem:[%s5807_s0 + $0x18] sm:$0xff]  ;;  %v977_v29 = vld [vmem:[#allocation2 + $0xf0] sm:$0xff]  ;;  %v3974_v30 = vld [vmem:[%s5807_s0 + $0x20] sm:$0xff] }
  0x25   :  { %3309 = vmatmul.mubr.msk.f32.vlgmr.msra.gmra.mxu0 %vm115_vm0, %v67_v17  ;;  %3337 = vmatmul.mubr.msk.f32.vlgmr.msra.gmra.mxu1 %vm115_vm0, %v66_v18  ;;  %v978_v28 = vld [vmem:[#allocation2 + $0xf8] sm:$0xff]  ;;  %v670_v31 = vld [vmem:[#allocation2 + $0x80] sm:$0xff]  ;;  %v976_v32 = vld [vmem:[#allocation2 + $0xe8] sm:$0xff] }
  0x26   :  { %705 = vmatprep.subr.mxu0 %v677_v19  ;;  %270 = vmatprep.mubr.f32.mxu0 %v5819_v0  ;;  %v975_v33 = vld [vmem:[#allocation2 + $0xe0] sm:$0xff]  ;;  %v1279_v34 = vld [vmem:[#allocation2 + $0x138] sm:$0xff]  ;;  %v3985_v35 = vld [vmem:[%s5807_s0 + $0x28] sm:$0xff] }
  0x27   :  { %706 = vmatpush1.msra.mxu0 %v676_v20  ;;  %506 = vmatprep.mubr.f32.mxu1 %v5819_v0  ;;  %v974_v36 = vld [vmem:[#allocation2 + $0xd8] sm:$0xff]  ;;  %v973_v37 = vld [vmem:[#allocation2 + $0xd0] sm:$0xff]  ;;  %v972_v39 = vld [vmem:[#allocation2 + $0xc8] sm:$0xff] }
  0x28   :  { %707 = vmatprep.subr.mxu0 %v675_v21  ;;  %1006 = vmatprep.subr.mxu1 %v978_v28  ;;  %v3996_v38 = vld [vmem:[%s5807_s0 + $0x30] sm:$0xff]  ;;  %v971_v40 = vld [vmem:[#allocation2 + $0xc0] sm:$0xff]  ;;  %v4007_v41 = vld [vmem:[%s5807_s0 + $0x38] sm:$0xff] }
  0x29   :  { %3310 = vmatmul.mubr.msk.f32.gmra.mxu0 %vm115_vm0, %v3952_v22  ;;  %3338 = vmatmul.mubr.msk.f32.gmra.mxu1 %vm115_vm0, %v67_v17  ;;  %v4018_v42 = vld [vmem:[%s5807_s0 + $0x40] sm:$0xff]  ;;  %v4029_v43 = vld [vmem:[%s5807_s0 + $0x48] sm:$0xff]  ;;  %v4040_v44 = vld [vmem:[%s5807_s0 + $0x50] sm:$0xff] }
  0x2a   :  { %276 = vmatprep.mubr.f32.mxu0 %v5819_v0  ;;  %512 = vmatprep.mubr.f32.mxu1 %v5819_v0  ;;  %v4051_v45 = vld [vmem:[%s5807_s0 + $0x58] sm:$0xff]  ;;  %v4062_v46 = vld [vmem:[%s5807_s0 + $0x60] sm:$0xff]  ;;  %v4073_v47 = vld [vmem:[%s5807_s0 + $0x68] sm:$0xff] }
  0x2b   :  { %708 = vmatpush1.msra.mxu0 %v674_v23  ;;  %1007 = vmatpush1.msra.mxu1 %v977_v29  ;;  %v4084_v48 = vld [vmem:[%s5807_s0 + $0x70] sm:$0xff]  ;;  %v4095_v49 = vld [vmem:[%s5807_s0 + $0x78] sm:$0xff]  ;;  %v4106_v50 = vld [vmem:[%s5807_s0 + $0x80] sm:$0xff] }
  0x2c   :  { %709 = vmatprep.subr.mxu0 %v673_v24  ;;  %1008 = vmatprep.subr.mxu1 %v976_v32  ;;  %v4117_v51 = vld [vmem:[%s5807_s0 + $0x88] sm:$0xff]  ;;  %v4128_v52 = vld [vmem:[%s5807_s0 + $0x90] sm:$0xff]  ;;  %v4139_v53 = vld [vmem:[%s5807_s0 + $0x98] sm:$0xff] }
  0x2d   :  { %3311 = vmatmul.mubr.msk.f32.gmra.mxu0 %vm115_vm0, %v3963_v25  ;;  %3339 = vmatmul.mubr.msk.f32.gmra.mxu1 %vm115_vm0, %v3952_v22  ;;  %v4150_v54 = vld [vmem:[%s5807_s0 + $0xa0] sm:$0xff]  ;;  %v4161_v55 = vld [vmem:[%s5807_s0 + $0xa8] sm:$0xff]  ;;  %v4172_v56 = vld [vmem:[%s5807_s0 + $0xb0] sm:$0xff] }
  0x2e   :  { %282 = vmatprep.mubr.f32.mxu0 %v5819_v0  ;;  %518 = vmatprep.mubr.f32.mxu1 %v5819_v0  ;;  %v4183_v57 = vld [vmem:[%s5807_s0 + $0xb8] sm:$0xff]  ;;  %v4194_v58 = vld [vmem:[%s5807_s0 + $0xc0] sm:$0xff]  ;;  %v4205_v59 = vld [vmem:[%s5807_s0 + $0xc8] sm:$0xff] }
  0x2f   :  { %710 = vmatpush1.msra.mxu0 %v672_v26  ;;  %1009 = vmatpush1.msra.mxu1 %v975_v33  ;;  %v4216_v60 = vld [vmem:[%s5807_s0 + $0xd0] sm:$0xff]  ;;  %v4227_v61 = vld [vmem:[%s5807_s0 + $0xd8] sm:$0xff]  ;;  %v4238_v62 = vld [vmem:[%s5807_s0 + $0xe0] sm:$0xff] }
  0x30   :  { %711 = vmatprep.subr.mxu0 %v671_v27  ;;  %1010 = vmatprep.subr.mxu1 %v974_v36  ;;  %v1278_v63 = vld [vmem:[#allocation2 + $0x130] sm:$0xff]  ;;  %v1277_v1 = vld [vmem:[#allocation2 + $0x128] sm:$0xff]  ;;  %v1276_v2 = vld [vmem:[#allocation2 + $0x120] sm:$0xff] }
  0x31   :  { %3312 = vmatmul.mubr.msk.f32.gmra.mxu0 %vm115_vm0, %v3974_v30  ;;  %3340 = vmatmul.mubr.msk.f32.gmra.mxu1 %vm115_vm0, %v3963_v25  ;;  %v1275_v3 = vld [vmem:[#allocation2 + $0x118] sm:$0xff]  ;;  %v1274_v4 = vld [vmem:[#allocation2 + $0x110] sm:$0xff]  ;;  %v1273_v5 = vld [vmem:[#allocation2 + $0x108] sm:$0xff] }
  0x32   :  { %288 = vmatprep.mubr.f32.mxu0 %v5819_v0  ;;  %524 = vmatprep.mubr.f32.mxu1 %v5819_v0  ;;  %v1272_v6 = vld [vmem:[#allocation2 + $0x100] sm:$0xff] }
  0x33   :  { %712 = vmatpush1.msra.mxu0 %v670_v31  ;;  %1011 = vmatpush1.msra.mxu1 %v973_v37  ;;  %v4437_v37 = vld [vmem:[%s5807_s0 + $0xe8] sm:$0xff] }
  0x34   :  { %1307 = vmatprep.subr.mxu0 %v1279_v34  ;;  %1012 = vmatprep.subr.mxu1 %v972_v39 }
  0x35   :  { %3313 = vmatmul.mubr.msk.f32.gmra.mxu0 %vm115_vm0, %v3985_v35  ;;  %3341 = vmatmul.mubr.msk.f32.gmra.mxu1 %vm115_vm0, %v3974_v30 }
  0x36   :  { %294 = vmatprep.mubr.f32.mxu0 %v5819_v0  ;;  %530 = vmatprep.mubr.f32.mxu1 %v5819_v0 }
  0x37   :  { %1013 = vmatpush1.msra.mxu1 %v971_v40 }
  0x39   :  { %3314 = vmatmul.mubr.msk.f32.gmra.mxu0 %vm115_vm0, %v3996_v38  ;;  %3342 = vmatmul.mubr.msk.f32.gmra.mxu1 %vm115_vm0, %v3985_v35 }
  0x3a   :  { %300 = vmatprep.mubr.f32.mxu0 %v5819_v0  ;;  %536 = vmatprep.mubr.f32.mxu1 %v5819_v0 }
  0x3d   :  { %3315 = vmatmul.mubr.msk.f32.gmra.mxu0 %vm115_vm0, %v4007_v41  ;;  %3343 = vmatmul.mubr.msk.f32.gmra.mxu1 %vm115_vm0, %v3996_v38 }
  0x3e   :  { %306 = vmatprep.mubr.f32.mxu0 %v5819_v0  ;;  %542 = vmatprep.mubr.f32.mxu1 %v5819_v0 }
  0x41   :  { %3316 = vmatmul.mubr.msk.f32.gmra.mxu0 %vm115_vm0, %v4018_v42  ;;  %3344 = vmatmul.mubr.msk.f32.gmra.mxu1 %vm115_vm0, %v4007_v41 }
  0x42   :  { %312 = vmatprep.mubr.f32.mxu0 %v5819_v0  ;;  %548 = vmatprep.mubr.f32.mxu1 %v5819_v0 }
  0x45   :  { %3317 = vmatmul.mubr.msk.f32.gmra.mxu0 %vm115_vm0, %v4029_v43  ;;  %3345 = vmatmul.mubr.msk.f32.gmra.mxu1 %vm115_vm0, %v4018_v42 }
  0x46   :  { %318 = vmatprep.mubr.f32.mxu0 %v5819_v0  ;;  %554 = vmatprep.mubr.f32.mxu1 %v5819_v0 }
  0x49   :  { %3318 = vmatmul.mubr.msk.f32.gmra.mxu0 %vm115_vm0, %v4040_v44  ;;  %3346 = vmatmul.mubr.msk.f32.gmra.mxu1 %vm115_vm0, %v4029_v43 }
  0x4a   :  { %324 = vmatprep.mubr.f32.mxu0 %v5819_v0  ;;  %560 = vmatprep.mubr.f32.mxu1 %v5819_v0 }
  0x4d   :  { %3319 = vmatmul.mubr.msk.f32.gmra.mxu0 %vm115_vm0, %v4051_v45  ;;  %3347 = vmatmul.mubr.msk.f32.gmra.mxu1 %vm115_vm0, %v4040_v44 }
  0x4e   :  { %330 = vmatprep.mubr.f32.mxu0 %v5819_v0  ;;  %566 = vmatprep.mubr.f32.mxu1 %v5819_v0 }
  0x51   :  { %3320 = vmatmul.mubr.msk.f32.gmra.mxu0 %vm115_vm0, %v4062_v46  ;;  %3348 = vmatmul.mubr.msk.f32.gmra.mxu1 %vm115_vm0, %v4051_v45 }
  0x52   :  { %336 = vmatprep.mubr.f32.mxu0 %v5819_v0  ;;  %572 = vmatprep.mubr.f32.mxu1 %v5819_v0 }
  0x55   :  { %3321 = vmatmul.mubr.msk.f32.gmra.mxu0 %vm115_vm0, %v4073_v47  ;;  %3349 = vmatmul.mubr.msk.f32.gmra.mxu1 %vm115_vm0, %v4062_v46 }
  0x56   :  { %342 = vmatprep.mubr.f32.mxu0 %v5819_v0  ;;  %578 = vmatprep.mubr.f32.mxu1 %v5819_v0 }
  0x59   :  { %3322 = vmatmul.mubr.msk.f32.gmra.mxu0 %vm115_vm0, %v4084_v48  ;;  %3350 = vmatmul.mubr.msk.f32.gmra.mxu1 %vm115_vm0, %v4073_v47 }
  0x5a   :  { %348 = vmatprep.mubr.f32.mxu0 %v5819_v0  ;;  %584 = vmatprep.mubr.f32.mxu1 %v5819_v0 }
  0x5d   :  { %3323 = vmatmul.mubr.msk.f32.gmra.mxu0 %vm115_vm0, %v4095_v49  ;;  %3351 = vmatmul.mubr.msk.f32.gmra.mxu1 %vm115_vm0, %v4084_v48 }
  0x5e   :  { %354 = vmatprep.mubr.f32.mxu0 %v5819_v0  ;;  %590 = vmatprep.mubr.f32.mxu1 %v5819_v0 }
  0x61   :  { %3324 = vmatmul.mubr.msk.f32.gmra.mxu0 %vm115_vm0, %v4106_v50  ;;  %3352 = vmatmul.mubr.msk.f32.gmra.mxu1 %vm115_vm0, %v4095_v49 }
  0x62   :  { %360 = vmatprep.mubr.f32.mxu0 %v5819_v0  ;;  %596 = vmatprep.mubr.f32.mxu1 %v5819_v0 }
  0x65   :  { %3325 = vmatmul.mubr.msk.f32.gmra.mxu0 %vm115_vm0, %v4117_v51  ;;  %3353 = vmatmul.mubr.msk.f32.gmra.mxu1 %vm115_vm0, %v4106_v50 }
  0x66   :  { %366 = vmatprep.mubr.f32.mxu0 %v5819_v0  ;;  %602 = vmatprep.mubr.f32.mxu1 %v5819_v0 }
  0x69   :  { %3326 = vmatmul.mubr.msk.f32.gmra.mxu0 %vm115_vm0, %v4128_v52  ;;  %3354 = vmatmul.mubr.msk.f32.gmra.mxu1 %vm115_vm0, %v4117_v51 }
  0x6a   :  { %372 = vmatprep.mubr.f32.mxu0 %v5819_v0  ;;  %608 = vmatprep.mubr.f32.mxu1 %v5819_v0 }
  0x6d   :  { %3327 = vmatmul.mubr.msk.f32.gmra.mxu0 %vm115_vm0, %v4139_v53  ;;  %3355 = vmatmul.mubr.msk.f32.gmra.mxu1 %vm115_vm0, %v4128_v52 }
  0x6e   :  { %378 = vmatprep.mubr.f32.mxu0 %v5819_v0  ;;  %614 = vmatprep.mubr.f32.mxu1 %v5819_v0 }
  0x71   :  { %3328 = vmatmul.mubr.msk.f32.gmra.mxu0 %vm115_vm0, %v4150_v54  ;;  %3356 = vmatmul.mubr.msk.f32.gmra.mxu1 %vm115_vm0, %v4139_v53 }
  0x72   :  { %384 = vmatprep.mubr.f32.mxu0 %v5819_v0  ;;  %620 = vmatprep.mubr.f32.mxu1 %v5819_v0 }
  0x75   :  { %3329 = vmatmul.mubr.msk.f32.gmra.mxu0 %vm115_vm0, %v4161_v55  ;;  %3357 = vmatmul.mubr.msk.f32.gmra.mxu1 %vm115_vm0, %v4150_v54 }
  0x76   :  { %390 = vmatprep.mubr.f32.mxu0 %v5819_v0  ;;  %626 = vmatprep.mubr.f32.mxu1 %v5819_v0 }
  0x79   :  { %3330 = vmatmul.mubr.msk.f32.gmra.mxu0 %vm115_vm0, %v4172_v56  ;;  %3358 = vmatmul.mubr.msk.f32.gmra.mxu1 %vm115_vm0, %v4161_v55 }
  0x7a   :  { %396 = vmatprep.mubr.f32.mxu0 %v5819_v0  ;;  %632 = vmatprep.mubr.f32.mxu1 %v5819_v0 }
  0x7d   :  { %3331 = vmatmul.mubr.msk.f32.gmra.mxu0 %vm115_vm0, %v4183_v57  ;;  %3359 = vmatmul.mubr.msk.f32.gmra.mxu1 %vm115_vm0, %v4172_v56 }
  0x7e   :  { %402 = vmatprep.mubr.f32.mxu0 %v5819_v0  ;;  %638 = vmatprep.mubr.f32.mxu1 %v5819_v0 }
  0x81   :  { %3332 = vmatmul.mubr.msk.f32.gmra.mxu0 %vm115_vm0, %v4194_v58  ;;  %3360 = vmatmul.mubr.msk.f32.gmra.mxu1 %vm115_vm0, %v4183_v57 }
  0x82   :  { %408 = vmatprep.mubr.f32.mxu0 %v5819_v0  ;;  %644 = vmatprep.mubr.f32.mxu1 %v5819_v0 }
  0x85   :  { %3333 = vmatmul.mubr.msk.f32.gmra.mxu0 %vm115_vm0, %v4205_v59  ;;  %3361 = vmatmul.mubr.msk.f32.gmra.mxu1 %vm115_vm0, %v4194_v58 }
  0x86   :  { %414 = vmatprep.mubr.f32.mxu0 %v5819_v0  ;;  %650 = vmatprep.mubr.f32.mxu1 %v5819_v0 }
  0x89   :  { %3334 = vmatmul.mubr.msk.f32.gmra.mxu0 %vm115_vm0, %v4216_v60  ;;  %3362 = vmatmul.mubr.msk.f32.gmra.mxu1 %vm115_vm0, %v4205_v59 }
  0x8a   :  { %420 = vmatprep.mubr.f32.mxu0 %v5819_v0  ;;  %656 = vmatprep.mubr.f32.mxu1 %v5819_v0 }
  0x8d   :  { %3335 = vmatmul.mubr.msk.f32.gmra.mxu0 %vm115_vm0, %v4227_v61  ;;  %3363 = vmatmul.mubr.msk.f32.gmra.mxu1 %vm115_vm0, %v4216_v60 }
  0x8e   :  { %426 = vmatprep.mubr.f32.mxu0 %v5819_v0  ;;  %662 = vmatprep.mubr.f32.mxu1 %v5819_v0 }
  0x91   :  { %3336 = vmatmul.mubr.msk.f32.gmra.mxu0 %vm115_vm0, %v4238_v62  ;;  %3364 = vmatmul.mubr.msk.f32.gmra.mxu1 %vm115_vm0, %v4227_v61 }
  0x92   :  { %745 = vmatprep.mubr.f32.mxu0 %v5819_v0  ;;  %1046 = vmatprep.mubr.f32.mxu1 %v5819_v0 }
  0x95   :  { %3365 = vmatmul.mubr.msk.f32.vlgmr.msra.gmra.mxu0 %vm115_vm0, %v3952_v22  ;;  %3393 = vmatmul.mubr.msk.f32.vlgmr.msra.gmra.mxu1 %vm115_vm0, %v3963_v25 }
  0x96   :  { %1308 = vmatpush1.msra.mxu0 %v1278_v63  ;;  %751 = vmatprep.mubr.f32.mxu0 %v5819_v0 }
  0x97   :  { %1052 = vmatprep.mubr.f32.mxu1 %v5819_v0  ;;  %1309 = vmatprep.subr.mxu0 %v1277_v1 }
  0x98   :  { %1310 = vmatpush1.msra.mxu0 %v1276_v2 }
  0x99   :  { %3366 = vmatmul.mubr.msk.f32.gmra.mxu0 %vm115_vm0, %v3963_v25  ;;  %3394 = vmatmul.mubr.msk.f32.gmra.mxu1 %vm115_vm0, %v3974_v30 }
  0x9a   :  { %757 = vmatprep.mubr.f32.mxu0 %v5819_v0  ;;  %1058 = vmatprep.mubr.f32.mxu1 %v5819_v0 }
  0x9b   :  { %1311 = vmatprep.subr.mxu0 %v1275_v3  ;;  %v4454_v3 = vld [vmem:[%s5807_s0 + $0xf0] sm:$0xff] }
  0x9c   :  { %1312 = vmatpush1.msra.mxu0 %v1274_v4 }
  0x9d   :  { %3367 = vmatmul.mubr.msk.f32.gmra.mxu0 %vm115_vm0, %v3974_v30  ;;  %3395 = vmatmul.mubr.msk.f32.gmra.mxu1 %vm115_vm0, %v3985_v35 }
  0x9e   :  { %763 = vmatprep.mubr.f32.mxu0 %v5819_v0  ;;  %1064 = vmatprep.mubr.f32.mxu1 %v5819_v0 }
  0x9f   :  { %1313 = vmatprep.subr.mxu0 %v1273_v5 }
  0xa0   :  { %1314 = vmatpush1.msra.mxu0 %v1272_v6 }
  0xa1   :  { %3368 = vmatmul.mubr.msk.f32.gmra.mxu0 %vm115_vm0, %v3985_v35  ;;  %3396 = vmatmul.mubr.msk.f32.gmra.mxu1 %vm115_vm0, %v3996_v38 }
  0xa2   :  { %769 = vmatprep.mubr.f32.mxu0 %v5819_v0  ;;  %1070 = vmatprep.mubr.f32.mxu1 %v5819_v0 }
  0xa5   :  { %3369 = vmatmul.mubr.msk.f32.gmra.mxu0 %vm115_vm0, %v3996_v38  ;;  %3397 = vmatmul.mubr.msk.f32.gmra.mxu1 %vm115_vm0, %v4007_v41 }
  0xa6   :  { %775 = vmatprep.mubr.f32.mxu0 %v5819_v0  ;;  %1076 = vmatprep.mubr.f32.mxu1 %v5819_v0 }
  0xa9   :  { %3370 = vmatmul.mubr.msk.f32.gmra.mxu0 %vm115_vm0, %v4007_v41  ;;  %3398 = vmatmul.mubr.msk.f32.gmra.mxu1 %vm115_vm0, %v4018_v42 }
  0xaa   :  { %781 = vmatprep.mubr.f32.mxu0 %v5819_v0  ;;  %1082 = vmatprep.mubr.f32.mxu1 %v5819_v0 }
  0xad   :  { %3371 = vmatmul.mubr.msk.f32.gmra.mxu0 %vm115_vm0, %v4018_v42  ;;  %3399 = vmatmul.mubr.msk.f32.gmra.mxu1 %vm115_vm0, %v4029_v43 }
  0xae   :  { %787 = vmatprep.mubr.f32.mxu0 %v5819_v0  ;;  %1088 = vmatprep.mubr.f32.mxu1 %v5819_v0 }
  0xb1   :  { %3372 = vmatmul.mubr.msk.f32.gmra.mxu0 %vm115_vm0, %v4029_v43  ;;  %3400 = vmatmul.mubr.msk.f32.gmra.mxu1 %vm115_vm0, %v4040_v44 }
  0xb2   :  { %793 = vmatprep.mubr.f32.mxu0 %v5819_v0  ;;  %1094 = vmatprep.mubr.f32.mxu1 %v5819_v0 }
  0xb5   :  { %3373 = vmatmul.mubr.msk.f32.gmra.mxu0 %vm115_vm0, %v4040_v44  ;;  %3401 = vmatmul.mubr.msk.f32.gmra.mxu1 %vm115_vm0, %v4051_v45 }
  0xb6   :  { %799 = vmatprep.mubr.f32.mxu0 %v5819_v0  ;;  %1100 = vmatprep.mubr.f32.mxu1 %v5819_v0 }
  0xb9   :  { %3374 = vmatmul.mubr.msk.f32.gmra.mxu0 %vm115_vm0, %v4051_v45  ;;  %3402 = vmatmul.mubr.msk.f32.gmra.mxu1 %vm115_vm0, %v4062_v46 }
  0xba   :  { %805 = vmatprep.mubr.f32.mxu0 %v5819_v0  ;;  %1106 = vmatprep.mubr.f32.mxu1 %v5819_v0 }
  0xbd   :  { %3375 = vmatmul.mubr.msk.f32.gmra.mxu0 %vm115_vm0, %v4062_v46  ;;  %3403 = vmatmul.mubr.msk.f32.gmra.mxu1 %vm115_vm0, %v4073_v47 }
  0xbe   :  { %811 = vmatprep.mubr.f32.mxu0 %v5819_v0  ;;  %1112 = vmatprep.mubr.f32.mxu1 %v5819_v0 }
  0xc1   :  { %3376 = vmatmul.mubr.msk.f32.gmra.mxu0 %vm115_vm0, %v4073_v47  ;;  %3404 = vmatmul.mubr.msk.f32.gmra.mxu1 %vm115_vm0, %v4084_v48 }
  0xc2   :  { %817 = vmatprep.mubr.f32.mxu0 %v5819_v0  ;;  %1118 = vmatprep.mubr.f32.mxu1 %v5819_v0 }
  0xc5   :  { %3377 = vmatmul.mubr.msk.f32.gmra.mxu0 %vm115_vm0, %v4084_v48  ;;  %3405 = vmatmul.mubr.msk.f32.gmra.mxu1 %vm115_vm0, %v4095_v49 }
  0xc6   :  { %823 = vmatprep.mubr.f32.mxu0 %v5819_v0  ;;  %1124 = vmatprep.mubr.f32.mxu1 %v5819_v0 }
  0xc9   :  { %3378 = vmatmul.mubr.msk.f32.gmra.mxu0 %vm115_vm0, %v4095_v49  ;;  %3406 = vmatmul.mubr.msk.f32.gmra.mxu1 %vm115_vm0, %v4106_v50 }
  0xca   :  { %829 = vmatprep.mubr.f32.mxu0 %v5819_v0  ;;  %1130 = vmatprep.mubr.f32.mxu1 %v5819_v0 }
  0xcd   :  { %3379 = vmatmul.mubr.msk.f32.gmra.mxu0 %vm115_vm0, %v4106_v50  ;;  %3407 = vmatmul.mubr.msk.f32.gmra.mxu1 %vm115_vm0, %v4117_v51 }
  0xce   :  { %835 = vmatprep.mubr.f32.mxu0 %v5819_v0  ;;  %1136 = vmatprep.mubr.f32.mxu1 %v5819_v0 }
  0xd1   :  { %3380 = vmatmul.mubr.msk.f32.gmra.mxu0 %vm115_vm0, %v4117_v51  ;;  %3408 = vmatmul.mubr.msk.f32.gmra.mxu1 %vm115_vm0, %v4128_v52 }
  0xd2   :  { %841 = vmatprep.mubr.f32.mxu0 %v5819_v0  ;;  %1142 = vmatprep.mubr.f32.mxu1 %v5819_v0 }
  0xd5   :  { %3381 = vmatmul.mubr.msk.f32.gmra.mxu0 %vm115_vm0, %v4128_v52  ;;  %3409 = vmatmul.mubr.msk.f32.gmra.mxu1 %vm115_vm0, %v4139_v53 }
  0xd6   :  { %847 = vmatprep.mubr.f32.mxu0 %v5819_v0  ;;  %1148 = vmatprep.mubr.f32.mxu1 %v5819_v0 }
  0xd9   :  { %3382 = vmatmul.mubr.msk.f32.gmra.mxu0 %vm115_vm0, %v4139_v53  ;;  %3410 = vmatmul.mubr.msk.f32.gmra.mxu1 %vm115_vm0, %v4150_v54 }
  0xda   :  { %853 = vmatprep.mubr.f32.mxu0 %v5819_v0  ;;  %1154 = vmatprep.mubr.f32.mxu1 %v5819_v0 }
  0xdd   :  { %3383 = vmatmul.mubr.msk.f32.gmra.mxu0 %vm115_vm0, %v4150_v54  ;;  %3411 = vmatmul.mubr.msk.f32.gmra.mxu1 %vm115_vm0, %v4161_v55 }
  0xde   :  { %859 = vmatprep.mubr.f32.mxu0 %v5819_v0  ;;  %1160 = vmatprep.mubr.f32.mxu1 %v5819_v0 }
  0xe1   :  { %3384 = vmatmul.mubr.msk.f32.gmra.mxu0 %vm115_vm0, %v4161_v55  ;;  %3412 = vmatmul.mubr.msk.f32.gmra.mxu1 %vm115_vm0, %v4172_v56 }
  0xe2   :  { %865 = vmatprep.mubr.f32.mxu0 %v5819_v0  ;;  %1166 = vmatprep.mubr.f32.mxu1 %v5819_v0 }
  0xe5   :  { %v266_v7 = vpop.f32.mrf.mxu0  ;;  %v502_v8 = vpop.f32.mrf.mxu1  ;;  %3385 = vmatmul.mubr.msk.f32.gmra.mxu0 %vm115_vm0, %v4172_v56  ;;  %3413 = vmatmul.mubr.msk.f32.gmra.mxu1 %vm115_vm0, %v4183_v57 }
  0xe6   :  { %v4370_v9 = vadd.f32 %v502_v8, %v266_v7  ;;  %871 = vmatprep.mubr.f32.mxu0 %v5819_v0  ;;  %1172 = vmatprep.mubr.f32.mxu1 %v5819_v0 }
  0xe7   :  { %v4374_v10 = vpop.f32.mrf.mxu0  ;;  %v4376_v11 = vpop.f32.mrf.mxu1 }
  0xe8   :  { %5825 = vst [vmem:[#allocation8_spill] sm:$0xff] %v4374_v10  ;;  %5826 = vst [vmem:[#allocation9_spill] sm:$0xff] %v4376_v11 }
  0xe9   :  { %v272_v12 = vpop.f32.mrf.mxu0  ;;  %v508_v13 = vpop.f32.mrf.mxu1  ;;  %3386 = vmatmul.mubr.msk.f32.gmra.mxu0 %vm115_vm0, %v4183_v57  ;;  %3414 = vmatmul.mubr.msk.f32.gmra.mxu1 %vm115_vm0, %v4194_v58 }
  0xea   :  { %v4382_v14 = vadd.f32 %v508_v13, %v272_v12  ;;  %877 = vmatprep.mubr.f32.mxu0 %v5819_v0  ;;  %1178 = vmatprep.mubr.f32.mxu1 %v5819_v0 }
  0xeb   :  { %v4386_v15 = vpop.f32.mrf.mxu0  ;;  %v4388_v16 = vpop.f32.mrf.mxu1 }
  0xec   :  { %5827 = vst [vmem:[#allocation10_spill] sm:$0xff] %v4386_v15  ;;  %5828 = vst [vmem:[#allocation11_spill] sm:$0xff] %v4388_v16 }
  0xed   :  { %v278_v17 = vpop.f32.mrf.mxu0  ;;  %v514_v18 = vpop.f32.mrf.mxu1  ;;  %3387 = vmatmul.mubr.msk.f32.gmra.mxu0 %vm115_vm0, %v4194_v58  ;;  %3415 = vmatmul.mubr.msk.f32.gmra.mxu1 %vm115_vm0, %v4205_v59 }
  0xee   :  { %v4394_v19 = vadd.f32 %v514_v18, %v278_v17  ;;  %883 = vmatprep.mubr.f32.mxu0 %v5819_v0  ;;  %1184 = vmatprep.mubr.f32.mxu1 %v5819_v0 }
  0xef   :  { %v4398_v20 = vpop.f32.mrf.mxu0  ;;  %v4400_v21 = vpop.f32.mrf.mxu1 }
  0xf0   :  { %5829 = vst [vmem:[#allocation12_spill] sm:$0xff] %v4398_v20  ;;  %5830 = vst [vmem:[#allocation13_spill] sm:$0xff] %v4400_v21 }
  0xf1   :  { %v284_v22 = vpop.f32.mrf.mxu0  ;;  %v520_v23 = vpop.f32.mrf.mxu1  ;;  %3388 = vmatmul.mubr.msk.f32.gmra.mxu0 %vm115_vm0, %v4205_v59  ;;  %3416 = vmatmul.mubr.msk.f32.gmra.mxu1 %vm115_vm0, %v4216_v60 }
  0xf2   :  { %v4406_v24 = vadd.f32 %v520_v23, %v284_v22  ;;  %889 = vmatprep.mubr.f32.mxu0 %v5819_v0  ;;  %1190 = vmatprep.mubr.f32.mxu1 %v5819_v0 }
  0xf3   :  { %v4410_v25 = vpop.f32.mrf.mxu0  ;;  %v4412_v26 = vpop.f32.mrf.mxu1 }
  0xf4   :  { %5831 = vst [vmem:[#allocation14_spill] sm:$0xff] %v4410_v25  ;;  %5832 = vst [vmem:[#allocation15_spill] sm:$0xff] %v4412_v26 }
  0xf5   :  { %v290_v27 = vpop.f32.mrf.mxu0  ;;  %v526_v28 = vpop.f32.mrf.mxu1  ;;  %3389 = vmatmul.mubr.msk.f32.gmra.mxu0 %vm115_vm0, %v4216_v60  ;;  %3417 = vmatmul.mubr.msk.f32.gmra.mxu1 %vm115_vm0, %v4227_v61 }
  0xf6   :  { %v4418_v29 = vadd.f32 %v526_v28, %v290_v27  ;;  %895 = vmatprep.mubr.f32.mxu0 %v5819_v0  ;;  %1196 = vmatprep.mubr.f32.mxu1 %v5819_v0 }
  0xf7   :  { %v4422_v31 = vpop.f32.mrf.mxu0  ;;  %v4424_v32 = vpop.f32.mrf.mxu1 }
  0xf8   :  { %5833 = vst [vmem:[#allocation16_spill] sm:$0xff] %v4422_v31  ;;  %5834 = vst [vmem:[#allocation17_spill] sm:$0xff] %v4424_v32 }
  0xf9   :  { %v296_v33 = vpop.f32.mrf.mxu0  ;;  %v532_v34 = vpop.f32.mrf.mxu1  ;;  %3390 = vmatmul.mubr.msk.f32.gmra.mxu0 %vm115_vm0, %v4227_v61  ;;  %3418 = vmatmul.mubr.msk.f32.gmra.mxu1 %vm115_vm0, %v4238_v62 }
  0xfa   :  { %v4430_v36 = vadd.f32 %v532_v34, %v296_v33  ;;  %901 = vmatprep.mubr.f32.mxu0 %v5819_v0  ;;  %1202 = vmatprep.mubr.f32.mxu1 %v5819_v0 }
  0xfb   :  { %v4439_v39 = vpop.f32.mrf.mxu0  ;;  %v4441_v40 = vpop.f32.mrf.mxu1 }
  0xfc   :  { %5835 = vst [vmem:[#allocation18_spill] sm:$0xff] %v4439_v39  ;;  %5836 = vst [vmem:[#allocation19_spill] sm:$0xff] %v4441_v40  ;;  %v1776_v40 = vld [vmem:[#allocation4 + $0x128] sm:$0xff]  ;;  %v1775_v39 = vld [vmem:[#allocation4 + $0x120] sm:$0xff] }
  0xfd   :  { %v302_v63 = vpop.f32.mrf.mxu0  ;;  %v538_v1 = vpop.f32.mrf.mxu1  ;;  %3391 = vmatmul.mubr.msk.f32.gmra.mxu0 %vm115_vm0, %v4238_v62  ;;  %3419 = vmatmul.mubr.msk.f32.gmra.mxu1 %vm115_vm0, %v4437_v37 }
  0xfe   :  { %v4447_v2 = vadd.f32 %v538_v1, %v302_v63  ;;  %907 = vmatprep.mubr.f32.mxu0 %v5819_v0  ;;  %1208 = vmatprep.mubr.f32.mxu1 %v5819_v0 }
  0xff   :  { %v4456_v4 = vpop.f32.mrf.mxu0  ;;  %v4458_v5 = vpop.f32.mrf.mxu1 }
 0x100   :  { %5837 = vst [vmem:[#allocation20_spill] sm:$0xff] %v4456_v4  ;;  %5838 = vst [vmem:[#allocation21_spill] sm:$0xff] %v4458_v5 }
 0x101   :  { %v308_v6 = vpop.f32.mrf.mxu0  ;;  %v544_v7 = vpop.f32.mrf.mxu1  ;;  %3392 = vmatmul.mubr.msk.f32.gmra.mxu0 %vm115_vm0, %v4437_v37  ;;  %3420 = vmatmul.mubr.msk.f32.gmra.mxu1 %vm115_vm0, %v4454_v3 }
 0x102   :  { %v4464_v8 = vadd.f32 %v544_v7, %v308_v6  ;;  %1347 = vmatprep.mubr.f32.mxu0 %v5819_v0  ;;  %1885 = vmatprep.mubr.f32.mxu1 %v5819_v0 }
 0x103   :  { %v4468_v12 = vpop.f32.mrf.mxu0  ;;  %v4470_v13 = vpop.f32.mrf.mxu1 }
 0x104   :  { %5839 = vst [vmem:[#allocation22_spill] sm:$0xff] %v4468_v12  ;;  %5840 = vst [vmem:[#allocation23_spill] sm:$0xff] %v4470_v13 }
 0x105   :  { %v314_v17 = vpop.f32.mrf.mxu0  ;;  %v550_v18 = vpop.f32.mrf.mxu1  ;;  %3421 = vmatmul.mubr.msk.f32.vlgmr.msra.gmra.mxu0 %vm115_vm0, %v3974_v30 }
 0x106   :  { %v4474_v22 = vadd.f32 %v550_v18, %v314_v17  ;;  %1353 = vmatprep.mubr.f32.mxu0 %v5819_v0 }
 0x107   :  { %v4477_v23 = vpop.f32.mrf.mxu0  ;;  %v4479_v27 = vpop.f32.mrf.mxu1 }
 0x108   :  { %5841 = vst [vmem:[#allocation24_spill] sm:$0xff] %v4477_v23  ;;  %5842 = vst [vmem:[#allocation25_spill] sm:$0xff] %v4479_v27 }
 0x109   :  { %v320_v28 = vpop.f32.mrf.mxu0  ;;  %v556_v33 = vpop.f32.mrf.mxu1  ;;  %3422 = vmatmul.mubr.msk.f32.gmra.mxu0 %vm115_vm0, %v3985_v35 }
 0x10a   :  { %v4483_v34 = vadd.f32 %v556_v33, %v320_v28  ;;  %1359 = vmatprep.mubr.f32.mxu0 %v5819_v0 }
 0x10b   :  { %v4486_v63 = vpop.f32.mrf.mxu0  ;;  %v4488_v30 = vpop.f32.mrf.mxu1 }
 0x10c   :  { %5843 = vst [vmem:[#allocation26_spill] sm:$0xff] %v4486_v63  ;;  %5844 = vst [vmem:[#allocation27_spill] sm:$0xff] %v4488_v30  ;;  %v1782_v30 = vld [vmem:[#allocation4 + $0x158] sm:$0xf]  ;;  %v1779_v63 = vld [vmem:[#allocation4 + $0x140] sm:$0xff] }
 0x10d   :  { %v326_v1 = vpop.f32.mrf.mxu0  ;;  %v562_v6 = vpop.f32.mrf.mxu1  ;;  %3423 = vmatmul.mubr.msk.f32.gmra.mxu0 %vm115_vm0, %v3996_v38  ;;  %3449 = vmatprep.subr.msk.mxu1 %vm1814_vm1, %v1782_v30 }
 0x10e   :  { %v4492_v7 = vadd.f32 %v562_v6, %v326_v1  ;;  %1365 = vmatprep.mubr.f32.mxu0 %v5819_v0  ;;  %v1781_v6 = vld [vmem:[#allocation4 + $0x150] sm:$0xf] }
 0x10f   :  { %v4495_v17 = vpop.f32.mrf.mxu0  ;;  %v4497_v35 = vpop.f32.mrf.mxu1  ;;  %3450 = vmatpush1.msk.msra.mxu1 %vm1814_vm1, %v1781_v6 }
 0x110   :  { %5845 = vst [vmem:[#allocation28_spill] sm:$0xff] %v4495_v17  ;;  %5846 = vst [vmem:[#allocation29_spill] sm:$0xff] %v4497_v35 }
 0x111   :  { %v332_v18 = vpop.f32.mrf.mxu0  ;;  %v568_v28 = vpop.f32.mrf.mxu1  ;;  %3424 = vmatmul.mubr.msk.f32.gmra.mxu0 %vm115_vm0, %v4007_v41 }
 0x112   :  { %v4501_v33 = vadd.f32 %v568_v28, %v332_v18  ;;  %1371 = vmatprep.mubr.f32.mxu0 %v5819_v0 }
 0x113   :  { %v4504_v38 = vpop.f32.mrf.mxu0  ;;  %v4506_v1 = vpop.f32.mrf.mxu1 }
 0x114   :  { %5847 = vst [vmem:[#allocation30_spill] sm:$0xff] %v4504_v38  ;;  %5848 = vst [vmem:[#allocation31_spill] sm:$0xff] %v4506_v1 }
 0x115   :  { %v338_v17 = vpop.f32.mrf.mxu0  ;;  %v574_v35 = vpop.f32.mrf.mxu1  ;;  %3425 = vmatmul.mubr.msk.f32.gmra.mxu0 %vm115_vm0, %v4018_v42 }
 0x116   :  { %v4512_v41 = vadd.f32 %v574_v35, %v338_v17  ;;  %1377 = vmatprep.mubr.f32.mxu0 %v5819_v0 }
 0x117   :  { %v4515_v18 = vpop.f32.mrf.mxu0  ;;  %v4517_v28 = vpop.f32.mrf.mxu1 }
 0x118   :  { %5849 = vst [vmem:[#allocation32_spill] sm:$0xff] %v4515_v18  ;;  %5850 = vst [vmem:[#allocation33_spill] sm:$0xff] %v4517_v28  ;;  %v1780_v28 = vld [vmem:[#allocation4 + $0x148] sm:$0xff] }
 0x119   :  { %v344_v38 = vpop.f32.mrf.mxu0  ;;  %v580_v1 = vpop.f32.mrf.mxu1  ;;  %3426 = vmatmul.mubr.msk.f32.gmra.mxu0 %vm115_vm0, %v4029_v43  ;;  %1833 = vmatprep.subr.mxu1 %v1780_v28 }
 0x11a   :  { %v4521_v30 = vadd.f32 %v580_v1, %v344_v38  ;;  %1383 = vmatprep.mubr.f32.mxu0 %v5819_v0  ;;  %1834 = vmatpush1.msra.mxu1 %v1779_v63 }
 0x11b   :  { %v4524_v42 = vpop.f32.mrf.mxu0  ;;  %v4526_v6 = vpop.f32.mrf.mxu1 }
 0x11c   :  { %5851 = vst [vmem:[#allocation34_spill] sm:$0xff] %v4524_v42  ;;  %5852 = vst [vmem:[#allocation35_spill] sm:$0xff] %v4526_v6 }
 0x11d   :  { %v350_v17 = vpop.f32.mrf.mxu0  ;;  %v586_v35 = vpop.f32.mrf.mxu1  ;;  %3427 = vmatmul.mubr.msk.f32.gmra.mxu0 %vm115_vm0, %v4040_v44 }
 0x11e   :  { %v4530_v18 = vadd.f32 %v586_v35, %v350_v17  ;;  %1389 = vmatprep.mubr.f32.mxu0 %v5819_v0 }
 0x11f   :  { %v4533_v43 = vpop.f32.mrf.mxu0  ;;  %v4535_v38 = vpop.f32.mrf.mxu1 }
 0x121   :  { %v356_v1 = vpop.f32.mrf.mxu0  ;;  %v592_v42 = vpop.f32.mrf.mxu1  ;;  %3428 = vmatmul.mubr.msk.f32.gmra.mxu0 %vm115_vm0, %v4051_v45 }
 0x122   :  { %v4539_v6 = vadd.f32 %v592_v42, %v356_v1  ;;  %1395 = vmatprep.mubr.f32.mxu0 %v5819_v0  ;;  %v1778_v42 = vld [vmem:[#allocation4 + $0x138] sm:$0xff]  ;;  %v1777_v1 = vld [vmem:[#allocation4 + $0x130] sm:$0xff] }
 0x123   :  { %v4542_v44 = vpop.f32.mrf.mxu0  ;;  %v4544_v17 = vpop.f32.mrf.mxu1  ;;  %1835 = vmatprep.subr.mxu1 %v1778_v42 }
 0x124   :  { %1836 = vmatpush1.msra.mxu1 %v1777_v1 }
 0x125   :  { %v362_v35 = vpop.f32.mrf.mxu0  ;;  %v598_v27 = vpop.f32.mrf.mxu1  ;;  %3429 = vmatmul.mubr.msk.f32.gmra.mxu0 %vm115_vm0, %v4062_v46  ;;  %1837 = vmatprep.subr.mxu1 %v1776_v40 }
 0x126   :  { %v4548_v28 = vadd.f32 %v598_v27, %v362_v35  ;;  %1401 = vmatprep.mubr.f32.mxu0 %v5819_v0  ;;  %1838 = vmatpush1.msra.mxu1 %v1775_v39 }
 0x127   :  { %v4551_v63 = vpop.f32.mrf.mxu0  ;;  %v4553_v45 = vpop.f32.mrf.mxu1 }
 0x129   :  { %v368_v23 = vpop.f32.mrf.mxu0  ;;  %v604_v13 = vpop.f32.mrf.mxu1  ;;  %3430 = vmatmul.mubr.msk.f32.gmra.mxu0 %vm115_vm0, %v4073_v47 }
 0x12a   :  { %v4557_v12 = vadd.f32 %v604_v13, %v368_v23  ;;  %1407 = vmatprep.mubr.f32.mxu0 %v5819_v0 }
 0x12b   :  { %v4560_v46 = vpop.f32.mrf.mxu0  ;;  %v4562_v27 = vpop.f32.mrf.mxu1 }
 0x12d   :  { %v374_v35 = vpop.f32.mrf.mxu0  ;;  %v610_v5 = vpop.f32.mrf.mxu1  ;;  %3431 = vmatmul.mubr.msk.f32.gmra.mxu0 %vm115_vm0, %v4084_v48 }
 0x12e   :  { %v4566_v4 = vadd.f32 %v610_v5, %v374_v35  ;;  %1413 = vmatprep.mubr.f32.mxu0 %v5819_v0 }
 0x12f   :  { %v4569_v47 = vpop.f32.mrf.mxu0  ;;  %v4571_v13 = vpop.f32.mrf.mxu1 }
 0x131   :  { %v380_v23 = vpop.f32.mrf.mxu0  ;;  %v616_v42 = vpop.f32.mrf.mxu1  ;;  %3432 = vmatmul.mubr.msk.f32.gmra.mxu0 %vm115_vm0, %v4095_v49 }
 0x132   :  { %v4575_v1 = vadd.f32 %v616_v42, %v380_v23  ;;  %1419 = vmatprep.mubr.f32.mxu0 %v5819_v0 }
 0x133   :  { %v4578_v48 = vpop.f32.mrf.mxu0  ;;  %v4580_v5 = vpop.f32.mrf.mxu1 }
 0x135   :  { %v386_v35 = vpop.f32.mrf.mxu0  ;;  %v622_v32 = vpop.f32.mrf.mxu1  ;;  %3433 = vmatmul.mubr.msk.f32.gmra.mxu0 %vm115_vm0, %v4106_v50 }
 0x136   :  { %v4584_v31 = vadd.f32 %v622_v32, %v386_v35  ;;  %1425 = vmatprep.mubr.f32.mxu0 %v5819_v0  ;;  %v1774_v32 = vld [vmem:[#allocation4 + $0x118] sm:$0xff]  ;;  %v1773_v35 = vld [vmem:[#allocation4 + $0x110] sm:$0xff] }
 0x137   :  { %v4587_v49 = vpop.f32.mrf.mxu0  ;;  %v4589_v23 = vpop.f32.mrf.mxu1  ;;  %1839 = vmatprep.subr.mxu1 %v1774_v32 }
 0x138   :  { %1840 = vmatpush1.msra.mxu1 %v1773_v35 }
 0x139   :  { %v392_v42 = vpop.f32.mrf.mxu0  ;;  %v628_v26 = vpop.f32.mrf.mxu1  ;;  %3434 = vmatmul.mubr.msk.f32.gmra.mxu0 %vm115_vm0, %v4117_v51 }
 0x13a   :  { %v4593_v40 = vadd.f32 %v628_v26, %v392_v42  ;;  %1431 = vmatprep.mubr.f32.mxu0 %v5819_v0 }
 0x13b   :  { %v4596_v39 = vpop.f32.mrf.mxu0  ;;  %v4598_v50 = vpop.f32.mrf.mxu1 }
 0x13d   :  { %v398_v25 = vpop.f32.mrf.mxu0  ;;  %v634_v21 = vpop.f32.mrf.mxu1  ;;  %3435 = vmatmul.mubr.msk.f32.gmra.mxu0 %vm115_vm0, %v4128_v52 }
 0x13e   :  { %v4602_v20 = vadd.f32 %v634_v21, %v398_v25  ;;  %1437 = vmatprep.mubr.f32.mxu0 %v5819_v0 }
 0x13f   :  { %v4605_v51 = vpop.f32.mrf.mxu0  ;;  %v4607_v26 = vpop.f32.mrf.mxu1 }
 0x141   :  { %v404_v42 = vpop.f32.mrf.mxu0  ;;  %v640_v16 = vpop.f32.mrf.mxu1  ;;  %3436 = vmatmul.mubr.msk.f32.gmra.mxu0 %vm115_vm0, %v4139_v53 }
 0x142   :  { %v4611_v15 = vadd.f32 %v640_v16, %v404_v42  ;;  %1443 = vmatprep.mubr.f32.mxu0 %v5819_v0 }
 0x143   :  { %v4614_v52 = vpop.f32.mrf.mxu0  ;;  %v4616_v21 = vpop.f32.mrf.mxu1 }
 0x144   :  { %5853 = vst [vmem:[#allocation36_spill] sm:$0xff] %v4611_v15  ;;  %5854 = vst [vmem:[#allocation37_spill] sm:$0xff] %v4616_v21  ;;  %v1772_v15 = vld [vmem:[#allocation4 + $0x108] sm:$0xff]  ;;  %v1771_v21 = vld [vmem:[#allocation4 + $0x100] sm:$0xff] }
 0x145   :  { %v410_v25 = vpop.f32.mrf.mxu0  ;;  %v646_v32 = vpop.f32.mrf.mxu1  ;;  %3437 = vmatmul.mubr.msk.f32.gmra.mxu0 %vm115_vm0, %v4150_v54  ;;  %1841 = vmatprep.subr.mxu1 %v1772_v15 }
 0x146   :  { %v4620_v35 = vadd.f32 %v646_v32, %v410_v25  ;;  %1449 = vmatprep.mubr.f32.mxu0 %v5819_v0  ;;  %1842 = vmatpush1.msra.mxu1 %v1771_v21 }
 0x147   :  { %v4623_v11 = vpop.f32.mrf.mxu0  ;;  %v4625_v53 = vpop.f32.mrf.mxu1 }
 0x148   :  { %5855 = vst [vmem:[#allocation38_spill] sm:$0xff] %v4620_v35  ;;  %5856 = vst [vmem:[#allocation39_spill] sm:$0xff] %v4625_v53 }
 0x149   :  { %v416_v16 = vpop.f32.mrf.mxu0  ;;  %v652_v42 = vpop.f32.mrf.mxu1  ;;  %3438 = vmatmul.mubr.msk.f32.gmra.mxu0 %vm115_vm0, %v4161_v55 }
 0x14a   :  { %v4629_v10 = vadd.f32 %v652_v42, %v416_v16  ;;  %1455 = vmatprep.mubr.f32.mxu0 %v5819_v0 }
 0x14b   :  { %v4632_v54 = vpop.f32.mrf.mxu0  ;;  %v4634_v25 = vpop.f32.mrf.mxu1 }
 0x14c   :  { %5857 = vst [vmem:[#allocation40_spill] sm:$0xff] %v4629_v10  ;;  %5858 = vst [vmem:[#allocation41_spill] sm:$0xff] %v4634_v25 }
 0x14d   :  { %v422_v32 = vpop.f32.mrf.mxu0  ;;  %v658_v35 = vpop.f32.mrf.mxu1  ;;  %3439 = vmatmul.mubr.msk.f32.gmra.mxu0 %vm115_vm0, %v4172_v56 }
 0x14e   :  { %v4638_v53 = vadd.f32 %v658_v35, %v422_v32  ;;  %1461 = vmatprep.mubr.f32.mxu0 %v5819_v0  ;;  %v1770_v35 = vld [vmem:[#allocation4 + $0xf8] sm:$0xff]  ;;  %v1769_v32 = vld [vmem:[#allocation4 + $0xf0] sm:$0xff] }
 0x14f   :  { %v4641_v55 = vpop.f32.mrf.mxu0  ;;  %v4643_v16 = vpop.f32.mrf.mxu1  ;;  %1843 = vmatprep.subr.mxu1 %v1770_v35  ;;  %v1766_v35 = vld [vmem:[#allocation4 + $0xd8] sm:$0xff] }
 0x150   :  { %5859 = vst [vmem:[#allocation42_spill] sm:$0xff] %v4638_v53  ;;  %5860 = vst [vmem:[#allocation43_spill] sm:$0xff] %v4641_v55  ;;  %1844 = vmatpush1.msra.mxu1 %v1769_v32  ;;  %v1768_v55 = vld [vmem:[#allocation4 + $0xe8] sm:$0xff]  ;;  %v2278_v32 = vld [vmem:[#allocation4 + $0x2b0] sm:$0xf] }
 0x151   :  { %5861 = vst [vmem:[#allocation44_spill] sm:$0xff] %v4643_v16  ;;  %v428_v42 = vpop.f32.mrf.mxu0  ;;  %v664_v10 = vpop.f32.mrf.mxu1  ;;  %3440 = vmatmul.mubr.msk.f32.gmra.mxu0 %vm115_vm0, %v4183_v57  ;;  %1845 = vmatprep.subr.mxu1 %v1768_v55  ;;  %v2277_v55 = vld [vmem:[#allocation4 + $0x2a8] sm:$0xff] }
 0x152   :  { %v4647_v15 = vadd.f32 %v664_v10, %v428_v42  ;;  %1467 = vmatprep.mubr.f32.mxu0 %v5819_v0  ;;  %v1767_v10 = vld [vmem:[#allocation4 + $0xe0] sm:$0xff] }
 0x153   :  { %v4650_v21 = vpop.f32.mrf.mxu0  ;;  %v4652_v56 = vpop.f32.mrf.mxu1  ;;  %1846 = vmatpush1.msra.mxu1 %v1767_v10  ;;  %v5868_v10 = vmov 0.0  }
 0x154   :  { %5862 = vst [vmem:[#allocation45_spill] sm:$0xff] %v4647_v15  ;;  %5863 = vst [vmem:[#allocation46_spill] sm:$0xff] %v4650_v21  ;;  %1847 = vmatprep.subr.mxu1 %v1766_v35 }
 0x155   :  { %5864 = vst [vmem:[#allocation47_spill] sm:$0xff] %v4652_v56  ;;  %v747_v53 = vpop.f32.mrf.mxu0  ;;  %3441 = vmatmul.mubr.msk.f32.gmra.mxu0 %vm115_vm0, %v4194_v58  ;;  %v1048_v16 = vpop.f32.mrf.mxu1  ;;  %v2279_v56 = vld [vmem:[#allocation4 + $0x2b8] sm:$0xf]  ;;  %v1765_v58 = vld [vmem:[#allocation4 + $0xd0] sm:$0xff] }
 0x156   :  { %v914_v57 = vadd.f32 %v747_v53, %v4370_v9  ;;  %1473 = vmatprep.mubr.f32.mxu0 %v5819_v0  ;;  %3485 = vmatprep.subr.msk.mxu0 %vm1814_vm1, %v2279_v56  ;;  %v1764_v53 = vld [vmem:[#allocation4 + $0xc8] sm:$0xff]  ;;  %v1762_v56 = vld [vmem:[#allocation4 + $0xb8] sm:$0xff] }
 0x157   :  { %v4658_v42 = vpop.f32.mrf.mxu0  ;;  %v4660_v15 = vpop.f32.mrf.mxu1  ;;  %1848 = vmatpush1.msra.mxu1 %v1765_v58  ;;  %3486 = vmatpush1.msk.msra.mxu0 %vm1814_vm1, %v2278_v32  ;;  %v2274_v58 = vld [vmem:[#allocation4 + $0x290] sm:$0xff] }
 0x158   :  { %5865 = vst [vmem:[#allocation48_spill] sm:$0xff] %v4658_v42  ;;  %5866 = vst [vmem:[#allocation49_spill] sm:$0xff] %v4660_v15  ;;  %v4662_v21 = vadd.f32 %v1048_v16, %v914_v57  ;;  %v1763_v16 = vld [vmem:[#allocation4 + $0xc0] sm:$0xff]  ;;  %1849 = vmatprep.subr.mxu1 %v1764_v53  ;;  %2301 = vmatprep.subr.mxu0 %v2277_v55  ;;  %v2271_v53 = vld [vmem:[#allocation4 + $0x278] sm:$0xff] }
 0x159   :  { %v753_v25 = vpop.f32.mrf.mxu0  ;;  %3442 = vmatmul.mubr.msk.f32.gmra.mxu0 %vm115_vm0, %v4205_v59  ;;  %v1054_v9 = vpop.f32.mrf.mxu1  ;;  %v2276_v57 = vld [vmem:[#allocation4 + $0x2a0] sm:$0xff]  ;;  %1850 = vmatpush1.msra.mxu1 %v1763_v16  ;;  %v1761_v59 = vld [vmem:[#allocation4 + $0xb0] sm:$0xff] }
 0x15a   :  { %5867 = vst [vmem:[#allocation50_spill] sm:$0xff] %v4662_v21  ;;  %v916_v0 = vadd.f32 %v753_v25, %v4382_v14  ;;  %1479 = vmatprep.mubr.f32.mxu0 %v5868_v10  ;;  %v2275_v21 = vld [vmem:[#allocation4 + $0x298] sm:$0xff]  ;;  %2302 = vmatpush1.msra.mxu0 %v2276_v57  ;;  %v2273_v14 = vld [vmem:[#allocation4 + $0x288] sm:$0xff]  ;;  %v2268_v57 = vld [vmem:[#allocation4 + $0x260] sm:$0xff] }
 0x15b   :  { %v4670_v35 = vpop.f32.mrf.mxu0  ;;  %1851 = vmatprep.subr.mxu1 %v1762_v56  ;;  %2303 = vmatprep.subr.mxu0 %v2275_v21  ;;  %v4680_v32 = vpop.f32.mrf.mxu1  ;;  %v2269_v21 = vld [vmem:[#allocation4 + $0x268] sm:$0xff]  ;;  %v2267_v56 = vld [vmem:[#allocation4 + $0x258] sm:$0xff] }
 0x15c   :  { %v4672_v15 = vadd.f32 %v1054_v9, %v916_v0  ;;  %1852 = vmatpush1.msra.mxu1 %v1761_v59  ;;  %2304 = vmatpush1.msra.mxu0 %v2274_v58  ;;  %v2272_v9 = vld [vmem:[#allocation4 + $0x280] sm:$0xff]  ;;  %v2265_v58 = vld [vmem:[#allocation4 + $0x248] sm:$0xff] }
 0x15d   :  { %v759_v42 = vpop.f32.mrf.mxu0  ;;  %3443 = vmatmul.mubr.msk.f32.gmra.mxu0 %vm115_vm0, %v4216_v60  ;;  %2305 = vmatprep.subr.mxu0 %v2273_v14  ;;  %v2270_v60 = vld [vmem:[#allocation4 + $0x270] sm:$0xff] }
 0x15e   :  { %v4677_v25 = vadd.f32 %v759_v42, %v4394_v19  ;;  %1485 = vmatprep.mubr.f32.mxu0 %v5868_v10  ;;  %2306 = vmatpush1.msra.mxu0 %v2272_v9  ;;  %v4690_v42 = vpop.f32.mrf.mxu1 }
 0x15f   :  { %v4682_v0 = vpop.f32.mrf.mxu0  ;;  %2307 = vmatprep.subr.mxu0 %v2271_v53  ;;  %v2264_v53 = vld [vmem:[#allocation4 + $0x240] sm:$0xff] }
 0x160   :  { %2308 = vmatpush1.msra.mxu0 %v2270_v60  ;;  %v4700_v14 = vpop.f32.mrf.mxu1 }
 0x161   :  { %v765_v55 = vpop.f32.mrf.mxu0  ;;  %3444 = vmatmul.mubr.msk.f32.gmra.mxu0 %vm115_vm0, %v4227_v61  ;;  %2309 = vmatprep.subr.mxu0 %v2269_v21  ;;  %v2266_v61 = vld [vmem:[#allocation4 + $0x250] sm:$0xff]  ;;  %v2261_v21 = vld [vmem:[#allocation4 + $0x228] sm:$0xff] }
 0x162   :  { %v4687_v19 = vadd.f32 %v765_v55, %v4406_v24  ;;  %1491 = vmatprep.mubr.f32.mxu0 %v5868_v10  ;;  %2310 = vmatpush1.msra.mxu0 %v2268_v57  ;;  %v2263_v55 = vld [vmem:[#allocation4 + $0x238] sm:$0xff]  ;;  %v4710_v57 = vpop.f32.mrf.mxu1 }
 0x163   :  { %v4692_v16 = vpop.f32.mrf.mxu0  ;;  %2311 = vmatprep.subr.mxu0 %v2267_v56  ;;  %v2260_v56 = vld [vmem:[#allocation4 + $0x220] sm:$0xff] }
 0x164   :  { %2312 = vmatpush1.msra.mxu0 %v2266_v61  ;;  %v2259_v61 = vld [vmem:[#allocation4 + $0x218] sm:$0xff] }
 0x165   :  { %v771_v59 = vpop.f32.mrf.mxu0  ;;  %3445 = vmatmul.mubr.msk.f32.gmra.mxu0 %vm115_vm0, %v4238_v62  ;;  %2313 = vmatprep.subr.mxu0 %v2265_v58  ;;  %v2262_v62 = vld [vmem:[#allocation4 + $0x230] sm:$0xff]  ;;  %v97_v58 = vld [vmem:[%s5807_s0 + $0xf8] sm:$0xff] }
 0x166   :  { %v4697_v24 = vadd.f32 %v771_v59, %v4418_v29  ;;  %1497 = vmatprep.mubr.f32.mxu0 %v5868_v10  ;;  %2314 = vmatpush1.msra.mxu0 %v2264_v53  ;;  %v4723_v53 = vpop.f32.mrf.mxu1 }
 0x167   :  { %v4702_v9 = vpop.f32.mrf.mxu0  ;;  %2315 = vmatprep.subr.mxu0 %v2263_v55 }
 0x168   :  { %5869 = vst [vmem:[#allocation51_spill] sm:$0xff] %v4697_v24  ;;  %2316 = vmatpush1.msra.mxu0 %v2262_v62 }
 0x169   :  { %v777_v60 = vpop.f32.mrf.mxu0  ;;  %3446 = vmatmul.mubr.msk.f32.gmra.mxu0 %vm115_vm0, %v4437_v37  ;;  %2317 = vmatprep.subr.mxu0 %v2261_v21  ;;  %v2258_v37 = vld [vmem:[#allocation4 + $0x210] sm:$0xff] }
 0x16a   :  { %v4707_v29 = vadd.f32 %v777_v60, %v4430_v36  ;;  %1503 = vmatprep.mubr.f32.mxu0 %v5868_v10  ;;  %2318 = vmatpush1.msra.mxu0 %v2260_v56 }
 0x16b   :  { %v4712_v59 = vpop.f32.mrf.mxu0  ;;  %2319 = vmatprep.subr.mxu0 %v2259_v61 }
 0x16c   :  { %2320 = vmatpush1.msra.mxu0 %v2258_v37 }
 0x16d   :  { %v783_v24 = vpop.f32.mrf.mxu0  ;;  %3447 = vmatmul.mubr.msk.f32.gmra.mxu0 %vm115_vm0, %v4454_v3  ;;  %3643 = vmatprep.subr.mxu0 %v5868_v10  ;;  %v4733_v3 = vpop.f32.mrf.mxu1 }
 0x16e   :  { %v4717_v36 = vadd.f32 %v783_v24, %v4447_v2  ;;  %1509 = vmatprep.mubr.f32.mxu0 %v5868_v10 }
 0x16f   :  { %v4725_v55 = vpop.f32.mrf.mxu0  ;;  %v4740_v56 = vpop.f32.mrf.mxu1 }
 0x171   :  { %v789_v60 = vpop.f32.mrf.mxu0  ;;  %3448 = vmatmul.mubr.msk.f32.gmra.mxu0 %vm115_vm0, %v97_v58 }
 0x172   :  { %v4730_v2 = vadd.f32 %v789_v60, %v4464_v8  ;;  %2353 = vmatprep.mubr.f32.mxu0 %v5868_v10  ;;  %v4747_v8 = vpop.f32.mrf.mxu1 }
 0x173   :  { %v4735_v24 = vpop.f32.mrf.mxu0 }
 0x174   :  { %5870 = vst [vmem:[#allocation52_spill] sm:$0xff] %v4730_v2  ;;  %5871 = vst [vmem:[#allocation53_spill] sm:$0xff] %v4735_v24  ;;  %v4754_v24 = vpop.f32.mrf.mxu1 }
 0x175   :  { %v795_v62 = vpop.f32.mrf.mxu0 }
 0x176   :  { %v4738_v21 = vadd.f32 %v795_v62, %v4474_v22 }
 0x177   :  { %v4742_v61 = vpop.f32.mrf.mxu0 }
 0x178   :  { %5872 = vst [vmem:[#allocation54_spill] sm:$0xff] %v4738_v21  ;;  %5873 = vst [vmem:[#allocation55_spill] sm:$0xff] %v4742_v61  ;;  %v4761_v61 = vpop.f32.mrf.mxu1 }
 0x179   :  { %v801_v37 = vpop.f32.mrf.mxu0 }
 0x17a   :  { %v4745_v58 = vadd.f32 %v801_v37, %v4483_v34 }
 0x17b   :  { %v4749_v60 = vpop.f32.mrf.mxu0 }
 0x17c   :  { %5874 = vst [vmem:[#allocation56_spill] sm:$0xff] %v4745_v58  ;;  %5875 = vst [vmem:[#allocation57_spill] sm:$0xff] %v4749_v60  ;;  %v4768_v60 = vpop.f32.mrf.mxu1 }
 0x17d   :  { %v807_v10 = vpop.f32.mrf.mxu0 }
 0x17e   :  { %v4752_v2 = vadd.f32 %v807_v10, %v4492_v7  ;;  %v1759_v10 = vld [vmem:[#allocation4 + $0xa8] sm:$0xf] }
 0x17f   :  { %v4756_v22 = vpop.f32.mrf.mxu0  ;;  %3461 = vmatprep.subr.msk.mxu1 %vm1814_vm1, %v1759_v10 }
 0x180   :  { %5876 = vst [vmem:[#allocation58_spill] sm:$0xff] %v4752_v2  ;;  %5877 = vst [vmem:[#allocation59_spill] sm:$0xff] %v4756_v22 }
 0x181   :  { %v813_v62 = vpop.f32.mrf.mxu0 }
 0x182   :  { %v4759_v21 = vadd.f32 %v813_v62, %v4501_v33  ;;  %v4776_v33 = vpop.f32.mrf.mxu1 }
 0x183   :  { %v4763_v34 = vpop.f32.mrf.mxu0  ;;  %5883 = vst [vmem:[#allocation65_spill] sm:$0xff] %v4776_v33 }
 0x184   :  { %5878 = vst [vmem:[#allocation60_spill] sm:$0xff] %v4759_v21  ;;  %5879 = vst [vmem:[#allocation61_spill] sm:$0xff] %v4763_v34 }
 0x185   :  { %v819_v37 = vpop.f32.mrf.mxu0 }
 0x186   :  { %v4766_v58 = vadd.f32 %v819_v37, %v4512_v41  ;;  %v589_v41 = vadd.f32 %v4535_v38, %v4533_v43 }
 0x187   :  { %v4770_v7 = vpop.f32.mrf.mxu0 }
 0x188   :  { %5880 = vst [vmem:[#allocation62_spill] sm:$0xff] %v4766_v58  ;;  %5881 = vst [vmem:[#allocation63_spill] sm:$0xff] %v4770_v7  ;;  %v4785_v58 = vpop.f32.mrf.mxu1 }
 0x189   :  { %v825_v2 = vpop.f32.mrf.mxu0 }
 0x18a   :  { %v4774_v22 = vadd.f32 %v825_v2, %v4521_v30  ;;  %v595_v30 = vadd.f32 %v4544_v17, %v4542_v44 }
 0x18b   :  { %v4778_v62 = vpop.f32.mrf.mxu0 }
 0x18c   :  { %5882 = vst [vmem:[#allocation64_spill] sm:$0xff] %v4774_v22  ;;  %5884 = vst [vmem:[#allocation66_spill] sm:$0xff] %v4778_v62  ;;  %v4794_v22 = vpop.f32.mrf.mxu1 }
 0x18d   :  { %v831_v21 = vpop.f32.mrf.mxu0 }
 0x18e   :  { %v4783_v37 = vadd.f32 %v831_v21, %v4530_v18  ;;  %v601_v18 = vadd.f32 %v4553_v45, %v4551_v63  ;;  %v4803_v21 = vpop.f32.mrf.mxu1 }
 0x18f   :  { %v833_v7 = vpop.f32.mrf.mxu0 }
 0x190   :  { %v4787_v34 = vadd.f32 %v833_v7, %v589_v41 }
 0x191   :  { %v837_v10 = vpop.f32.mrf.mxu0 }
 0x192   :  { %v4792_v2 = vadd.f32 %v837_v10, %v4539_v6  ;;  %v607_v6 = vadd.f32 %v4562_v27, %v4560_v46 }
 0x193   :  { %v839_v62 = vpop.f32.mrf.mxu0 }
 0x194   :  { %v4796_v33 = vadd.f32 %v839_v62, %v595_v30  ;;  %v4812_v62 = vpop.f32.mrf.mxu1 }
 0x195   :  { %v843_v43 = vpop.f32.mrf.mxu0 }
 0x196   :  { %v4801_v38 = vadd.f32 %v843_v43, %v4548_v28  ;;  %v613_v28 = vadd.f32 %v4571_v13, %v4569_v47  ;;  %v4821_v43 = vpop.f32.mrf.mxu1 }
 0x197   :  { %v845_v7 = vpop.f32.mrf.mxu0 }
 0x198   :  { %v4805_v41 = vadd.f32 %v845_v7, %v601_v18 }
 0x199   :  { %v849_v44 = vpop.f32.mrf.mxu0 }
 0x19a   :  { %v4810_v17 = vadd.f32 %v849_v44, %v4557_v12  ;;  %v619_v12 = vadd.f32 %v4580_v5, %v4578_v48  ;;  %v4830_v44 = vpop.f32.mrf.mxu1 }
 0x19b   :  { %v851_v10 = vpop.f32.mrf.mxu0 }
 0x19c   :  { %5885 = vst [vmem:[#allocation67_spill] sm:$0xff] %v4810_v17  ;;  %v4814_v30 = vadd.f32 %v851_v10, %v607_v6 }
 0x19d   :  { %v855_v63 = vpop.f32.mrf.mxu0 }
 0x19e   :  { %5886 = vst [vmem:[#allocation68_spill] sm:$0xff] %v4814_v30  ;;  %v4819_v45 = vadd.f32 %v855_v63, %v4566_v4  ;;  %v625_v4 = vadd.f32 %v4589_v23, %v4587_v49  ;;  %v4839_v63 = vpop.f32.mrf.mxu1 }
 0x19f   :  { %v857_v18 = vpop.f32.mrf.mxu0 }
 0x1a0   :  { %5887 = vst [vmem:[#allocation69_spill] sm:$0xff] %v4819_v45  ;;  %v4823_v7 = vadd.f32 %v857_v18, %v613_v28  ;;  %v5928_v45 = vld [vmem:[#allocation13_spill] sm:$0xff] }
 0x1a1   :  { %v861_v46 = vpop.f32.mrf.mxu0 }
 0x1a2   :  { %5888 = vst [vmem:[#allocation70_spill] sm:$0xff] %v4823_v7  ;;  %v4828_v27 = vadd.f32 %v861_v46, %v4575_v1  ;;  %v631_v1 = vadd.f32 %v4598_v50, %v4596_v39  ;;  %v4848_v46 = vpop.f32.mrf.mxu1  ;;  %v5927_v7 = vld [vmem:[#allocation12_spill] sm:$0xff] }
 0x1a3   :  { %v863_v6 = vpop.f32.mrf.mxu0  ;;  %v517_v30 = vadd.f32 %v5928_v45, %v5927_v7 }
 0x1a4   :  { %5889 = vst [vmem:[#allocation71_spill] sm:$0xff] %v4828_v27  ;;  %v4832_v10 = vadd.f32 %v863_v6, %v619_v12 }
 0x1a5   :  { %v867_v47 = vpop.f32.mrf.mxu0 }
 0x1a6   :  { %5890 = vst [vmem:[#allocation72_spill] sm:$0xff] %v4832_v10  ;;  %v4837_v13 = vadd.f32 %v867_v47, %v4584_v31  ;;  %v637_v31 = vadd.f32 %v4607_v26, %v4605_v51  ;;  %v4857_v47 = vpop.f32.mrf.mxu1  ;;  %v5919_v10 = vld [vmem:[#allocation48_spill] sm:$0xff] }
 0x1a7   :  { %v869_v28 = vpop.f32.mrf.mxu0 }
 0x1a8   :  { %5891 = vst [vmem:[#allocation73_spill] sm:$0xff] %v4837_v13  ;;  %v4841_v18 = vadd.f32 %v869_v28, %v625_v4 }
 0x1a9   :  { %v873_v48 = vpop.f32.mrf.mxu0 }
 0x1aa   :  { %5892 = vst [vmem:[#allocation74_spill] sm:$0xff] %v4841_v18  ;;  %v4846_v5 = vadd.f32 %v873_v48, %v4593_v40  ;;  %v5897_v40 = vld [vmem:[#allocation37_spill] sm:$0xff]  ;;  %v5898_v48 = vld [vmem:[#allocation36_spill] sm:$0xff]  ;;  %v5911_v18 = vld [vmem:[#allocation42_spill] sm:$0xff] }
 0x1ab   :  { %v875_v12 = vpop.f32.mrf.mxu0  ;;  %v643_v50 = vadd.f32 %v5897_v40, %v4614_v52 }
 0x1ac   :  { %5893 = vst [vmem:[#allocation75_spill] sm:$0xff] %v4846_v5  ;;  %v4850_v6 = vadd.f32 %v875_v12, %v631_v1  ;;  %v4866_v1 = vpop.f32.mrf.mxu1 }
 0x1ad   :  { %v879_v49 = vpop.f32.mrf.mxu0 }
 0x1ae   :  { %5894 = vst [vmem:[#allocation76_spill] sm:$0xff] %v4850_v6  ;;  %v4855_v23 = vadd.f32 %v879_v49, %v4602_v20  ;;  %v5901_v20 = vld [vmem:[#allocation39_spill] sm:$0xff]  ;;  %v5902_v49 = vld [vmem:[#allocation38_spill] sm:$0xff] }
 0x1af   :  { %v881_v4 = vpop.f32.mrf.mxu0  ;;  %v649_v26 = vadd.f32 %v5901_v20, %v4623_v11  ;;  %v5909_v20 = vld [vmem:[#allocation43_spill] sm:$0xff] }
 0x1b0   :  { %5895 = vst [vmem:[#allocation77_spill] sm:$0xff] %v4855_v23  ;;  %v4859_v28 = vadd.f32 %v881_v4, %v637_v31  ;;  %v4875_v31 = vpop.f32.mrf.mxu1 }
 0x1b1   :  { %v885_v39 = vpop.f32.mrf.mxu0 }
 0x1b2   :  { %5896 = vst [vmem:[#allocation78_spill] sm:$0xff] %v4859_v28  ;;  %v4864_v5 = vadd.f32 %v885_v39, %v5898_v48  ;;  %v5905_v39 = vld [vmem:[#allocation41_spill] sm:$0xff]  ;;  %v5906_v48 = vld [vmem:[#allocation40_spill] sm:$0xff] }
 0x1b3   :  { %v887_v12 = vpop.f32.mrf.mxu0  ;;  %v655_v40 = vadd.f32 %v5905_v39, %v4632_v54  ;;  %v5915_v39 = vld [vmem:[#allocation9_spill] sm:$0xff] }
 0x1b4   :  { %5899 = vst [vmem:[#allocation37_spill] sm:$0xff] %v4864_v5  ;;  %v4868_v6 = vadd.f32 %v887_v12, %v643_v50  ;;  %v1574_v50 = vlaneseq  ;;  %v4884_v12 = vpop.f32.mrf.mxu1 }
 0x1b5   :  { %v891_v51 = vpop.f32.mrf.mxu0 }
 0x1b6   :  { %5900 = vst [vmem:[#allocation36_spill] sm:$0xff] %v4868_v6  ;;  %v4873_v23 = vadd.f32 %v891_v51, %v5902_v49  ;;  %v5910_v49 = vld [vmem:[#allocation44_spill] sm:$0xff] }
 0x1b7   :  { %v893_v4 = vpop.f32.mrf.mxu0 }
 0x1b8   :  { %5903 = vst [vmem:[#allocation39_spill] sm:$0xff] %v4873_v23  ;;  %v4877_v28 = vadd.f32 %v893_v4, %v649_v26  ;;  %v661_v23 = vadd.f32 %v5910_v49, %v5909_v20  ;;  %v4893_v4 = vshrl.u32 %v1574_v50, 7  ;;  %v5920_v20 = vld [vmem:[#allocation45_spill] sm:$0xff] }
 0x1b9   :  { %v897_v52 = vpop.f32.mrf.mxu0 }
 0x1ba   :  { %5904 = vst [vmem:[#allocation38_spill] sm:$0xff] %v4877_v28  ;;  %v4882_v5 = vadd.f32 %v897_v52, %v5906_v48  ;;  %5913 = vst [vmem:[#allocation44_spill] sm:$0xff] %v4893_v4  ;;  %v4895_v28 = vpop.f32.mrf.mxu1  ;;  %v5914_v52 = vld [vmem:[#allocation8_spill] sm:$0xff] }
 0x1bb   :  { %v899_v6 = vpop.f32.mrf.mxu0  ;;  %v505_v48 = vadd.f32 %v5915_v39, %v5914_v52  ;;  %v1572_v52 = vld [vmem:[%s5809_s2] sm:$0x3] }
 0x1bc   :  { %5907 = vst [vmem:[#allocation41_spill] sm:$0xff] %v4882_v5  ;;  %v4886_v11 = vadd.f32 %v899_v6, %v655_v40  ;;  %v5917_v6 = vld [vmem:[#allocation46_spill] sm:$0xff]  ;;  %v5918_v40 = vld [vmem:[#allocation47_spill] sm:$0xff]  ;;  %v4908_v50 = vpop.f32.mrf.mxu1 }
 0x1bd   :  { %v903_v51 = vpop.f32.mrf.mxu0  ;;  %v915_v27 = vadd.f32 %v5919_v10, %v505_v48  ;;  %v5924_v48 = vld [vmem:[#allocation49_spill] sm:$0xff] }
 0x1be   :  { %5908 = vst [vmem:[#allocation40_spill] sm:$0xff] %v4886_v11  ;;  %v4891_v26 = vadd.f32 %v903_v51, %v5911_v18  ;;  %v667_v11 = vadd.f32 %v5918_v40, %v5917_v6  ;;  %v5822_v6 = vsub.s32 1, %v4893_v4  ;;  %v4927_v17 = vpop.f32.mrf.mxu1 }
 0x1bf   :  { %v905_v54 = vpop.f32.mrf.mxu0 }
 0x1c0   :  { %5912 = vst [vmem:[#allocation43_spill] sm:$0xff] %v4891_v26  ;;  %v4899_v5 = vadd.f32 %v905_v54, %v661_v23  ;;  %v5922_v23 = vld [vmem:[#allocation10_spill] sm:$0xff]  ;;  %v5923_v54 = vld [vmem:[#allocation11_spill] sm:$0xff]  ;;  %v4939_v7 = vpop.f32.mrf.mxu1 }
 0x1c1   :  { %v909_v13 = vpop.f32.mrf.mxu0  ;;  %v511_v39 = vadd.f32 %v5923_v54, %v5922_v23  ;;  %v4931_v23 = vrot.slane %v1572_v52, %v5822_v6  ;;  %v5932_v6 = vld [vmem:[#allocation17_spill] sm:$0xff] }
 0x1c2   :  { %5916 = vst [vmem:[#allocation42_spill] sm:$0xff] %v4899_v5  ;;  %v4905_v49 = vadd.f32 %v909_v13, %v5920_v20  ;;  %v1216_v13 = vadd.f32 %v5924_v48, %v915_v27  ;;  %v5925_v20 = vld [vmem:[#allocation50_spill] sm:$0xff]  ;;  %v919_v27 = vadd.f32 %v4682_v0, %v517_v30  ;;  %v5930_v48 = vld [vmem:[#allocation15_spill] sm:$0xff] }
 0x1c3   :  { %v911_v51 = vpop.f32.mrf.mxu0  ;;  %v917_v40 = vadd.f32 %v4670_v35, %v511_v39 }
 0x1c4   :  { %5921 = vst [vmem:[#allocation8_spill] sm:$0xff] %v4905_v49  ;;  %v4915_v5 = vadd.f32 %v911_v51, %v667_v11  ;;  %v5926_v49 = vsub.s32 0, %v4893_v4 }
 0x1c5   :  { %v1349_v10 = vpop.f32.mrf.mxu0  ;;  %v1218_v54 = vadd.f32 %v4680_v32, %v917_v40  ;;  %v1220_v32 = vadd.f32 %v4700_v14, %v919_v27 }
 0x1c6   :  { %v1516_v18 = vadd.f32 %v1349_v10, %v5925_v20  ;;  %v4923_v26 = vrot.slane %v1572_v52, %v5926_v49  ;;  %v5929_v10 = vld [vmem:[#allocation14_spill] sm:$0xff] }
 0x1c7   :  { %v1351_v11 = vpop.f32.mrf.mxu0  ;;  %v523_v45 = vadd.f32 %v5930_v48, %v5929_v10  ;;  %v5931_v48 = vld [vmem:[#allocation16_spill] sm:$0xff] }
 0x1c8   :  { %v1517_v51 = vadd.f32 %v1351_v11, %v1216_v13  ;;  %v1584_v39 = vadd.f32 %v4923_v26, %v1516_v18  ;;  %v1219_v13 = vadd.f32 %v4690_v42, %v4677_v25  ;;  %v529_v4 = vadd.f32 %v5932_v6, %v5931_v48  ;;  %v4952_v42 = vpop.f32.mrf.mxu1 }
 0x1c9   :  { %v1355_v35 = vpop.f32.mrf.mxu0  ;;  %v921_v18 = vadd.f32 %v4692_v16, %v523_v45  ;;  %v1221_v25 = vadd.f32 %v4710_v57, %v4687_v19  ;;  %v5934_v19 = vld [vmem:[#allocation19_spill] sm:$0xff] }
 0x1ca   :  { %v1518_v49 = vadd.f32 %v1355_v35, %v4672_v15  ;;  %v1585_v52 = vadd.f32 %v4931_v23, %v1517_v51  ;;  %v1640_v15 = vmax.f32 %v1584_v39, 0.0  ;;  %v923_v27 = vadd.f32 %v4702_v9, %v529_v4 }
 0x1cb   :  { %v1357_v20 = vpop.f32.mrf.mxu0  ;;  %v1222_v45 = vadd.f32 %v4723_v53, %v921_v18 }
 0x1cc   :  { %v1586_v0 = vadd.f32 %v4923_v26, %v1518_v49  ;;  %v1519_v30 = vadd.f32 %v1357_v20, %v1218_v54  ;;  %v1641_v54 = vmax.f32 %v1585_v52, 0.0  ;;  %v1224_v18 = vadd.f32 %v4740_v56, %v923_v27 }
 0x1cd   :  { %v1361_v40 = vpop.f32.mrf.mxu0 }
 0x1ce   :  { %v1642_v11 = vmax.f32 %v1586_v0, 0.0  ;;  %v1587_v35 = vadd.f32 %v4931_v23, %v1519_v30  ;;  %v1520_v10 = vadd.f32 %v1361_v40, %v1219_v13  ;;  %v5933_v0 = vld [vmem:[#allocation18_spill] sm:$0xff]  ;;  %v5935_v30 = vld [vmem:[#allocation51_spill] sm:$0xff]  ;;  %v4965_v40 = vpop.f32.mrf.mxu1 }
 0x1cf   :  { %v1363_v51 = vpop.f32.mrf.mxu0  ;;  %v535_v57 = vadd.f32 %v5934_v19, %v5933_v0  ;;  %v1223_v52 = vadd.f32 %v4733_v3, %v5935_v30 }
 0x1d0   :  { %v4954_v49 = vmax.f32 %v1640_v15, %v1642_v11  ;;  %v1643_v14 = vmax.f32 %v1587_v35, 0.0  ;;  %v1521_v16 = vadd.f32 %v1363_v51, %v1220_v32  ;;  %v1588_v6 = vadd.f32 %v4923_v26, %v1520_v10  ;;  %v5936_v51 = vld [vmem:[#allocation20_spill] sm:$0xff] }
 0x1d1   :  { %v1367_v39 = vpop.f32.mrf.mxu0  ;;  %v925_v11 = vadd.f32 %v4712_v59, %v535_v57 }
 0x1d2   :  { %v4958_v20 = vmax.f32 %v1641_v54, %v1643_v14  ;;  %v1522_v13 = vadd.f32 %v1367_v39, %v1221_v25  ;;  %v1589_v4 = vadd.f32 %v4931_v23, %v1521_v16  ;;  %v1644_v10 = vmax.f32 %v1588_v6, 0.0  ;;  %v5937_v54 = vld [vmem:[#allocation21_spill] sm:$0xff]  ;;  %v4978_v16 = vpop.f32.mrf.mxu1 }
 0x1d3   :  { %v1369_v15 = vpop.f32.mrf.mxu0  ;;  %v541_v14 = vadd.f32 %v5937_v54, %v5936_v51  ;;  %v1225_v39 = vadd.f32 %v4747_v8, %v4707_v29  ;;  %v1226_v19 = vadd.f32 %v4754_v24, %v925_v11  ;;  %v1227_v29 = vadd.f32 %v4761_v61, %v4717_v36  ;;  %v1757_v51 = vld [vmem:[#allocation4 + $0x98] sm:$0xff] }
 0x1d4   :  { %v1724_v9 = vmax.f32 %v4954_v49, %v4958_v20  ;;  %v1590_v53 = vadd.f32 %v4923_v26, %v1522_v13  ;;  %v1523_v32 = vadd.f32 %v1369_v15, %v1222_v45  ;;  %v1645_v45 = vmax.f32 %v1589_v4, 0.0  ;;  %v5938_v15 = vld [vmem:[#allocation22_spill] sm:$0xff]  ;;  %v4987_v8 = vpop.f32.mrf.mxu1  ;;  %v2098_v49 = vld [vmem:[#allocation4 + $0x1e8] sm:$0xff] }
 0x1d5   :  { %v1373_v35 = vpop.f32.mrf.mxu0  ;;  %v927_v59 = vadd.f32 %v4725_v55, %v541_v14  ;;  %v5987_v20 = vld [vmem:[#allocation42_spill] sm:$0xff] }
 0x1d6   :  { %v1646_v48 = vmax.f32 %v1590_v53, 0.0  ;;  %v1591_v3 = vadd.f32 %v4931_v23, %v1523_v32  ;;  %v1524_v25 = vadd.f32 %v1373_v35, %v1223_v52  ;;  %v5939_v53 = vld [vmem:[#allocation23_spill] sm:$0xff]  ;;  %v1758_v35 = vld [vmem:[#allocation4 + $0xa0] sm:$0xf] }
 0x1d7   :  { %v1375_v13 = vpop.f32.mrf.mxu0  ;;  %v547_v32 = vadd.f32 %v5939_v53, %v5938_v15 }
 0x1d8   :  { %v1698_v0 = vmax.f32 %v1644_v10, %v1646_v48  ;;  %v1647_v56 = vmax.f32 %v1591_v3, 0.0  ;;  %v1525_v27 = vadd.f32 %v1375_v13, %v1224_v18  ;;  %v1592_v30 = vadd.f32 %v4923_v26, %v1524_v25  ;;  %v5940_v48 = vld [vmem:[#allocation53_spill] sm:$0xff]  ;;  %v5941_v13 = vld [vmem:[#allocation24_spill] sm:$0xff] }
 0x1d9   :  { %v1379_v6 = vpop.f32.mrf.mxu0  ;;  %v1228_v10 = vadd.f32 %v4768_v60, %v927_v59  ;;  %v929_v3 = vadd.f32 %v5940_v48, %v547_v32  ;;  %v5002_v60 = vpop.f32.mrf.mxu1  ;;  %v1754_v32 = vld [vmem:[#allocation4 + $0x80] sm:$0xff] }
 0x1da   :  { %v1699_v57 = vmax.f32 %v1645_v45, %v1647_v56  ;;  %v1526_v52 = vadd.f32 %v1379_v6, %v1225_v39  ;;  %v1593_v55 = vadd.f32 %v4931_v23, %v1525_v27  ;;  %v1648_v54 = vmax.f32 %v1592_v30, 0.0  ;;  %v1756_v39 = vld [vmem:[#allocation4 + $0x90] sm:$0xff]  ;;  %v5942_v45 = vld [vmem:[#allocation25_spill] sm:$0xff] }
 0x1db   :  { %v1381_v4 = vpop.f32.mrf.mxu0  ;;  %v5943_v56 = vld [vmem:[#allocation52_spill] sm:$0xff]  ;;  %v5944_v27 = vld [vmem:[#allocation65_spill] sm:$0xff]  ;;  %v1230_v48 = vadd.f32 %v4785_v58, %v929_v3 }
 0x1dc   :  { %v4989_v18 = vmax.f32 %v1698_v0, %v1699_v57  ;;  %v1594_v24 = vadd.f32 %v4923_v26, %v1526_v52  ;;  %v1527_v11 = vadd.f32 %v1381_v4, %v1226_v19  ;;  %v553_v0 = vadd.f32 %v5942_v45, %v5941_v13  ;;  %v1755_v57 = vld [vmem:[#allocation4 + $0x88] sm:$0xff] }
 0x1dd   :  { %v1385_v25 = vpop.f32.mrf.mxu0  ;;  %v1229_v6 = vadd.f32 %v5944_v27, %v5943_v56  ;;  %v5945_v19 = vmov 0.0   ;;  %v1649_v30 = vmax.f32 %v1593_v55, 0.0  ;;  %v5947_v56 = vld [vmem:[#allocation26_spill] sm:$0xff]  ;;  %v5948_v55 = vld [vmem:[#allocation27_spill] sm:$0xff] }
 0x1de   :  { %v1650_v36 = vmax.f32 %v1594_v24, 0.0  ;;  %v1595_v61 = vadd.f32 %v4931_v23, %v1527_v11  ;;  %v1528_v14 = vadd.f32 %v1385_v25, %v1227_v29  ;;  %3451 = vmatmul.mubr.msk.f32.vlgmr.msra.gmra.mxu1 %vm1783_vm2, %v4989_v18  ;;  %v5946_v29 = vld [vmem:[#allocation55_spill] sm:$0xff]  ;;  %v1753_v11 = vld [vmem:[#allocation4 + $0x78] sm:$0xff]  ;;  %v1750_v27 = vld [vmem:[#allocation4 + $0x60] sm:$0xff] }
 0x1df   :  { %v1387_v59 = vpop.f32.mrf.mxu0  ;;  %1891 = vmatprep.mubr.f32.mxu1 %v5945_v19  ;;  %3462 = vmatpush1.msk.msra.mxu1 %vm1814_vm1, %v1758_v35  ;;  %v931_v4 = vadd.f32 %v5946_v29, %v553_v0  ;;  %v1752_v35 = vld [vmem:[#allocation4 + $0x70] sm:$0xff] }
 0x1e0   :  { %v1700_v52 = vmax.f32 %v1648_v54, %v1650_v36  ;;  %v1651_v15 = vmax.f32 %v1595_v61, 0.0  ;;  %v1529_v53 = vadd.f32 %v1387_v59, %v1228_v10  ;;  %1967 = vmatprep.subr.mxu1 %v1757_v51  ;;  %v1596_v13 = vadd.f32 %v4923_v26, %v1528_v14  ;;  %v5949_v36 = vld [vmem:[#allocation54_spill] sm:$0xff]  ;;  %v5013_v51 = vpop.f32.mrf.mxu1  ;;  %v5950_v59 = vld [vmem:[#allocation57_spill] sm:$0xff] }
 0x1e1   :  { %v1391_v24 = vpop.f32.mrf.mxu0  ;;  %1968 = vmatpush1.msra.mxu1 %v1756_v39  ;;  %v559_v54 = vadd.f32 %v5948_v55, %v5947_v56  ;;  %v1231_v10 = vadd.f32 %v4794_v22, %v5949_v36  ;;  %v1751_v39 = vld [vmem:[#allocation4 + $0x68] sm:$0xff]  ;;  %v1749_v22 = vld [vmem:[#allocation4 + $0x58] sm:$0xff]  ;;  %v1746_v36 = vld [vmem:[#allocation4 + $0x40] sm:$0xff] }
 0x1e2   :  { %v1701_v25 = vmax.f32 %v1649_v30, %v1651_v15  ;;  %v1530_v45 = vadd.f32 %v1391_v24, %v1229_v6  ;;  %1969 = vmatprep.subr.mxu1 %v1755_v57  ;;  %v1597_v58 = vadd.f32 %v4931_v23, %v1529_v53  ;;  %v1232_v6 = vadd.f32 %v4803_v21, %v931_v4  ;;  %v1748_v53 = vld [vmem:[#allocation4 + $0x50] sm:$0xff]  ;;  %v5028_v4 = vpop.f32.mrf.mxu1 }
 0x1e3   :  { %v1393_v61 = vpop.f32.mrf.mxu0  ;;  %1970 = vmatpush1.msra.mxu1 %v1754_v32  ;;  %v933_v57 = vadd.f32 %v5950_v59, %v559_v54  ;;  %v1652_v15 = vmax.f32 %v1596_v13, 0.0  ;;  %v5951_v24 = vld [vmem:[#allocation28_spill] sm:$0xff]  ;;  %v1747_v13 = vld [vmem:[#allocation4 + $0x48] sm:$0xff] }
 0x1e4   :  { %v5015_v0 = vmax.f32 %v1700_v52, %v1701_v25  ;;  %v1598_v3 = vadd.f32 %v4923_v26, %v1530_v45  ;;  %v1531_v14 = vadd.f32 %v1393_v61, %v1230_v48  ;;  %1971 = vmatprep.subr.mxu1 %v1753_v11  ;;  %v5952_v11 = vld [vmem:[#allocation29_spill] sm:$0xff]  ;;  %v5953_v25 = vld [vmem:[#allocation56_spill] sm:$0xff] }
 0x1e5   :  { %v1397_v30 = vpop.f32.mrf.mxu0  ;;  %1972 = vmatpush1.msra.mxu1 %v1752_v35  ;;  %v565_v48 = vadd.f32 %v5952_v11, %v5951_v24  ;;  %v1233_v21 = vadd.f32 %v4812_v62, %v5953_v25  ;;  %v1653_v35 = vmax.f32 %v1597_v58, 0.0  ;;  %v1234_v62 = vadd.f32 %v4821_v43, %v933_v57  ;;  %v5955_v24 = vld [vmem:[#allocation30_spill] sm:$0xff]  ;;  %v5956_v58 = vld [vmem:[#allocation31_spill] sm:$0xff] }
 0x1e6   :  { %v1654_v29 = vmax.f32 %v1598_v3, 0.0  ;;  %v1599_v32 = vadd.f32 %v4931_v23, %v1531_v14  ;;  %v1532_v52 = vadd.f32 %v1397_v30, %v1231_v10  ;;  %3452 = vmatmul.mubr.msk.f32.gmra.mxu1 %vm1783_vm2, %v5015_v0  ;;  %1973 = vmatprep.subr.mxu1 %v1751_v39  ;;  %v5954_v10 = vld [vmem:[#allocation59_spill] sm:$0xff]  ;;  %v1745_v3 = vld [vmem:[#allocation4 + $0x38] sm:$0xff] }
 0x1e7   :  { %v1399_v45 = vpop.f32.mrf.mxu0  ;;  %1897 = vmatprep.mubr.f32.mxu1 %v5945_v19  ;;  %1974 = vmatpush1.msra.mxu1 %v1750_v27  ;;  %v935_v61 = vadd.f32 %v5954_v10, %v565_v48  ;;  %v1744_v27 = vld [vmem:[#allocation4 + $0x30] sm:$0xff]  ;;  %v5958_v48 = vld [vmem:[#allocation61_spill] sm:$0xff] }
 0x1e8   :  { %v1702_v56 = vmax.f32 %v1652_v15, %v1654_v29  ;;  %v1655_v55 = vmax.f32 %v1599_v32, 0.0  ;;  %v1533_v54 = vadd.f32 %v1399_v45, %v1232_v6  ;;  %1975 = vmatprep.subr.mxu1 %v1749_v22  ;;  %v1600_v59 = vadd.f32 %v4923_v26, %v1532_v52  ;;  %v5957_v29 = vld [vmem:[#allocation58_spill] sm:$0xff]  ;;  %v5038_v22 = vpop.f32.mrf.mxu1  ;;  %v1743_v45 = vld [vmem:[#allocation4 + $0x28] sm:$0xff]  ;;  %v5961_v10 = vld [vmem:[#allocation60_spill] sm:$0xff] }
 0x1e9   :  { %v1403_v39 = vpop.f32.mrf.mxu0  ;;  %1976 = vmatpush1.msra.mxu1 %v1748_v53  ;;  %v571_v15 = vadd.f32 %v5956_v58, %v5955_v24  ;;  %v1235_v6 = vadd.f32 %v4830_v44, %v5957_v29  ;;  %v1236_v11 = vadd.f32 %v4839_v63, %v935_v61  ;;  %v1237_v61 = vadd.f32 %v4848_v46, %v5961_v10  ;;  %v1740_v24 = vld [vmem:[#allocation4 + $0x10] sm:$0xff]  ;;  %v5962_v58 = vld [vmem:[#allocation63_spill] sm:$0xff] }
 0x1ea   :  { %v1703_v14 = vmax.f32 %v1653_v35, %v1655_v55  ;;  %v1534_v30 = vadd.f32 %v1403_v39, %v1233_v21  ;;  %1977 = vmatprep.subr.mxu1 %v1747_v13  ;;  %v1601_v43 = vadd.f32 %v4931_v23, %v1533_v54  ;;  %v1656_v44 = vmax.f32 %v1600_v59, 0.0  ;;  %v5959_v54 = vld [vmem:[#allocation32_spill] sm:$0xff]  ;;  %v5055_v39 = vpop.f32.mrf.mxu1 }
 0x1eb   :  { %v1405_v32 = vpop.f32.mrf.mxu0  ;;  %1978 = vmatpush1.msra.mxu1 %v1746_v36  ;;  %v937_v25 = vadd.f32 %v5958_v48, %v571_v15  ;;  %v5960_v36 = vld [vmem:[#allocation33_spill] sm:$0xff]  ;;  %v1738_v48 = vld [vmem:[#allocation4] sm:$0xff] }
 0x1ec   :  { %v5040_v53 = vmax.f32 %v1702_v56, %v1703_v14  ;;  %v1602_v57 = vadd.f32 %v4923_v26, %v1534_v30  ;;  %v1535_v52 = vadd.f32 %v1405_v32, %v1234_v62  ;;  %1979 = vmatprep.subr.mxu1 %v1745_v3  ;;  %v1742_v56 = vld [vmem:[#allocation4 + $0x20] sm:$0xff]  ;;  %v577_v63 = vadd.f32 %v5960_v36, %v5959_v54  ;;  %v1741_v62 = vld [vmem:[#allocation4 + $0x18] sm:$0xff] }
 0x1ed   :  { %v1409_v21 = vpop.f32.mrf.mxu0  ;;  %1980 = vmatpush1.msra.mxu1 %v1744_v27  ;;  %v1657_v14 = vmax.f32 %v1601_v43, 0.0  ;;  %v1238_v46 = vadd.f32 %v4857_v47, %v937_v25  ;;  %v5964_v43 = vld [vmem:[#allocation35_spill] sm:$0xff]  ;;  %v5966_v36 = vld [vmem:[#allocation66_spill] sm:$0xff] }
 0x1ee   :  { %v1658_v13 = vmax.f32 %v1602_v57, 0.0  ;;  %v1603_v35 = vadd.f32 %v4931_v23, %v1535_v52  ;;  %v1536_v55 = vadd.f32 %v1409_v21, %v1235_v6  ;;  %3453 = vmatmul.mubr.msk.f32.gmra.mxu1 %vm1783_vm2, %v5040_v53  ;;  %3487 = vmatmul.mubr.msk.f32.vlgmr.msra.gmra.mxu0 %vm1783_vm2, %v5040_v53  ;;  %v939_v15 = vadd.f32 %v5962_v58, %v577_v63  ;;  %v1739_v6 = vld [vmem:[#allocation4 + $0x8] sm:$0xff]  ;;  %v5963_v21 = vld [vmem:[#allocation34_spill] sm:$0xff] }
 0x1ef   :  { %v1411_v3 = vpop.f32.mrf.mxu0  ;;  %1903 = vmatprep.mubr.f32.mxu1 %v5945_v19  ;;  %2359 = vmatprep.mubr.f32.mxu0 %v5945_v19 }
 0x1f0   :  { %v1704_v59 = vmax.f32 %v1656_v44, %v1658_v13  ;;  %v1659_v30 = vmax.f32 %v1603_v35, 0.0  ;;  %v1537_v27 = vadd.f32 %v1411_v3, %v1236_v11  ;;  %1981 = vmatprep.subr.mxu1 %v1743_v45  ;;  %v1604_v57 = vadd.f32 %v4923_v26, %v1536_v55  ;;  %v5965_v13 = vld [vmem:[#allocation62_spill] sm:$0xff]  ;;  %v5066_v45 = vpop.f32.mrf.mxu1 }
 0x1f1   :  { %v1415_v29 = vpop.f32.mrf.mxu0  ;;  %1982 = vmatpush1.msra.mxu1 %v1742_v56  ;;  %v583_v44 = vadd.f32 %v5964_v43, %v5963_v21  ;;  %v1239_v11 = vadd.f32 %v4866_v1, %v5965_v13  ;;  %v1240_v54 = vadd.f32 %v4875_v31, %v939_v15 }
 0x1f2   :  { %v1705_v32 = vmax.f32 %v1657_v14, %v1659_v30  ;;  %v1538_v52 = vadd.f32 %v1415_v29, %v1237_v61  ;;  %1983 = vmatprep.subr.mxu1 %v1741_v62  ;;  %v1605_v47 = vadd.f32 %v4931_v23, %v1537_v27  ;;  %v2102_v61 = vld [vmem:[#allocation4 + $0x208] sm:$0xf]  ;;  %v1660_v1 = vmax.f32 %v1604_v57, 0.0  ;;  %v5081_v31 = vpop.f32.mrf.mxu1 }
 0x1f3   :  { %v1417_v35 = vpop.f32.mrf.mxu0  ;;  %1984 = vmatpush1.msra.mxu1 %v1740_v24  ;;  %v941_v63 = vadd.f32 %v5966_v36, %v583_v44 }
 0x1f4   :  { %v5068_v56 = vmax.f32 %v1704_v59, %v1705_v32  ;;  %v1606_v25 = vadd.f32 %v4923_v26, %v1538_v52  ;;  %v1539_v55 = vadd.f32 %v1417_v35, %v1238_v46  ;;  %1985 = vmatprep.subr.mxu1 %v1739_v6  ;;  %v5967_v59 = vld [vmem:[#allocation64_spill] sm:$0xff]  ;;  %v1661_v24 = vmax.f32 %v1605_v47, 0.0 }
 0x1f5   :  { %v1421_v10 = vpop.f32.mrf.mxu0  ;;  %1986 = vmatpush1.msra.mxu1 %v1738_v48  ;;  %v1241_v30 = vadd.f32 %v4884_v12, %v5967_v59  ;;  %v1242_v46 = vadd.f32 %v4895_v28, %v941_v63  ;;  %v1243_v52 = vadd.f32 %v4908_v50, %v4783_v37  ;;  %v5090_v48 = vpop.f32.mrf.mxu1  ;;  %v1244_v28 = vadd.f32 %v4927_v17, %v4787_v34 }
 0x1f6   :  { %v1662_v3 = vmax.f32 %v1606_v25, 0.0  ;;  %v1607_v62 = vadd.f32 %v4931_v23, %v1539_v55  ;;  %v1540_v14 = vadd.f32 %v1421_v10, %v1239_v11  ;;  %3454 = vmatmul.mubr.msk.f32.gmra.mxu1 %vm1783_vm2, %v5068_v56  ;;  %3488 = vmatmul.mubr.msk.f32.gmra.mxu0 %vm1783_vm2, %v5068_v56  ;;  %v1245_v37 = vadd.f32 %v4939_v7, %v4792_v2 }
 0x1f7   :  { %v1423_v27 = vpop.f32.mrf.mxu0  ;;  %1909 = vmatprep.mubr.f32.mxu1 %v5945_v19  ;;  %2365 = vmatprep.mubr.f32.mxu0 %v5945_v19  ;;  %v5105_v50 = vpop.f32.mrf.mxu1  ;;  %v1247_v2 = vadd.f32 %v4965_v40, %v4801_v38  ;;  %v5968_v38 = vld [vmem:[#allocation67_spill] sm:$0xff] }
 0x1f8   :  { %v1706_v58 = vmax.f32 %v1660_v1, %v1662_v3  ;;  %v1663_v15 = vmax.f32 %v1607_v62, 0.0  ;;  %v1541_v29 = vadd.f32 %v1423_v27, %v1240_v54  ;;  %3473 = vmatprep.subr.msk.mxu1 %vm1814_vm1, %v2102_v61  ;;  %v1608_v57 = vadd.f32 %v4923_v26, %v1540_v14 }
 0x1f9   :  { %v1427_v6 = vpop.f32.mrf.mxu0  ;;  %v1246_v1 = vadd.f32 %v4952_v42, %v4796_v33  ;;  %v5114_v7 = vpop.f32.mrf.mxu1  ;;  %v1248_v33 = vadd.f32 %v4978_v16, %v4805_v41  ;;  %v1249_v40 = vadd.f32 %v4987_v8, %v5968_v38  ;;  %v5970_v8 = vld [vmem:[#allocation69_spill] sm:$0xff] }
 0x1fa   :  { %v1707_v32 = vmax.f32 %v1661_v24, %v1663_v15  ;;  %v1542_v12 = vadd.f32 %v1427_v6, %v1241_v30  ;;  %v1609_v44 = vadd.f32 %v4931_v23, %v1541_v29  ;;  %v1664_v47 = vmax.f32 %v1608_v57, 0.0 }
 0x1fb   :  { %v1429_v21 = vpop.f32.mrf.mxu0 }
 0x1fc   :  { %v5092_v43 = vmax.f32 %v1706_v58, %v1707_v32  ;;  %v1610_v13 = vadd.f32 %v4923_v26, %v1542_v12  ;;  %v1543_v11 = vadd.f32 %v1429_v21, %v1242_v46  ;;  %v1665_v34 = vmax.f32 %v1609_v44, 0.0  ;;  %v5129_v32 = vpop.f32.mrf.mxu1  ;;  %v5969_v44 = vld [vmem:[#allocation68_spill] sm:$0xff] }
 0x1fd   :  { %v1433_v35 = vpop.f32.mrf.mxu0 }
 0x1fe   :  { %v1666_v25 = vmax.f32 %v1610_v13, 0.0  ;;  %v1611_v55 = vadd.f32 %v4931_v23, %v1543_v11  ;;  %v1544_v54 = vadd.f32 %v1433_v35, %v1243_v52  ;;  %3455 = vmatmul.mubr.msk.f32.gmra.mxu1 %vm1783_vm2, %v5092_v43  ;;  %3489 = vmatmul.mubr.msk.f32.gmra.mxu0 %vm1783_vm2, %v5092_v43  ;;  %v1250_v13 = vadd.f32 %v5002_v60, %v5969_v44 }
 0x1ff   :  { %v1435_v36 = vpop.f32.mrf.mxu0  ;;  %1915 = vmatprep.mubr.f32.mxu1 %v5945_v19  ;;  %2371 = vmatprep.mubr.f32.mxu0 %v5945_v19 }
 0x200   :  { %v1708_v17 = vmax.f32 %v1664_v47, %v1666_v25  ;;  %v1667_v63 = vmax.f32 %v1611_v55, 0.0  ;;  %v1545_v10 = vadd.f32 %v1435_v36, %v1244_v28  ;;  %v1612_v62 = vadd.f32 %v4923_v26, %v1544_v54  ;;  %v5138_v25 = vpop.f32.mrf.mxu1 }
 0x201   :  { %v1439_v61 = vpop.f32.mrf.mxu0  ;;  %v1251_v47 = vadd.f32 %v5013_v51, %v5970_v8  ;;  %v5972_v51 = vld [vmem:[#allocation71_spill] sm:$0xff] }
 0x202   :  { %v1709_v3 = vmax.f32 %v1665_v34, %v1667_v63  ;;  %v1546_v14 = vadd.f32 %v1439_v61, %v1245_v37  ;;  %v1613_v27 = vadd.f32 %v4931_v23, %v1545_v10  ;;  %v1668_v15 = vmax.f32 %v1612_v62, 0.0 }
 0x203   :  { %v1441_v59 = vpop.f32.mrf.mxu0  ;;  %v1253_v62 = vadd.f32 %v5038_v22, %v5972_v51  ;;  %v5974_v22 = vld [vmem:[#allocation73_spill] sm:$0xff] }
 0x204   :  { %v5116_v30 = vmax.f32 %v1708_v17, %v1709_v3  ;;  %v1614_v24 = vadd.f32 %v4923_v26, %v1546_v14  ;;  %v1547_v58 = vadd.f32 %v1441_v59, %v1246_v1  ;;  %v1669_v41 = vmax.f32 %v1613_v27, 0.0  ;;  %v5971_v17 = vld [vmem:[#allocation70_spill] sm:$0xff]  ;;  %v5153_v14 = vpop.f32.mrf.mxu1 }
 0x205   :  { %v1445_v42 = vpop.f32.mrf.mxu0  ;;  %v1252_v60 = vadd.f32 %v5028_v4, %v5971_v17  ;;  %v5977_v17 = vld [vmem:[#allocation76_spill] sm:$0xff] }
 0x206   :  { %v1670_v29 = vmax.f32 %v1614_v24, 0.0  ;;  %v1615_v6 = vadd.f32 %v4931_v23, %v1547_v58  ;;  %v1548_v46 = vadd.f32 %v1445_v42, %v1247_v2  ;;  %3456 = vmatmul.mubr.msk.f32.gmra.mxu1 %vm1783_vm2, %v5116_v30  ;;  %3490 = vmatmul.mubr.msk.f32.gmra.mxu0 %vm1783_vm2, %v5116_v30  ;;  %v1192_v38 = vpop.f32.mrf.mxu1 }
 0x207   :  { %v1447_v57 = vpop.f32.mrf.mxu0  ;;  %1921 = vmatprep.mubr.f32.mxu1 %v5945_v19  ;;  %2377 = vmatprep.mubr.f32.mxu0 %v5945_v19 }
 0x208   :  { %v1710_v16 = vmax.f32 %v1668_v15, %v1670_v29  ;;  %v1671_v12 = vmax.f32 %v1615_v6, 0.0  ;;  %v1549_v52 = vadd.f32 %v1447_v57, %v1248_v33  ;;  %v1616_v28 = vadd.f32 %v4923_v26, %v1548_v46  ;;  %v5973_v33 = vld [vmem:[#allocation72_spill] sm:$0xff]  ;;  %v1194_v8 = vpop.f32.mrf.mxu1 }
 0x209   :  { %v1451_v21 = vpop.f32.mrf.mxu0  ;;  %v1254_v42 = vadd.f32 %v5055_v39, %v5973_v33  ;;  %v1255_v46 = vadd.f32 %v5066_v45, %v5974_v22  ;;  %v5976_v45 = vld [vmem:[#allocation75_spill] sm:$0xff] }
 0x20a   :  { %v1711_v11 = vmax.f32 %v1669_v41, %v1671_v12  ;;  %v1550_v35 = vadd.f32 %v1451_v21, %v1249_v40  ;;  %v1617_v37 = vadd.f32 %v4931_v23, %v1549_v52  ;;  %v1672_v10 = vmax.f32 %v1616_v28, 0.0  ;;  %v5975_v52 = vld [vmem:[#allocation74_spill] sm:$0xff] }
 0x20b   :  { %v1453_v55 = vpop.f32.mrf.mxu0  ;;  %v1256_v21 = vadd.f32 %v5081_v31, %v5975_v52 }
 0x20c   :  { %v5140_v54 = vmax.f32 %v1710_v16, %v1711_v11  ;;  %v1618_v36 = vadd.f32 %v4923_v26, %v1550_v35  ;;  %v1551_v34 = vadd.f32 %v1453_v55, %v1250_v13  ;;  %v1673_v4 = vmax.f32 %v1617_v37, 0.0 }
 0x20d   :  { %v1457_v63 = vpop.f32.mrf.mxu0  ;;  %v1257_v35 = vadd.f32 %v5090_v48, %v5976_v45 }
 0x20e   :  { %v1674_v61 = vmax.f32 %v1618_v36, 0.0  ;;  %v1619_v1 = vadd.f32 %v4931_v23, %v1551_v34  ;;  %v1552_v3 = vadd.f32 %v1457_v63, %v1251_v47  ;;  %3457 = vmatmul.mubr.msk.f32.gmra.mxu1 %vm1783_vm2, %v5140_v54  ;;  %3491 = vmatmul.mubr.msk.f32.gmra.mxu0 %vm1783_vm2, %v5140_v54 }
 0x20f   :  { %v1459_v2 = vpop.f32.mrf.mxu0  ;;  %1927 = vmatprep.mubr.f32.mxu1 %v5945_v19  ;;  %2383 = vmatprep.mubr.f32.mxu0 %v5945_v19 }
 0x210   :  { %v1712_v59 = vmax.f32 %v1672_v10, %v1674_v61  ;;  %v1675_v27 = vmax.f32 %v1619_v1, 0.0  ;;  %v1553_v24 = vadd.f32 %v1459_v2, %v1252_v60  ;;  %v1620_v29 = vadd.f32 %v4923_v26, %v1552_v3  ;;  %v5978_v1 = vld [vmem:[#allocation77_spill] sm:$0xff]  ;;  %v1198_v3 = vpop.f32.mrf.mxu1 }
 0x211   :  { %v1463_v58 = vpop.f32.mrf.mxu0  ;;  %v1258_v60 = vadd.f32 %v5105_v50, %v5977_v17  ;;  %v1259_v48 = vadd.f32 %v5114_v7, %v5978_v1  ;;  %v5980_v7 = vld [vmem:[#allocation37_spill] sm:$0xff] }
 0x212   :  { %v1713_v15 = vmax.f32 %v1673_v4, %v1675_v27  ;;  %v1554_v6 = vadd.f32 %v1463_v58, %v1253_v62  ;;  %v1621_v41 = vadd.f32 %v4931_v23, %v1553_v24  ;;  %v1676_v44 = vmax.f32 %v1620_v29, 0.0  ;;  %v5979_v27 = vld [vmem:[#allocation78_spill] sm:$0xff] }
 0x213   :  { %v1465_v40 = vpop.f32.mrf.mxu0  ;;  %v1260_v24 = vadd.f32 %v5129_v32, %v5979_v27  ;;  %v1261_v29 = vadd.f32 %v5138_v25, %v5980_v7  ;;  %v5985_v27 = vld [vmem:[#allocation40_spill] sm:$0xff] }
 0x214   :  { %v5162_v57 = vmax.f32 %v1712_v59, %v1713_v15  ;;  %v1622_v16 = vadd.f32 %v4923_v26, %v1554_v6  ;;  %v1555_v12 = vadd.f32 %v1465_v40, %v1254_v42  ;;  %v1677_v31 = vmax.f32 %v1621_v41, 0.0  ;;  %v1200_v6 = vpop.f32.mrf.mxu1 }
 0x215   :  { %v1469_v39 = vpop.f32.mrf.mxu0 }
 0x216   :  { %v1678_v13 = vmax.f32 %v1622_v16, 0.0  ;;  %v1623_v11 = vadd.f32 %v4931_v23, %v1555_v12  ;;  %v1556_v28 = vadd.f32 %v1469_v39, %v1255_v46  ;;  %3458 = vmatmul.mubr.msk.f32.gmra.mxu1 %vm1783_vm2, %v5162_v57  ;;  %3492 = vmatmul.mubr.msk.f32.gmra.mxu0 %vm1783_vm2, %v5162_v57  ;;  %v5981_v12 = vld [vmem:[#allocation36_spill] sm:$0xff] }
 0x217   :  { %v1471_v47 = vpop.f32.mrf.mxu0  ;;  %1933 = vmatprep.mubr.f32.mxu1 %v5945_v19  ;;  %2389 = vmatprep.mubr.f32.mxu0 %v5945_v19  ;;  %v1262_v52 = vadd.f32 %v5153_v14, %v5981_v12 }
 0x218   :  { %v1714_v55 = vmax.f32 %v1676_v44, %v1678_v13  ;;  %v1679_v37 = vmax.f32 %v1623_v11, 0.0  ;;  %v1557_v36 = vadd.f32 %v1471_v47, %v1256_v21  ;;  %v1624_v10 = vadd.f32 %v4923_v26, %v1556_v28  ;;  %v5982_v13 = vld [vmem:[#allocation39_spill] sm:$0xff]  ;;  %v1204_v11 = vpop.f32.mrf.mxu1 }
 0x219   :  { %v1475_v34 = vpop.f32.mrf.mxu0  ;;  %v1263_v25 = vadd.f32 %v1192_v38, %v5982_v13  ;;  %v5984_v38 = vld [vmem:[#allocation41_spill] sm:$0xff] }
 0x21a   :  { %v1715_v63 = vmax.f32 %v1677_v31, %v1679_v37  ;;  %v1558_v61 = vadd.f32 %v1475_v34, %v1257_v35  ;;  %v1625_v2 = vadd.f32 %v4931_v23, %v1557_v36  ;;  %v1680_v58 = vmax.f32 %v1624_v10, 0.0  ;;  %v1206_v10 = vpop.f32.mrf.mxu1 }
 0x21b   :  { %v1477_v51 = vpop.f32.mrf.mxu0 }
 0x21c   :  { %v5182_v62 = vmax.f32 %v1714_v55, %v1715_v63  ;;  %v1626_v4 = vadd.f32 %v4923_v26, %v1558_v61  ;;  %v1559_v59 = vadd.f32 %v1477_v51, %v1258_v60  ;;  %v1681_v32 = vmax.f32 %v1625_v2, 0.0  ;;  %v5983_v55 = vld [vmem:[#allocation38_spill] sm:$0xff]  ;;  %v1210_v7 = vpop.f32.mrf.mxu1 }
 0x21d   :  { %v1481_v50 = vpop.f32.mrf.mxu0  ;;  %v1264_v37 = vadd.f32 %v1194_v8, %v5983_v55  ;;  %v1265_v63 = vadd.f32 %v1198_v3, %v5984_v38  ;;  %v2101_v2 = vld [vmem:[#allocation4 + $0x200] sm:$0xf]  ;;  %v2099_v3 = vld [vmem:[#allocation4 + $0x1f0] sm:$0xff] }
 0x21e   :  { %v1682_v33 = vmax.f32 %v1626_v4, 0.0  ;;  %v1627_v42 = vadd.f32 %v4931_v23, %v1559_v59  ;;  %v1560_v15 = vadd.f32 %v1481_v50, %v1259_v48  ;;  %3459 = vmatmul.mubr.msk.f32.gmra.mxu1 %vm1783_vm2, %v5182_v62  ;;  %3493 = vmatmul.mubr.msk.f32.gmra.mxu0 %vm1783_vm2, %v5182_v62  ;;  %v2100_v59 = vld [vmem:[#allocation4 + $0x1f8] sm:$0xff]  ;;  %v2095_v55 = vld [vmem:[#allocation4 + $0x1d0] sm:$0xff] }
 0x21f   :  { %v1483_v22 = vpop.f32.mrf.mxu0  ;;  %1939 = vmatprep.mubr.f32.mxu1 %v5945_v19  ;;  %2395 = vmatprep.mubr.f32.mxu0 %v5945_v19 }
 0x220   :  { %v1716_v46 = vmax.f32 %v1680_v58, %v1682_v33  ;;  %v1683_v40 = vmax.f32 %v1627_v42, 0.0  ;;  %v1561_v41 = vadd.f32 %v1483_v22, %v1260_v24  ;;  %v1628_v39 = vadd.f32 %v4923_v26, %v1560_v15  ;;  %v5986_v42 = vld [vmem:[#allocation43_spill] sm:$0xff] }
 0x221   :  { %v1487_v16 = vpop.f32.mrf.mxu0  ;;  %v1266_v24 = vadd.f32 %v1200_v6, %v5985_v27  ;;  %v1267_v15 = vadd.f32 %v1204_v11, %v5986_v42  ;;  %v2085_v42 = vld [vmem:[#allocation4 + $0x180] sm:$0xff] }
 0x222   :  { %v1717_v21 = vmax.f32 %v1681_v32, %v1683_v40  ;;  %v1562_v44 = vadd.f32 %v1487_v16, %v1261_v29  ;;  %v1629_v35 = vadd.f32 %v4931_v23, %v1561_v41  ;;  %v1684_v34 = vmax.f32 %v1628_v39, 0.0  ;;  %v2097_v41 = vld [vmem:[#allocation4 + $0x1e0] sm:$0xff]  ;;  %v2096_v39 = vld [vmem:[#allocation4 + $0x1d8] sm:$0xff] }
 0x223   :  { %v1489_v28 = vpop.f32.mrf.mxu0 }
 0x224   :  { %v5201_v45 = vmax.f32 %v1716_v46, %v1717_v21  ;;  %v1630_v47 = vadd.f32 %v4923_v26, %v1562_v44  ;;  %v1563_v31 = vadd.f32 %v1489_v28, %v1262_v52  ;;  %v1685_v8 = vmax.f32 %v1629_v35, 0.0  ;;  %v5988_v44 = vld [vmem:[#allocation8_spill] sm:$0xff] }
 0x225   :  { %v1493_v36 = vpop.f32.mrf.mxu0  ;;  %v1269_v13 = vadd.f32 %v1210_v7, %v5988_v44  ;;  %v2083_v7 = vld [vmem:[#allocation4 + $0x170] sm:$0xff]  ;;  %v2442_v44 = vld [vmem:[#allocation4 + $0x2f8] sm:$0xff] }
 0x226   :  { %v1686_v14 = vmax.f32 %v1630_v47, 0.0  ;;  %v1631_v17 = vadd.f32 %v4931_v23, %v1563_v31  ;;  %v1564_v60 = vadd.f32 %v1493_v36, %v1263_v25  ;;  %3460 = vmatmul.mubr.msk.f32.gmra.mxu1 %vm1783_vm2, %v5201_v45  ;;  %3494 = vmatmul.mubr.msk.f32.gmra.mxu0 %vm1783_vm2, %v5201_v45  ;;  %v1212_v25 = vpop.f32.mrf.mxu1 }
 0x227   :  { %v1495_v61 = vpop.f32.mrf.mxu0  ;;  %2019 = vmatprep.mubr.f32.mxu1 %v5945_v19  ;;  %2401 = vmatprep.mubr.f32.mxu0 %v5945_v19  ;;  %v1270_v36 = vadd.f32 %v1212_v25, %v4915_v5  ;;  %v2092_v5 = vld [vmem:[#allocation4 + $0x1b8] sm:$0xff]  ;;  %v2440_v25 = vld [vmem:[#allocation4 + $0x2e8] sm:$0xff] }
 0x228   :  { %v1718_v1 = vmax.f32 %v1684_v34, %v1686_v14  ;;  %v1687_v48 = vmax.f32 %v1631_v17, 0.0  ;;  %v1565_v51 = vadd.f32 %v1495_v61, %v1264_v37  ;;  %v1632_v58 = vadd.f32 %v4923_v26, %v1564_v60  ;;  %v2094_v37 = vld [vmem:[#allocation4 + $0x1c8] sm:$0xff]  ;;  %v2093_v60 = vld [vmem:[#allocation4 + $0x1c0] sm:$0xff] }
 0x229   :  { %v1499_v4 = vpop.f32.mrf.mxu0 }
 0x22a   :  { %v1719_v50 = vmax.f32 %v1685_v8, %v1687_v48  ;;  %v1566_v33 = vadd.f32 %v1499_v4, %v1265_v63  ;;  %3463 = vmatmul.mubr.msk.f32.vlgmr.msra.gmra.mxu1 %vm1783_vm2, %v1724_v9  ;;  %v1633_v6 = vadd.f32 %v4931_v23, %v1565_v51  ;;  %v1268_v9 = vadd.f32 %v1206_v10, %v5987_v20  ;;  %v2090_v4 = vld [vmem:[#allocation4 + $0x1a8] sm:$0xff]  ;;  %v2453_v20 = vld [vmem:[#allocation4 + $0x350] sm:$0xff] }
 0x22b   :  { %v1501_v29 = vpop.f32.mrf.mxu0  ;;  %3474 = vmatpush1.msk.msra.mxu1 %vm1814_vm1, %v2101_v2  ;;  %2025 = vmatprep.mubr.f32.mxu1 %v5945_v19  ;;  %v1688_v16 = vmax.f32 %v1632_v58, 0.0 }
 0x22c   :  { %v5223_v22 = vmax.f32 %v1718_v1, %v1719_v50  ;;  %v1634_v32 = vadd.f32 %v4923_v26, %v1566_v33  ;;  %v1567_v46 = vadd.f32 %v1501_v29, %v1266_v24  ;;  %2124 = vmatprep.subr.mxu1 %v2100_v59  ;;  %v1689_v28 = vmax.f32 %v1633_v6, 0.0  ;;  %v2091_v1 = vld [vmem:[#allocation4 + $0x1b0] sm:$0xff]  ;;  %v2089_v24 = vld [vmem:[#allocation4 + $0x1a0] sm:$0xff]  ;;  %v2088_v50 = vld [vmem:[#allocation4 + $0x198] sm:$0xff] }
 0x22d   :  { %v1505_v40 = vpop.f32.mrf.mxu0  ;;  %2125 = vmatpush1.msra.mxu1 %v2099_v3  ;;  %v2086_v33 = vld [vmem:[#allocation4 + $0x188] sm:$0xff]  ;;  %v2081_v6 = vld [vmem:[#allocation4 + $0x160] sm:$0xff] }
 0x22e   :  { %v1690_v12 = vmax.f32 %v1634_v32, 0.0  ;;  %v1635_v52 = vadd.f32 %v4931_v23, %v1567_v46  ;;  %v1568_v21 = vadd.f32 %v1505_v40, %v1267_v15  ;;  %3464 = vmatmul.mubr.msk.f32.gmra.mxu1 %vm1783_vm2, %v4989_v18  ;;  %3495 = vmatmul.mubr.msk.f32.gmra.mxu0 %vm1783_vm2, %v5223_v22  ;;  %v2084_v15 = vld [vmem:[#allocation4 + $0x178] sm:$0xff]  ;;  %v2082_v29 = vld [vmem:[#allocation4 + $0x168] sm:$0xff]  ;;  %v2455_v46 = vld [vmem:[#allocation4 + $0x360] sm:$0xf] }
 0x22f   :  { %v1507_v11 = vpop.f32.mrf.mxu0  ;;  %2031 = vmatprep.mubr.f32.mxu1 %v5945_v19  ;;  %2126 = vmatprep.subr.mxu1 %v2098_v49  ;;  %v2456_v32 = vld [vmem:[#allocation4 + $0x368] sm:$0xf]  ;;  %v2454_v49 = vld [vmem:[#allocation4 + $0x358] sm:$0xff]  ;;  %v2451_v40 = vld [vmem:[#allocation4 + $0x340] sm:$0xff] }
 0x230   :  { %v1720_v35 = vmax.f32 %v1688_v16, %v1690_v12  ;;  %v1691_v47 = vmax.f32 %v1635_v52, 0.0  ;;  %v1569_v31 = vadd.f32 %v1507_v11, %v1268_v9  ;;  %2127 = vmatpush1.msra.mxu1 %v2097_v41  ;;  %2407 = vmatprep.mubr.f32.mxu0 %v5945_v19  ;;  %v1636_v14 = vadd.f32 %v4923_v26, %v1568_v21  ;;  %v2452_v9 = vld [vmem:[#allocation4 + $0x348] sm:$0xff]  ;;  %v2450_v41 = vld [vmem:[#allocation4 + $0x338] sm:$0xff]  ;;  %v2449_v16 = vld [vmem:[#allocation4 + $0x330] sm:$0xff] }
 0x231   :  { %v1511_v18 = vpop.f32.mrf.mxu0  ;;  %2128 = vmatprep.subr.mxu1 %v2096_v39  ;;  %v2448_v12 = vld [vmem:[#allocation4 + $0x328] sm:$0xff]  ;;  %v2446_v52 = vld [vmem:[#allocation4 + $0x318] sm:$0xff]  ;;  %v2445_v21 = vld [vmem:[#allocation4 + $0x310] sm:$0xff] }
 0x232   :  { %v1721_v34 = vmax.f32 %v1689_v28, %v1691_v47  ;;  %v1570_v17 = vadd.f32 %v1511_v18, %v1269_v13  ;;  %3465 = vmatmul.mubr.msk.f32.gmra.mxu1 %vm1783_vm2, %v5015_v0  ;;  %v1637_v10 = vadd.f32 %v4931_v23, %v1569_v31  ;;  %v1692_v48 = vmax.f32 %v1636_v14, 0.0  ;;  %v2444_v39 = vld [vmem:[#allocation4 + $0x308] sm:$0xff]  ;;  %v2441_v13 = vld [vmem:[#allocation4 + $0x2f0] sm:$0xff]  ;;  %v2439_v11 = vld [vmem:[#allocation4 + $0x2e0] sm:$0xff] }
 0x233   :  { %v1513_v38 = vpop.f32.mrf.mxu0  ;;  %2037 = vmatprep.mubr.f32.mxu1 %v5945_v19  ;;  %2129 = vmatpush1.msra.mxu1 %v2095_v55  ;;  %v2438_v28 = vld [vmem:[#allocation4 + $0x2d8] sm:$0xff]  ;;  %v2436_v47 = vld [vmem:[#allocation4 + $0x2c8] sm:$0xff]  ;;  %v2435_v31 = vld [vmem:[#allocation4 + $0x2c0] sm:$0xff] }
 0x234   :  { %v5241_v63 = vmax.f32 %v1720_v35, %v1721_v34  ;;  %v1638_v61 = vadd.f32 %v4923_v26, %v1570_v17  ;;  %v1571_v8 = vadd.f32 %v1513_v38, %v1270_v36  ;;  %2130 = vmatprep.subr.mxu1 %v2094_v37  ;;  %v1693_v26 = vmax.f32 %v1637_v10, 0.0  ;;  %v2437_v35 = vld [vmem:[#allocation4 + $0x2d0] sm:$0xff]  ;;  %v3520_v55 = vld [vmem:[%s5812_s5 + $0x98] sm:$0xff]  ;;  %v2683_v18 = vld [vmem:[%s5812_s5 + $0x20] sm:$0xff] }
 0x235   :  { %2131 = vmatpush1.msra.mxu1 %v2093_v60  ;;  %v3519_v34 = vld [vmem:[%s5812_s5 + $0x90] sm:$0xff]  ;;  %v2682_v17 = vld [vmem:[%s5812_s5 + $0x18] sm:$0xff]  ;;  %v3518_v38 = vld [vmem:[%s5812_s5 + $0x88] sm:$0xff] }
 0x236   :  { %v1694_v51 = vmax.f32 %v1638_v61, 0.0  ;;  %v1639_v2 = vadd.f32 %v4931_v23, %v1571_v8  ;;  %3466 = vmatmul.mubr.msk.f32.gmra.mxu1 %vm1783_vm2, %v5040_v53  ;;  %3496 = vmatmul.mubr.msk.f32.gmra.mxu0 %vm1783_vm2, %v5241_v63  ;;  %v2087_v23 = vld [vmem:[#allocation4 + $0x190] sm:$0xff]  ;;  %v3517_v10 = vld [vmem:[%s5812_s5 + $0x80] sm:$0xff]  ;;  %v2680_v8 = vld [vmem:[%s5812_s5 + $0x8] sm:$0xff] }
 0x237   :  { %2043 = vmatprep.mubr.f32.mxu1 %v5945_v19  ;;  %2132 = vmatprep.subr.mxu1 %v2092_v5  ;;  %v3516_v5 = vld [vmem:[%s5812_s5 + $0x78] sm:$0xff] }
 0x238   :  { %v5251_v59 = vmax.f32 %v1692_v48, %v1694_v51  ;;  %v1695_v27 = vmax.f32 %v1639_v2, 0.0  ;;  %2133 = vmatpush1.msra.mxu1 %v2091_v1  ;;  %v2679_v48 = vld [vmem:[%s5812_s5] sm:$0xff]  ;;  %v3515_v51 = vld [vmem:[%s5812_s5 + $0x70] sm:$0xff]  ;;  %3663 = vmatprep.mubr.msk.f32.mxu0 %vm3871_vm3, %v5945_v19  ;;  %v3514_v2 = vld [vmem:[%s5812_s5 + $0x68] sm:$0xff] }
 0x239   :  { %2134 = vmatprep.subr.mxu1 %v2090_v4 }
 0x23a   :  { %v5253_v58 = vmax.f32 %v1693_v26, %v1695_v27  ;;  %3467 = vmatmul.mubr.msk.f32.gmra.mxu1 %vm1783_vm2, %v5068_v56  ;;  %v3513_v26 = vld [vmem:[%s5812_s5 + $0x60] sm:$0xff]  ;;  %v3512_v27 = vld [vmem:[%s5812_s5 + $0x58] sm:$0xff] }
 0x23b   :  { %2049 = vmatprep.mubr.f32.mxu1 %v5945_v19  ;;  %2135 = vmatpush1.msra.mxu1 %v2089_v24  ;;  %v3511_v24 = vld [vmem:[%s5812_s5 + $0x50] sm:$0xff] }
 0x23c   :  { %v1737_v3 = vmax.f32 %v5251_v59, %v5253_v58  ;;  %2136 = vmatprep.subr.mxu1 %v2088_v50 }
 0x23d   :  { %2137 = vmatpush1.msra.mxu1 %v2087_v23 }
 0x23e   :  { %3468 = vmatmul.mubr.msk.f32.gmra.mxu1 %vm1783_vm2, %v5092_v43  ;;  %2138 = vmatprep.subr.mxu1 %v2086_v33 }
 0x23f   :  { %2055 = vmatprep.mubr.f32.mxu1 %v5945_v19  ;;  %2139 = vmatpush1.msra.mxu1 %v2085_v42 }
 0x240   :  { %2140 = vmatprep.subr.mxu1 %v2084_v15 }
 0x241   :  { %2141 = vmatpush1.msra.mxu1 %v2083_v7 }
 0x242   :  { %3469 = vmatmul.mubr.msk.f32.gmra.mxu1 %vm1783_vm2, %v5116_v30  ;;  %2142 = vmatprep.subr.mxu1 %v2082_v29 }
 0x243   :  { %2061 = vmatprep.mubr.f32.mxu1 %v5945_v19  ;;  %2143 = vmatpush1.msra.mxu1 %v2081_v6 }
 0x244   :  { %3497 = vmatprep.subr.msk.mxu1 %vm1814_vm1, %v2456_v32 }
 0x246   :  { %3470 = vmatmul.mubr.msk.f32.gmra.mxu1 %vm1783_vm2, %v5140_v54 }
 0x247   :  { %2067 = vmatprep.mubr.f32.mxu1 %v5945_v19 }
 0x24a   :  { %3471 = vmatmul.mubr.msk.f32.gmra.mxu1 %vm1783_vm2, %v5162_v57 }
 0x24b   :  { %2073 = vmatprep.mubr.f32.mxu1 %v5945_v19 }
 0x24e   :  { %3472 = vmatmul.mubr.msk.f32.gmra.mxu1 %vm1783_vm2, %v5182_v62 }
 0x24f   :  { %2176 = vmatprep.mubr.f32.mxu1 %v5945_v19 }
 0x252   :  { %3475 = vmatmul.mubr.msk.f32.vlgmr.msra.gmra.mxu1 %vm1783_vm2, %v5015_v0  ;;  %v2447_v0 = vld [vmem:[#allocation4 + $0x320] sm:$0xff] }
 0x253   :  { %3498 = vmatpush1.msk.msra.mxu1 %vm1814_vm1, %v2455_v46  ;;  %2182 = vmatprep.mubr.f32.mxu1 %v5945_v19 }
 0x254   :  { %2478 = vmatprep.subr.mxu1 %v2454_v49 }
 0x255   :  { %2479 = vmatpush1.msra.mxu1 %v2453_v20 }
 0x256   :  { %3476 = vmatmul.mubr.msk.f32.gmra.mxu1 %vm1783_vm2, %v5040_v53  ;;  %2480 = vmatprep.subr.mxu1 %v2452_v9  ;;  %v2443_v53 = vld [vmem:[#allocation4 + $0x300] sm:$0xff] }
 0x257   :  { %2188 = vmatprep.mubr.f32.mxu1 %v5945_v19  ;;  %2481 = vmatpush1.msra.mxu1 %v2451_v40 }
 0x258   :  { %2482 = vmatprep.subr.mxu1 %v2450_v41 }
 0x259   :  { %2483 = vmatpush1.msra.mxu1 %v2449_v16 }
 0x25a   :  { %3477 = vmatmul.mubr.msk.f32.gmra.mxu1 %vm1783_vm2, %v5068_v56  ;;  %2484 = vmatprep.subr.mxu1 %v2448_v12 }
 0x25b   :  { %2194 = vmatprep.mubr.f32.mxu1 %v5945_v19  ;;  %2485 = vmatpush1.msra.mxu1 %v2447_v0 }
 0x25c   :  { %2486 = vmatprep.subr.mxu1 %v2446_v52 }
 0x25d   :  { %2487 = vmatpush1.msra.mxu1 %v2445_v21 }
 0x25e   :  { %3478 = vmatmul.mubr.msk.f32.gmra.mxu1 %vm1783_vm2, %v5092_v43  ;;  %2488 = vmatprep.subr.mxu1 %v2444_v39 }
 0x25f   :  { %2200 = vmatprep.mubr.f32.mxu1 %v5945_v19  ;;  %2489 = vmatpush1.msra.mxu1 %v2443_v53 }
 0x260   :  { %2490 = vmatprep.subr.mxu1 %v2442_v44 }
 0x261   :  { %2491 = vmatpush1.msra.mxu1 %v2441_v13 }
 0x262   :  { %3479 = vmatmul.mubr.msk.f32.gmra.mxu1 %vm1783_vm2, %v5116_v30  ;;  %2492 = vmatprep.subr.mxu1 %v2440_v25 }
 0x263   :  { %2206 = vmatprep.mubr.f32.mxu1 %v5945_v19  ;;  %2493 = vmatpush1.msra.mxu1 %v2439_v11 }
 0x264   :  { %2494 = vmatprep.subr.mxu1 %v2438_v28 }
 0x265   :  { %2495 = vmatpush1.msra.mxu1 %v2437_v35 }
 0x266   :  { %3480 = vmatmul.mubr.msk.f32.gmra.mxu1 %vm1783_vm2, %v5140_v54  ;;  %2496 = vmatprep.subr.mxu1 %v2436_v47 }
 0x267   :  { %2212 = vmatprep.mubr.f32.mxu1 %v5945_v19  ;;  %2497 = vmatpush1.msra.mxu1 %v2435_v31 }
 0x268   :  { %3666 = vmatprep.subr.mxu1 %v5945_v19 }
 0x26a   :  { %3481 = vmatmul.mubr.msk.f32.gmra.mxu1 %vm1783_vm2, %v5162_v57 }
 0x26b   :  { %2218 = vmatprep.mubr.f32.mxu1 %v5945_v19 }
 0x26e   :  { %3482 = vmatmul.mubr.msk.f32.gmra.mxu1 %vm1783_vm2, %v5182_v62 }
 0x26f   :  { %2224 = vmatprep.mubr.f32.mxu1 %v5945_v19 }
 0x272   :  { %3483 = vmatmul.mubr.msk.f32.gmra.mxu1 %vm1783_vm2, %v5201_v45 }
 0x273   :  { %2230 = vmatprep.mubr.f32.mxu1 %v5945_v19 }
 0x276   :  { %3484 = vmatmul.mubr.msk.f32.gmra.mxu1 %vm1783_vm2, %v5223_v22 }
 0x277   :  { %2530 = vmatprep.mubr.f32.mxu1 %v5945_v19 }
 0x27a   :  { %3499 = vmatmul.mubr.msk.f32.vlgmr.msra.gmra.mxu1 %vm1783_vm2, %v5068_v56  ;;  %v2688_v56 = vld [vmem:[%s5812_s5 + $0x48] sm:$0xff] }
 0x27b   :  { %2536 = vmatprep.mubr.f32.mxu1 %v5945_v19  ;;  %3644 = vmatpush3.msra.mxu0 %v2688_v56 }
 0x27c   :  { %3645 = vmatprep.subr.mxu0 %v5945_v19  ;;  %3667 = vmatpush3.msra.mxu1 %v3520_v55 }
 0x27d   :  { %3668 = vmatprep.subr.mxu1 %v5945_v19 }
 0x27e   :  { %3500 = vmatmul.mubr.msk.f32.gmra.mxu1 %vm1783_vm2, %v5092_v43  ;;  %v2687_v43 = vld [vmem:[%s5812_s5 + $0x40] sm:$0xff] }
 0x27f   :  { %2542 = vmatprep.mubr.f32.mxu1 %v5945_v19  ;;  %3646 = vmatpush3.msra.mxu0 %v2687_v43 }
 0x280   :  { %3647 = vmatprep.subr.mxu0 %v5945_v19  ;;  %3669 = vmatpush3.msra.mxu1 %v3519_v34 }
 0x281   :  { %3670 = vmatprep.subr.mxu1 %v5945_v19 }
 0x282   :  { %3501 = vmatmul.mubr.msk.f32.gmra.mxu1 %vm1783_vm2, %v5116_v30  ;;  %v2686_v30 = vld [vmem:[%s5812_s5 + $0x38] sm:$0xff] }
 0x283   :  { %2548 = vmatprep.mubr.f32.mxu1 %v5945_v19  ;;  %3648 = vmatpush3.msra.mxu0 %v2686_v30 }
 0x284   :  { %3649 = vmatprep.subr.mxu0 %v5945_v19  ;;  %3671 = vmatpush3.msra.mxu1 %v3518_v38 }
 0x285   :  { %3672 = vmatprep.subr.mxu1 %v5945_v19 }
 0x286   :  { %3502 = vmatmul.mubr.msk.f32.gmra.mxu1 %vm1783_vm2, %v5140_v54 }
 0x287   :  { %2554 = vmatprep.mubr.f32.mxu1 %v5945_v19  ;;  %3673 = vmatpush3.msra.mxu1 %v3517_v10 }
 0x288   :  { %3674 = vmatprep.subr.mxu1 %v5945_v19 }
 0x289   :  { %3675 = vmatpush3.msra.mxu1 %v3516_v5 }
 0x28a   :  { %3503 = vmatmul.mubr.msk.f32.gmra.mxu1 %vm1783_vm2, %v5162_v57  ;;  %v2685_v57 = vld [vmem:[%s5812_s5 + $0x30] sm:$0xff]  ;;  %3676 = vmatprep.subr.mxu1 %v5945_v19 }
 0x28b   :  { %2560 = vmatprep.mubr.f32.mxu1 %v5945_v19  ;;  %3650 = vmatpush3.msra.mxu0 %v2685_v57 }
 0x28c   :  { %3651 = vmatprep.subr.mxu0 %v5945_v19  ;;  %3677 = vmatpush3.msra.mxu1 %v3515_v51 }
 0x28d   :  { %3678 = vmatprep.subr.mxu1 %v5945_v19 }
 0x28e   :  { %3504 = vmatmul.mubr.msk.f32.gmra.mxu1 %vm1783_vm2, %v5182_v62 }
 0x28f   :  { %2566 = vmatprep.mubr.f32.mxu1 %v5945_v19  ;;  %3679 = vmatpush3.msra.mxu1 %v3514_v2 }
 0x290   :  { %3680 = vmatprep.subr.mxu1 %v5945_v19 }
 0x291   :  { %3681 = vmatpush3.msra.mxu1 %v3513_v26 }
 0x292   :  { %3505 = vmatmul.mubr.msk.f32.gmra.mxu1 %vm1783_vm2, %v5201_v45  ;;  %v2684_v45 = vld [vmem:[%s5812_s5 + $0x28] sm:$0xff]  ;;  %3682 = vmatprep.subr.mxu1 %v5945_v19 }
 0x293   :  { %2572 = vmatprep.mubr.f32.mxu1 %v5945_v19  ;;  %3652 = vmatpush3.msra.mxu0 %v2684_v45 }
 0x294   :  { %3653 = vmatprep.subr.mxu0 %v5945_v19  ;;  %3683 = vmatpush3.msra.mxu1 %v3512_v27 }
 0x295   :  { %3654 = vmatpush3.msra.mxu0 %v2683_v18  ;;  %3684 = vmatprep.subr.mxu1 %v5945_v19 }
 0x296   :  { %3506 = vmatmul.mubr.msk.f32.gmra.mxu1 %vm1783_vm2, %v5223_v22  ;;  %3655 = vmatprep.subr.mxu0 %v5945_v19 }
 0x297   :  { %2578 = vmatprep.mubr.f32.mxu1 %v5945_v19  ;;  %3656 = vmatpush3.msra.mxu0 %v2682_v17 }
 0x298   :  { %3657 = vmatprep.subr.mxu0 %v5945_v19  ;;  %3685 = vmatpush3.msra.mxu1 %v3511_v24 }
 0x299   :  { %3712 = vmatprep.subr.mxu1 %v5945_v19 }
 0x29a   :  { %3507 = vmatmul.mubr.msk.f32.gmra.mxu1 %vm1783_vm2, %v5241_v63  ;;  %v2681_v63 = vld [vmem:[%s5812_s5 + $0x10] sm:$0xff] }
 0x29b   :  { %2584 = vmatprep.mubr.f32.mxu1 %v5945_v19  ;;  %3658 = vmatpush3.msra.mxu0 %v2681_v63 }
 0x29c   :  { %3659 = vmatprep.subr.mxu0 %v5945_v19 }
 0x29d   :  { %3660 = vmatpush3.msra.mxu0 %v2680_v8 }
 0x29e   :  { %3508 = vmatmul.mubr.msk.f32.gmra.mxu1 %vm1783_vm2, %v1737_v3  ;;  %v5351_v54 = vpop.f32.mrf.mxu1  ;;  %3661 = vmatprep.subr.mxu0 %v5945_v19 }
 0x29f   :  { %3662 = vmatpush3.msra.mxu0 %v2679_v48  ;;  %3686 = vmatprep.mubr.msk.f32.mxu1 %vm3871_vm3, %v5945_v19 }
 0x2a0   :  { %v5357_v62 = vpop.f32.mrf.mxu1  ;;  %3689 = vmatprep.subr.mxu0 %v5945_v19 }
 0x2a6   :  { %v5362_v22 = vpop.f32.mrf.mxu1 }
 0x2a8   :  { %v5372_v37 = vpop.f32.mrf.mxu1 }
 0x2ae   :  { %v5375_v36 = vpop.f32.mrf.mxu1 }
 0x2b0   :  { %v1901_v14 = vpop.f32.mrf.mxu1 }
 0x2b6   :  { %v1905_v60 = vpop.f32.mrf.mxu1 }
 0x2b8   :  { %v1907_v61 = vpop.f32.mrf.mxu1 }
 0x2be   :  { %v1911_v1 = vpop.f32.mrf.mxu1 }
 0x2c0   :  { %v1913_v4 = vpop.f32.mrf.mxu1 }
 0x2c6   :  { %v1917_v59 = vpop.f32.mrf.mxu1 }
 0x2c8   :  { %v1919_v50 = vpop.f32.mrf.mxu1 }
 0x2ce   :  { %v1923_v58 = vpop.f32.mrf.mxu1 }
 0x2d0   :  { %v1925_v23 = vpop.f32.mrf.mxu1 }
 0x2d6   :  { %v1929_v33 = vpop.f32.mrf.mxu1 }
 0x2d8   :  { %v1931_v3 = vpop.f32.mrf.mxu1 }
 0x2de   :  { %v1935_v42 = vpop.f32.mrf.mxu1 }
 0x2e0   :  { %v1937_v15 = vpop.f32.mrf.mxu1 }
 0x2e6   :  { %v1941_v7 = vpop.f32.mrf.mxu1 }
 0x2e8   :  { %v1943_v29 = vpop.f32.mrf.mxu1 }
 0x2ea   :  { %v2021_v6 = vpop.f32.mrf.mxu1 }
 0x2ec   :  { %v2023_v32 = vpop.f32.mrf.mxu1 }
 0x2ee   :  { %v2027_v46 = vpop.f32.mrf.mxu1 }
 0x2f0   :  { %v5433_v49 = vpop.f32.mrf.mxu1 }
 0x2f2   :  { %v5435_v20 = vpop.f32.mrf.mxu1 }
 0x2f4   :  { %v2035_v9 = vpop.f32.mrf.mxu1 }
 0x2f5   :  { %v5437_v40 = vadd.f32 %v2035_v9, %v1901_v14  ;;  %v2022_v9 = vadd.f32 %v2021_v6, %v5351_v54  ;;  %v2030_v54 = vadd.f32 %v5433_v49, %v5372_v37 }
 0x2f6   :  { %v2039_v41 = vpop.f32.mrf.mxu1 }
 0x2f7   :  { %v5439_v16 = vadd.f32 %v2039_v41, %v1905_v60 }
 0x2f8   :  { %v2041_v12 = vpop.f32.mrf.mxu1 }
 0x2f9   :  { %v5441_v0 = vadd.f32 %v2041_v12, %v1907_v61 }
 0x2fa   :  { %v2045_v52 = vpop.f32.mrf.mxu1 }
 0x2fb   :  { %v5443_v21 = vadd.f32 %v2045_v52, %v1911_v1  ;;  %v2024_v52 = vadd.f32 %v2023_v32, %v5357_v62  ;;  %v5992_v62 = vld [vmem:[#allocation44_spill] sm:$0xff] }
 0x2fc   :  { %v2047_v39 = vpop.f32.mrf.mxu1  ;;  %v5993_v32 = vsub.s32 0, %v5992_v62 }
 0x2fd   :  { %v5445_v53 = vadd.f32 %v2047_v39, %v1913_v4  ;;  %v2355_v4 = vpop.f32.mrf.mxu0 }
 0x2fe   :  { %v2051_v44 = vpop.f32.mrf.mxu1 }
 0x2ff   :  { %v5447_v13 = vadd.f32 %v2051_v44, %v1917_v59  ;;  %v2357_v27 = vpop.f32.mrf.mxu0 }
 0x300   :  { %v2053_v25 = vpop.f32.mrf.mxu1 }
 0x301   :  { %v5449_v11 = vadd.f32 %v2053_v25, %v1919_v50  ;;  %v2361_v50 = vpop.f32.mrf.mxu0  ;;  %v2028_v25 = vadd.f32 %v2027_v46, %v5362_v22  ;;  %v2034_v22 = vadd.f32 %v5435_v20, %v5375_v36 }
 0x302   :  { %v2057_v28 = vpop.f32.mrf.mxu1 }
 0x303   :  { %v5451_v35 = vadd.f32 %v2057_v28, %v1923_v58 }
 0x304   :  { %v2059_v47 = vpop.f32.mrf.mxu1 }
 0x305   :  { %v5453_v31 = vadd.f32 %v2059_v47, %v1925_v23  ;;  %v2611_v47 = vld [vmem:[%s5811_s4] sm:$0x3] }
 0x306   :  { %v2063_v56 = vpop.f32.mrf.mxu1 }
 0x307   :  { %v5455_v43 = vadd.f32 %v2063_v56, %v1929_v33  ;;  %v2363_v33 = vpop.f32.mrf.mxu0 }
 0x308   :  { %v2065_v30 = vpop.f32.mrf.mxu1 }
 0x309   :  { %v5457_v57 = vadd.f32 %v2065_v30, %v1931_v3 }
 0x30a   :  { %v2069_v45 = vpop.f32.mrf.mxu1 }
 0x30b   :  { %v5459_v55 = vadd.f32 %v2069_v45, %v1935_v42  ;;  %v2367_v42 = vpop.f32.mrf.mxu0 }
 0x30c   :  { %v2071_v18 = vpop.f32.mrf.mxu1 }
 0x30d   :  { %v5461_v34 = vadd.f32 %v2071_v18, %v1937_v15 }
 0x30e   :  { %v2075_v14 = vpop.f32.mrf.mxu1 }
 0x30f   :  { %v5463_v17 = vadd.f32 %v2075_v14, %v1941_v7  ;;  %v5499_v14 = vrot.slane %v2611_v47, %v5993_v32 }
 0x310   :  { %v2077_v60 = vpop.f32.mrf.mxu1 }
 0x311   :  { %v5465_v38 = vadd.f32 %v2077_v60, %v1943_v29  ;;  %v2369_v29 = vpop.f32.mrf.mxu0 }
 0x312   :  { %v2178_v63 = vpop.f32.mrf.mxu1 }
 0x313   :  { %5989 = vst [vmem:[#allocation9_spill] sm:$0xff] %v5465_v38  ;;  %v2373_v12 = vpop.f32.mrf.mxu0  ;;  %v2237_v39 = vadd.f32 %v2178_v63, %v2022_v9  ;;  %v5994_v38 = vsub.s32 1, %v5992_v62 }
 0x314   :  { %v2180_v10 = vpop.f32.mrf.mxu1 }
 0x315   :  { %v2238_v28 = vadd.f32 %v2180_v10, %v2024_v52  ;;  %v2375_v30 = vpop.f32.mrf.mxu0  ;;  %v2414_v45 = vadd.f32 %v2355_v4, %v2237_v39  ;;  %v5505_v37 = vrot.slane %v2611_v47, %v5994_v38 }
 0x316   :  { %v2184_v61 = vpop.f32.mrf.mxu1 }
 0x317   :  { %v2239_v6 = vadd.f32 %v2184_v61, %v2028_v25  ;;  %v2379_v60 = vpop.f32.mrf.mxu0  ;;  %v2415_v10 = vadd.f32 %v2357_v27, %v2238_v28 }
 0x318   :  { %v2186_v8 = vpop.f32.mrf.mxu1 }
 0x319   :  { %v2240_v46 = vadd.f32 %v2186_v8, %v2030_v54  ;;  %v2416_v49 = vadd.f32 %v2361_v50, %v2239_v6  ;;  %v2381_v39 = vpop.f32.mrf.mxu0 }
 0x31a   :  { %v2190_v5 = vpop.f32.mrf.mxu1 }
 0x31b   :  { %v2241_v52 = vadd.f32 %v2190_v5, %v2034_v22  ;;  %v2385_v8 = vpop.f32.mrf.mxu0 }
 0x31c   :  { %v2192_v1 = vpop.f32.mrf.mxu1 }
 0x31d   :  { %v2242_v61 = vadd.f32 %v2192_v1, %v5437_v40  ;;  %v2418_v38 = vadd.f32 %v2367_v42, %v2241_v52 }
 0x31e   :  { %v2196_v48 = vpop.f32.mrf.mxu1 }
 0x31f   :  { %v2243_v36 = vadd.f32 %v2196_v48, %v5439_v16  ;;  %v2419_v40 = vadd.f32 %v2369_v29, %v2242_v61 }
 0x320   :  { %v2198_v51 = vpop.f32.mrf.mxu1 }
 0x321   :  { %v2244_v50 = vadd.f32 %v2198_v51, %v5441_v0  ;;  %v2420_v48 = vadd.f32 %v2373_v12, %v2243_v36  ;;  %v3530_v36 = vld [vmem:[%s5812_s5 + $0xe0] sm:$0xff] }
 0x322   :  { %v2202_v2 = vpop.f32.mrf.mxu1 }
 0x324   :  { %v5467_v26 = vpop.f32.mrf.mxu1 }
 0x325   :  { %v2246_v42 = vadd.f32 %v5467_v26, %v5445_v53  ;;  %v3531_v53 = vld [vmem:[%s5812_s5 + $0xe8] sm:$0xff] }
 0x326   :  { %v5469_v59 = vpop.f32.mrf.mxu1 }
 0x328   :  { %v5471_v24 = vpop.f32.mrf.mxu1 }
 0x329   :  { %v2248_v26 = vadd.f32 %v5471_v24, %v5449_v11 }
 0x32a   :  { %v5473_v58 = vpop.f32.mrf.mxu1 }
 0x32c   :  { %v5475_v23 = vpop.f32.mrf.mxu1 }
 0x32e   :  { %v5477_v3 = vpop.f32.mrf.mxu1 }
 0x330   :  { %v5479_v15 = vpop.f32.mrf.mxu1 }
 0x332   :  { %v5481_v7 = vpop.f32.mrf.mxu1 }
 0x334   :  { %v5484_v41 = vpop.f32.mrf.mxu1 }
 0x336   :  { %v5487_v44 = vpop.f32.mrf.mxu1 }
 0x337   :  { %5990 = vst [vmem:[#allocation46_spill] sm:$0xff] %v5487_v44  ;;  %v2417_v44 = vadd.f32 %v2363_v33, %v2240_v46  ;;  %v2245_v33 = vadd.f32 %v2202_v2, %v5443_v21  ;;  %v2247_v21 = vadd.f32 %v5469_v59, %v5447_v13 }
 0x338   :  { %v5493_v56 = vpop.f32.mrf.mxu1 }
 0x339   :  { %5991 = vst [vmem:[#allocation47_spill] sm:$0xff] %v5493_v56  ;;  %v2422_v12 = vadd.f32 %v2379_v60, %v2245_v33  ;;  %v2424_v11 = vadd.f32 %v2385_v8, %v2247_v21 }
 0x33a   :  { %v2532_v18 = vpop.f32.mrf.mxu1 }
 0x33b   :  { %v2591_v63 = vadd.f32 %v2532_v18, %v2414_v45  ;;  %v2387_v18 = vpop.f32.mrf.mxu0 }
 0x33c   :  { %v2534_v9 = vpop.f32.mrf.mxu1 }
 0x33d   :  { %v2592_v56 = vadd.f32 %v2534_v9, %v2415_v10  ;;  %v2623_v25 = vadd.f32 %v5499_v14, %v2591_v63  ;;  %v2391_v51 = vpop.f32.mrf.mxu0  ;;  %v2421_v10 = vadd.f32 %v2375_v30, %v2244_v50  ;;  %v3529_v50 = vld [vmem:[%s5812_s5 + $0xd8] sm:$0xff] }
 0x33e   :  { %v2538_v4 = vpop.f32.mrf.mxu1 }
 0x33f   :  { %v2593_v32 = vadd.f32 %v2538_v4, %v2416_v49  ;;  %v2624_v5 = vadd.f32 %v5505_v37, %v2592_v56  ;;  %v2643_v1 = vmax.f32 %v2623_v25, 0.0  ;;  %v2423_v4 = vadd.f32 %v2381_v39, %v2246_v42  ;;  %v2393_v25 = vpop.f32.mrf.mxu0 }
 0x340   :  { %v2540_v20 = vpop.f32.mrf.mxu1 }
 0x341   :  { %v2625_v27 = vadd.f32 %v5499_v14, %v2593_v32  ;;  %v2594_v28 = vadd.f32 %v2540_v20, %v2417_v44  ;;  %v2644_v62 = vmax.f32 %v2624_v5, 0.0  ;;  %v2249_v20 = vadd.f32 %v5473_v58, %v5451_v35  ;;  %v2397_v24 = vpop.f32.mrf.mxu0 }
 0x342   :  { %v2544_v47 = vpop.f32.mrf.mxu1  ;;  %v2250_v35 = vadd.f32 %v5475_v23, %v5453_v31 }
 0x343   :  { %v2645_v54 = vmax.f32 %v2625_v27, 0.0  ;;  %v2626_v6 = vadd.f32 %v5505_v37, %v2594_v28  ;;  %v2595_v45 = vadd.f32 %v2544_v47, %v2418_v38  ;;  %v2426_v33 = vadd.f32 %v2391_v51, %v2249_v20  ;;  %v2399_v31 = vpop.f32.mrf.mxu0 }
 0x344   :  { %v2546_v16 = vpop.f32.mrf.mxu1 }
 0x345   :  { %v2663_v56 = vmax.f32 %v2643_v1, %v2645_v54  ;;  %v2646_v22 = vmax.f32 %v2626_v6, 0.0  ;;  %v2596_v46 = vadd.f32 %v2546_v16, %v2419_v40  ;;  %v2627_v44 = vadd.f32 %v5499_v14, %v2595_v45  ;;  %v3528_v54 = vld [vmem:[%s5812_s5 + $0xd0] sm:$0xff] }
 0x346   :  { %v2550_v0 = vpop.f32.mrf.mxu1  ;;  %v2425_v1 = vadd.f32 %v2387_v18, %v2248_v26  ;;  %v2251_v6 = vadd.f32 %v5477_v3, %v5455_v43  ;;  %v3527_v18 = vld [vmem:[%s5812_s5 + $0xc8] sm:$0xff]  ;;  %v3542_v43 = vld [vmem:[%s5812_s5 + $0x138] sm:$0xff]  ;;  %v2252_v3 = vadd.f32 %v5479_v15, %v5457_v57  ;;  %v3541_v57 = vld [vmem:[%s5812_s5 + $0x130] sm:$0xff]  ;;  %v2253_v15 = vadd.f32 %v5481_v7, %v5459_v55 }
 0x347   :  { %v2664_v29 = vmax.f32 %v2644_v62, %v2646_v22  ;;  %v2597_v63 = vadd.f32 %v2550_v0, %v2420_v48  ;;  %v2628_v52 = vadd.f32 %v5505_v37, %v2596_v46  ;;  %v2647_v13 = vmax.f32 %v2627_v44, 0.0  ;;  %v2403_v46 = vpop.f32.mrf.mxu0  ;;  %v3526_v44 = vld [vmem:[%s5812_s5 + $0xc0] sm:$0xff]  ;;  %v3540_v55 = vld [vmem:[%s5812_s5 + $0x128] sm:$0xff] }
 0x348   :  { %v2552_v2 = vpop.f32.mrf.mxu1  ;;  %v2427_v22 = vadd.f32 %v2393_v25, %v2250_v35  ;;  %v2254_v7 = vadd.f32 %v5484_v41, %v5461_v34  ;;  %v3524_v25 = vld [vmem:[%s5812_s5 + $0xb0] sm:$0xff]  ;;  %v3539_v34 = vld [vmem:[%s5812_s5 + $0x120] sm:$0xff] }
 0x349   :  { %v2673_v9 = vmax.f32 %v2663_v56, %v2664_v29  ;;  %v2629_v49 = vadd.f32 %v5499_v14, %v2597_v63  ;;  %v2598_v61 = vadd.f32 %v2552_v2, %v2421_v10  ;;  %v2648_v39 = vmax.f32 %v2628_v52, 0.0  ;;  %v3525_v52 = vld [vmem:[%s5812_s5 + $0xb8] sm:$0xff]  ;;  %v5995_v41 = vld [vmem:[#allocation46_spill] sm:$0xff] }
 0x34a   :  { %v2556_v30 = vpop.f32.mrf.mxu1  ;;  %v2428_v10 = vadd.f32 %v2397_v24, %v2251_v6  ;;  %v3538_v24 = vld [vmem:[%s5812_s5 + $0x118] sm:$0xff] }
 0x34b   :  { %v2649_v59 = vmax.f32 %v2629_v49, 0.0  ;;  %v2630_v60 = vadd.f32 %v5505_v37, %v2598_v61  ;;  %v2599_v32 = vadd.f32 %v2556_v30, %v2422_v12  ;;  %3664 = vmatmul.mubr.msk.f32.vlgmr.msra.gmra.mxu0 %vm2689_vm4, %v2673_v9  ;;  %v2429_v61 = vadd.f32 %v2399_v31, %v2252_v3 }
 0x34c   :  { %3690 = vmatpush3.msra.mxu0 %v3531_v53  ;;  %v2558_v5 = vpop.f32.mrf.mxu1  ;;  %3709 = vmatprep.mubr.msk.f32.mxu0 %vm3871_vm3, %v5945_v19  ;;  %v2405_v53 = vpop.f32.mrf.mxu0 }
 0x34d   :  { %v2665_v27 = vmax.f32 %v2647_v13, %v2649_v59  ;;  %v2650_v28 = vmax.f32 %v2630_v60, 0.0  ;;  %v2600_v38 = vadd.f32 %v2558_v5, %v2423_v4  ;;  %3691 = vmatprep.subr.mxu0 %v5945_v19  ;;  %v2631_v47 = vadd.f32 %v5499_v14, %v2599_v32 }
 0x34e   :  { %3692 = vmatpush3.msra.mxu0 %v3530_v36  ;;  %v2562_v58 = vpop.f32.mrf.mxu1  ;;  %v2255_v13 = vadd.f32 %v5995_v41, %v5463_v17  ;;  %v2430_v32 = vadd.f32 %v2403_v46, %v2253_v15  ;;  %v2409_v36 = vpop.f32.mrf.mxu0  ;;  %v3523_v17 = vld [vmem:[%s5812_s5 + $0xa8] sm:$0xff]  ;;  %v3535_v46 = vld [vmem:[%s5812_s5 + $0x100] sm:$0xff]  ;;  %v3534_v15 = vld [vmem:[%s5812_s5 + $0xf8] sm:$0xff] }
 0x34f   :  { %v2666_v8 = vmax.f32 %v2648_v39, %v2650_v28  ;;  %v2601_v40 = vadd.f32 %v2562_v58, %v2424_v11  ;;  %3693 = vmatprep.subr.mxu0 %v5945_v19  ;;  %v2632_v16 = vadd.f32 %v5505_v37, %v2600_v38  ;;  %v2651_v42 = vmax.f32 %v2631_v47, 0.0  ;;  %v5996_v39 = vld [vmem:[#allocation9_spill] sm:$0xff]  ;;  %v3123_v41 = vld [vmem:[%s5814_s7 + $0x60] sm:$0xff] }
 0x350   :  { %3694 = vmatpush3.msra.mxu0 %v3529_v50  ;;  %v2564_v45 = vpop.f32.mrf.mxu1  ;;  %v2431_v50 = vadd.f32 %v2405_v53, %v2254_v7  ;;  %v2432_v6 = vadd.f32 %v2409_v36, %v2255_v13  ;;  %v3547_v53 = vld [vmem:[%s5812_s5 + $0x158] sm:$0xff] }
 0x351   :  { %v2674_v23 = vmax.f32 %v2665_v27, %v2666_v8  ;;  %v2633_v48 = vadd.f32 %v5499_v14, %v2601_v40  ;;  %v2602_v62 = vadd.f32 %v2564_v45, %v2425_v1  ;;  %3695 = vmatprep.subr.mxu0 %v5945_v19  ;;  %v2652_v21 = vmax.f32 %v2632_v16, 0.0  ;;  %v5997_v27 = vld [vmem:[#allocation47_spill] sm:$0xff]  ;;  %v3522_v40 = vld [vmem:[%s5812_s5 + $0xa0] sm:$0xff]  ;;  %v3537_v1 = vld [vmem:[%s5812_s5 + $0x110] sm:$0xff]  ;;  %v2411_v45 = vpop.f32.mrf.mxu0 }
 0x352   :  { %3696 = vmatpush3.msra.mxu0 %v3528_v54  ;;  %v2568_v56 = vpop.f32.mrf.mxu1  ;;  %v2256_v28 = vadd.f32 %v5997_v27, %v5996_v39  ;;  %v3122_v13 = vld [vmem:[%s5814_s7 + $0x58] sm:$0xff]  ;;  %v3112_v39 = vld [vmem:[%s5814_s7 + $0x8] sm:$0xff]  ;;  %v3111_v27 = vld [vmem:[%s5814_s7] sm:$0xff] }
 0x353   :  { %v2653_v0 = vmax.f32 %v2633_v48, 0.0  ;;  %v2634_v51 = vadd.f32 %v5505_v37, %v2602_v62  ;;  %v2603_v29 = vadd.f32 %v2568_v56, %v2426_v33  ;;  %3697 = vmatprep.subr.mxu0 %v5945_v19  ;;  %3687 = vmatmul.mubr.msk.f32.vlgmr.msra.gmra.mxu1 %vm2689_vm4, %v2674_v23  ;;  %v3536_v48 = vld [vmem:[%s5812_s5 + $0x108] sm:$0xff]  ;;  %v3118_v36 = vld [vmem:[%s5814_s7 + $0x38] sm:$0xff] }
 0x354   :  { %3698 = vmatpush3.msra.mxu0 %v3527_v18  ;;  %3713 = vmatpush3.msra.mxu1 %v3542_v43  ;;  %v2570_v63 = vpop.f32.mrf.mxu1  ;;  %v3553_v18 = vld [vmem:[%s5812_s5 + $0x188] sm:$0xff]  ;;  %v2433_v43 = vadd.f32 %v2411_v45, %v2256_v28  ;;  %v3218_v28 = vld [vmem:[%s5816_s9 + $0x50] sm:$0xf] }
 0x355   :  { %v5571_v2 = vmax.f32 %v2651_v42, %v2653_v0  ;;  %v2654_v12 = vmax.f32 %v2634_v51, 0.0  ;;  %v2604_v9 = vadd.f32 %v2570_v63, %v2427_v22  ;;  %3699 = vmatprep.subr.mxu0 %v5945_v19  ;;  %3714 = vmatprep.subr.mxu1 %v5945_v19  ;;  %v2635_v30 = vadd.f32 %v5499_v14, %v2603_v29  ;;  %v3552_v51 = vld [vmem:[%s5812_s5 + $0x180] sm:$0xff]  ;;  %v3551_v63 = vld [vmem:[%s5812_s5 + $0x178] sm:$0xff] }
 0x356   :  { %3700 = vmatpush3.msra.mxu0 %v3526_v44  ;;  %3715 = vmatpush3.msra.mxu1 %v3541_v57  ;;  %v2574_v49 = vpop.f32.mrf.mxu1 }
 0x357   :  { %v2668_v26 = vmax.f32 %v2652_v21, %v2654_v12  ;;  %v2605_v4 = vadd.f32 %v2574_v49, %v2428_v10  ;;  %3701 = vmatprep.subr.mxu0 %v5945_v19  ;;  %3716 = vmatprep.subr.mxu1 %v5945_v19  ;;  %v2636_v59 = vadd.f32 %v5505_v37, %v2604_v9  ;;  %v2655_v35 = vmax.f32 %v2635_v30, 0.0  ;;  %v3550_v12 = vld [vmem:[%s5812_s5 + $0x170] sm:$0xff]  ;;  %v3548_v49 = vld [vmem:[%s5812_s5 + $0x160] sm:$0xff]  ;;  %v3545_v30 = vld [vmem:[%s5812_s5 + $0x148] sm:$0xff] }
 0x358   :  { %3702 = vmatpush3.msra.mxu0 %v3525_v52  ;;  %3717 = vmatpush3.msra.mxu1 %v3540_v55  ;;  %v2576_v60 = vpop.f32.mrf.mxu1 }
 0x359   :  { %v2675_v20 = vmax.f32 %v5571_v2, %v2668_v26  ;;  %v2637_v5 = vadd.f32 %v5499_v14, %v2605_v4  ;;  %v2606_v11 = vadd.f32 %v2576_v60, %v2429_v61  ;;  %3703 = vmatprep.subr.mxu0 %v5945_v19  ;;  %3718 = vmatprep.subr.mxu1 %v5945_v19  ;;  %v2656_v33 = vmax.f32 %v2636_v59, 0.0  ;;  %v3546_v26 = vld [vmem:[%s5812_s5 + $0x150] sm:$0xff]  ;;  %v3544_v4 = vld [vmem:[%s5812_s5 + $0x140] sm:$0xff]  ;;  %v3120_v60 = vld [vmem:[%s5814_s7 + $0x48] sm:$0xff] }
 0x35a   :  { %3704 = vmatpush3.msra.mxu0 %v3524_v25  ;;  %3719 = vmatpush3.msra.mxu1 %v3539_v34  ;;  %v2580_v38 = vpop.f32.mrf.mxu1  ;;  %v3125_v25 = vld [vmem:[%s5814_s7 + $0x70] sm:$0xff]  ;;  %v3124_v34 = vld [vmem:[%s5814_s7 + $0x68] sm:$0xff] }
 0x35b   :  { %v2657_v58 = vmax.f32 %v2637_v5, 0.0  ;;  %v2638_v8 = vadd.f32 %v5505_v37, %v2606_v11  ;;  %v2607_v47 = vadd.f32 %v2580_v38, %v2430_v32  ;;  %3705 = vmatprep.subr.mxu0 %v5945_v19  ;;  %3720 = vmatprep.subr.mxu1 %v5945_v19  ;;  %v3121_v59 = vld [vmem:[%s5814_s7 + $0x50] sm:$0xff]  ;;  %v3119_v32 = vld [vmem:[%s5814_s7 + $0x40] sm:$0xff]  ;;  %v3116_v5 = vld [vmem:[%s5814_s7 + $0x28] sm:$0xff] }
 0x35c   :  { %3706 = vmatpush3.msra.mxu0 %v3523_v17  ;;  %3721 = vmatpush3.msra.mxu1 %v3538_v24  ;;  %v2582_v54 = vpop.f32.mrf.mxu1  ;;  %v3115_v11 = vld [vmem:[%s5814_s7 + $0x20] sm:$0xff]  ;;  %v3114_v17 = vld [vmem:[%s5814_s7 + $0x18] sm:$0xff]  ;;  %v3113_v24 = vld [vmem:[%s5814_s7 + $0x10] sm:$0xff] }
 0x35d   :  { %v2669_v31 = vmax.f32 %v2655_v35, %v2657_v58  ;;  %v2658_v23 = vmax.f32 %v2638_v8, 0.0  ;;  %v2608_v16 = vadd.f32 %v2582_v54, %v2431_v50  ;;  %3707 = vmatprep.subr.mxu0 %v5945_v19  ;;  %3722 = vmatprep.subr.mxu1 %v5945_v19  ;;  %v2639_v56 = vadd.f32 %v5499_v14, %v2607_v47  ;;  %v3217_v38 = vld [vmem:[%s5816_s9 + $0x48] sm:$0xff]  ;;  %v3216_v50 = vld [vmem:[%s5816_s9 + $0x40] sm:$0xff]  ;;  %v3215_v35 = vld [vmem:[%s5816_s9 + $0x38] sm:$0xff] }
 0x35e   :  { %3708 = vmatpush3.msra.mxu0 %v3522_v40  ;;  %3723 = vmatpush3.msra.mxu1 %v3537_v1  ;;  %v2586_v62 = vpop.f32.mrf.mxu1  ;;  %v3214_v58 = vld [vmem:[%s5816_s9 + $0x30] sm:$0xff]  ;;  %v3213_v8 = vld [vmem:[%s5816_s9 + $0x28] sm:$0xff]  ;;  %v3212_v47 = vld [vmem:[%s5816_s9 + $0x20] sm:$0xff] }
 0x35f   :  { %v2670_v3 = vmax.f32 %v2656_v33, %v2658_v23  ;;  %v2609_v22 = vadd.f32 %v2586_v62, %v2432_v6  ;;  %3710 = vmatmul.mubr.msk.f32.vlgmr.msra.gmra.mxu0 %vm2689_vm4, %v2675_v20  ;;  %3724 = vmatprep.subr.mxu1 %v5945_v19  ;;  %v2640_v42 = vadd.f32 %v5505_v37, %v2608_v16  ;;  %v2659_v10 = vmax.f32 %v2639_v56, 0.0  ;;  %v3117_v20 = vld [vmem:[%s5814_s7 + $0x30] sm:$0xff]  ;;  %v3211_v40 = vld [vmem:[%s5816_s9 + $0x18] sm:$0xff]  ;;  %v3510_v16 = vld [vmem:[%s5813_s6] ss:$0 sm:$0xff] }
 0x360   :  { %3735 = vmatprep.subr.mxu0 %v5945_v19  ;;  %3725 = vmatpush3.msra.mxu1 %v3536_v48  ;;  %v2588_v0 = vpop.f32.mrf.mxu1 }
 0x361   :  { %v2676_v29 = vmax.f32 %v2669_v31, %v2670_v3  ;;  %v2641_v44 = vadd.f32 %v5499_v14, %v2609_v22  ;;  %3736 = vmatpush3.msra.mxu0 %v3553_v18  ;;  %v2610_v57 = vadd.f32 %v2588_v0, %v2433_v43  ;;  %3726 = vmatprep.subr.mxu1 %v5945_v19  ;;  %v3533_v14 = vld [vmem:[%s5812_s5 + $0xf0] sm:$0xff]  ;;  %v2660_v9 = vmax.f32 %v2640_v42, 0.0 }
 0x362   :  { %3737 = vmatprep.subr.mxu0 %v5945_v19  ;;  %3727 = vmatpush3.msra.mxu1 %v3535_v46  ;;  %v3210_v0 = vld [vmem:[%s5816_s9 + $0x10] sm:$0xff] }
 0x363   :  { %v2661_v21 = vmax.f32 %v2641_v44, 0.0  ;;  %v2642_v2 = vadd.f32 %v5505_v37, %v2610_v57  ;;  %3738 = vmatpush3.msra.mxu0 %v3552_v51  ;;  %3728 = vmatprep.subr.mxu1 %v5945_v19  ;;  %v3549_v37 = vld [vmem:[%s5812_s5 + $0x168] sm:$0xff]  ;;  %v3555_v44 = vld [vmem:[%s5815_s8] ss:$0 sm:$0xff] }
 0x364   :  { %3739 = vmatprep.subr.mxu0 %v5945_v19  ;;  %3729 = vmatpush3.msra.mxu1 %v3534_v15  ;;  %v3209_v51 = vld [vmem:[%s5816_s9 + $0x8] sm:$0xff] }
 0x365   :  { %v2671_v52 = vmax.f32 %v2659_v10, %v2661_v21  ;;  %v2662_v55 = vmax.f32 %v2642_v2, 0.0  ;;  %3740 = vmatpush3.msra.mxu0 %v3551_v63  ;;  %3730 = vmatprep.subr.mxu1 %v5945_v19  ;;  %v3557_v21 = vld [vmem:[%s5817_s10] ss:$0 sm:$0xff] }
 0x366   :  { %3741 = vmatprep.subr.mxu0 %v5945_v19  ;;  %3731 = vmatpush3.msra.mxu1 %v3533_v14 }
 0x367   :  { %v2672_v7 = vmax.f32 %v2660_v9, %v2662_v55  ;;  %3732 = vmatprep.mubr.msk.f32.mxu1 %vm3871_vm3, %v5945_v19  ;;  %3742 = vmatpush3.msra.mxu0 %v3550_v12 }
 0x368   :  { %3733 = vmatmul.mubr.msk.f32.vlgmr.msra.gmra.mxu1 %vm2689_vm4, %v2676_v29  ;;  %3743 = vmatprep.subr.mxu0 %v5945_v19  ;;  %v3208_v29 = vld [vmem:[%s5816_s9] sm:$0xff] }
 0x369   :  { %v2677_v61 = vmax.f32 %v2671_v52, %v2672_v7  ;;  %3744 = vmatpush3.msra.mxu0 %v3549_v37  ;;  %3755 = vmatprep.mubr.msk.f32.mxu0 %vm3871_vm3, %v5945_v19 }
 0x36a   :  { %3745 = vmatprep.subr.mxu0 %v5945_v19  ;;  %3758 = vmatprep.subr.mxu1 %v5945_v19 }
 0x36b   :  { %3746 = vmatpush3.msra.mxu0 %v3548_v49  ;;  %3788 = vmatprep.mubr.msk.f32.mxu1 %vm3871_vm3, %v5945_v19 }
 0x36c   :  { %3747 = vmatprep.subr.mxu0 %v5945_v19  ;;  %3759 = vmatpush3.msra.mxu1 %v3125_v25 }
 0x36d   :  { %3748 = vmatpush3.msra.mxu0 %v3547_v53  ;;  %3760 = vmatprep.subr.mxu1 %v5945_v19 }
 0x36e   :  { %3749 = vmatprep.subr.mxu0 %v5945_v19  ;;  %3761 = vmatpush3.msra.mxu1 %v3124_v34 }
 0x36f   :  { %3750 = vmatpush3.msra.mxu0 %v3546_v26  ;;  %3762 = vmatprep.subr.mxu1 %v5945_v19 }
 0x370   :  { %3751 = vmatprep.subr.mxu0 %v5945_v19  ;;  %3763 = vmatpush3.msra.mxu1 %v3123_v41 }
 0x371   :  { %3752 = vmatpush3.msra.mxu0 %v3545_v30  ;;  %3764 = vmatprep.subr.mxu1 %v5945_v19 }
 0x372   :  { %3753 = vmatprep.subr.mxu0 %v5945_v19  ;;  %3765 = vmatpush3.msra.mxu1 %v3122_v13 }
 0x373   :  { %3754 = vmatpush3.msra.mxu0 %v3544_v4  ;;  %3766 = vmatprep.subr.mxu1 %v5945_v19 }
 0x374   :  { %3756 = vmatmul.mubr.msk.f32.vlgmr.msra.gmra.mxu0 %vm2689_vm4, %v2677_v61  ;;  %3791 = vmatprep.subr.mxu0 %v5945_v19 }
 0x375   :  { %3813 = vmatprep.mubr.msk.f32.mxu0 %vm3871_vm3, %v5945_v19  ;;  %3767 = vmatpush3.msra.mxu1 %v3121_v59 }
 0x376   :  { %3768 = vmatprep.subr.mxu1 %v5945_v19  ;;  %3792 = vmatpush3.msk.msra.mxu0 %vm1814_vm1, %v3218_v28 }
 0x377   :  { %3769 = vmatpush3.msra.mxu1 %v3120_v60  ;;  %3793 = vmatprep.subr.mxu0 %v5945_v19 }
 0x378   :  { %3770 = vmatprep.subr.mxu1 %v5945_v19  ;;  %3794 = vmatpush3.msra.mxu0 %v3217_v38 }
 0x379   :  { %3771 = vmatpush3.msra.mxu1 %v3119_v32  ;;  %3795 = vmatprep.subr.mxu0 %v5945_v19 }
 0x37a   :  { %3772 = vmatprep.subr.mxu1 %v5945_v19  ;;  %3796 = vmatpush3.msra.mxu0 %v3216_v50 }
 0x37b   :  { %3773 = vmatpush3.msra.mxu1 %v3118_v36  ;;  %3797 = vmatprep.subr.mxu0 %v5945_v19 }
 0x37c   :  { %3774 = vmatprep.subr.mxu1 %v5945_v19  ;;  %3798 = vmatpush3.msra.mxu0 %v3215_v35 }
 0x37d   :  { %3775 = vmatpush3.msra.mxu1 %v3117_v20  ;;  %3799 = vmatprep.subr.mxu0 %v5945_v19 }
 0x37e   :  { %3776 = vmatprep.subr.mxu1 %v5945_v19  ;;  %3800 = vmatpush3.msra.mxu0 %v3214_v58 }
 0x37f   :  { %3777 = vmatpush3.msra.mxu1 %v3116_v5  ;;  %3801 = vmatprep.subr.mxu0 %v5945_v19 }
 0x380   :  { %3778 = vmatprep.subr.mxu1 %v5945_v19  ;;  %3802 = vmatpush3.msra.mxu0 %v3213_v8 }
 0x381   :  { %3779 = vmatpush3.msra.mxu1 %v3115_v11  ;;  %3803 = vmatprep.subr.mxu0 %v5945_v19 }
 0x382   :  { %3780 = vmatprep.subr.mxu1 %v5945_v19  ;;  %3804 = vmatpush3.msra.mxu0 %v3212_v47 }
 0x383   :  { %3781 = vmatpush3.msra.mxu1 %v3114_v17  ;;  %3805 = vmatprep.subr.mxu0 %v5945_v19 }
 0x384   :  { %3782 = vmatprep.subr.mxu1 %v5945_v19  ;;  %3806 = vmatpush3.msra.mxu0 %v3211_v40 }
 0x385   :  { %3783 = vmatpush3.msra.mxu1 %v3113_v24  ;;  %3807 = vmatprep.subr.mxu0 %v5945_v19 }
 0x386   :  { %3784 = vmatprep.subr.mxu1 %v5945_v19  ;;  %3808 = vmatpush3.msra.mxu0 %v3210_v0 }
 0x387   :  { %3785 = vmatpush3.msra.mxu1 %v3112_v39  ;;  %3809 = vmatprep.subr.mxu0 %v5945_v19 }
 0x388   :  { %3786 = vmatprep.subr.mxu1 %v5945_v19  ;;  %3810 = vmatpush3.msra.mxu0 %v3209_v51 }
 0x389   :  { %3787 = vmatpush3.msra.mxu1 %v3111_v27  ;;  %3811 = vmatprep.subr.mxu0 %v5945_v19 }
 0x38a   :  { %3812 = vmatpush3.msra.mxu0 %v3208_v29 }
 0x40b   :  { %v2759_v1 = vpop.f32.mrf.mxu0 }
 0x40c   :  { %v2769_v62 = vadd.f32 %v3510_v16, %v2759_v1 }
 0x40d   :  { %v3665_v54 = vpop.f32.mrf.mxu0 }
 0x413   :  { %v2850_v6 = vpop.f32.mrf.mxu1 }
 0x414   :  { %v2854_v18 = vadd.f32 %v2850_v6, %v2769_v62 }
 0x415   :  { %v3688_v45 = vpop.f32.mrf.mxu1 }
 0x41f   :  { %v2935_v33 = vpop.f32.mrf.mxu0 }
 0x420   :  { %v2939_v43 = vadd.f32 %v2935_v33, %v2854_v18 }
 0x421   :  { %v3711_v31 = vpop.f32.mrf.mxu0 }
 0x428   :  { %v3020_v23 = vpop.f32.mrf.mxu1 }
 0x429   :  { %v3024_v3 = vadd.f32 %v3020_v23, %v2939_v43 }
 0x42a   :  { %v3734_v48 = vpop.f32.mrf.mxu1 }
 0x434   :  { %v3105_v56 = vpop.f32.mrf.mxu0 }
 0x435   :  { %v3109_v22 = vadd.f32 %v3105_v56, %v3024_v3 }
 0x436   :  { %v3757_v46 = vpop.f32.mrf.mxu0 }
 0x437   :  { %v3110_v42 = vmax.f32 %v3109_v22, 0.0 }
 0x439   :  { %3789 = vmatmul.mubr.msk.f32.vlgmr.msra.gmra.mxu1 %vm3133_vm5, %v3110_v42 }
 0x4f9   :  { %v3203_v57 = vpop.f32.mrf.mxu1 }
 0x4fa   :  { %v3204_v15 = vadd.f32 %v3555_v44, %v3203_v57 }
 0x4fb   :  { %v3790_v63 = vpop.f32.mrf.mxu1 }
 0x4fc   :  { %v3207_v10 = vmax.f32 %v3204_v15, 0.0 }
 0x4fe   :  { %3814 = vmatmul.mubr.msk.f32.vlgmr.msra.gmra.mxu0 %vm1783_vm2, %v3207_v10 }
 0x5be   :  { %v3298_v19 = vpop.f32.mrf.mxu0 }
 0x5bf   :  { %v3299_v2 = vadd.f32 %v3557_v21, %v3298_v19 }
 0x5c0   :  { %v3815_v14 = vpop.f32.mrf.mxu0 }
 0x5c1   :  { %3302 = vst [vmem:[%s5818_s11] sm:$0xff] %v3299_v2 }
 0x5c2   :  { %3307 = vsyncpa [#allocation3], 1 }
 0x5c3   :  { %3308 = vsyncpa [#allocation5], 1 }

</bundles_post_ra>
